<compile_context>
chip_gen: v7x
topology: tpu7x:2x2x1
jax: 0.10.0
libtpu: 0.0.40
codegen_flags: <defaults>
</compile_context>

<pallas_src>
import functools

import numpy as np
import jax
import jax.numpy as jnp
from jax import lax
from jax.experimental import pallas as pl
from jax.experimental.pallas import tpu as pltpu

LRELU_SLOPE = 0.2
BN_EPS = 1e-5
# 32 MiB scoped VMEM is safe on every generation (v5e/v6e: 128 MiB physical,
# v7x: 64 MiB physical / 32 MiB default scoped limit).
_VMEM_LIMIT = 32 * 1024 * 1024


# ----------------------------- Pallas kernels -----------------------------

def _conv_body(z_ref, w_ref, s_ref, b_ref, *, th, wo, k4c):
    """Fused Conv2d(k=4, s=2, p=1, bias=False) + BN affine + LeakyReLU block.

    z_ref : (th+1, wo+1, 4*Cin)  phase-packed padded input rows (+1 halo row/col)
    w_ref : (4, 4*Cin, Cout)     weight, first index = output-pixel shift 2a+b
    s_ref, b_ref : (1, Cout)     folded eval-mode BatchNorm scale / bias (f32)
    Returns y : (th*wo, Cout) f32 activations for this row block.
    """
    cout = w_ref.shape[-1]
    acc = jnp.zeros((th * wo, cout), jnp.float32)
    # 4 MXU matmuls (a, b = output shifts); K = 4*Cin per matmul.
    # TODO(synk): for very deep/wide configs (4*Cin in the thousands) a K grid
    #   axis with a VMEM accumulator would bound the block further; not needed
    #   at these channel counts.
    for a in range(2):
        for b in range(2):
            xs = z_ref[a:a + th, b:b + wo, :].reshape(th * wo, k4c)
            acc = acc + jnp.dot(xs, w_ref[2 * a + b],
                                preferred_element_type=jnp.float32)
    y = acc * s_ref[...] + b_ref[...]
    return jnp.where(y > 0, y, LRELU_SLOPE * y)


def _conv_bn_lrelu_kernel(z_ref, w_ref, s_ref, b_ref, o_ref, *, th, wo, k4c):
    y = _conv_body(z_ref, w_ref, s_ref, b_ref, th=th, wo=wo, k4c=k4c)
    o_ref[...] = y.astype(o_ref.dtype)


def _conv_bn_lrelu_head_kernel(z_ref, w_ref, s_ref, b_ref, wout_ref, o_ref, *,
                               th, wo, k4c, inv_area):
    """Last pyramid block fused with the head: 1x1 conv (no bias) + global
    AvgPool == mean over (h, w) of act @ w_out, accumulated across the grid."""
    n = pl.program_id(0)
    t = pl.program_id(1)
    y = _conv_body(z_ref, w_ref, s_ref, b_ref, th=th, wo=wo, k4c=k4c)
    part = jnp.sum(y * wout_ref[...]) * inv_area        # partial spatial mean

    @pl.when(jnp.logical_and(n == 0, t == 0))
    def _():
        o_ref[...] = jnp.zeros_like(o_ref)

    row = lax.broadcasted_iota(jnp.int32, o_ref.shape, 0)
    o_ref[...] = o_ref[...] + jnp.where(row == n, part, 0.0)


# ------------------------------ glue / wrappers ----------------------------

def _phase_pack(x_nhwc):
    """Z[n, r, s, (2p+q)*C + c] = pad(x,1)[n, 2r+p, 2s+q, c]  (~1x input size)."""
    n, h, w, c = x_nhwc.shape
    ho, wo = h // 2, w // 2
    xp = jnp.pad(x_nhwc, ((0, 0), (1, 1), (1, 1), (0, 0)))
    z = xp.reshape(n, ho + 1, 2, wo + 1, 2, c)
    z = jnp.transpose(z, (0, 1, 3, 2, 4, 5))
    return z.reshape(n, ho + 1, wo + 1, 4 * c)


def _row_halo_blocks(z, th):
    """(N, Ho+1, Wo+1, K) -> (N, nblk, th+1, Wo+1, K): row blocks + 1 halo row."""
    n, hp1, wp1, k = z.shape
    ho = hp1 - 1
    nblk = ho // th
    idx = jnp.arange(nblk)[:, None] * th + jnp.arange(th + 1)[None, :]
    return z[:, idx]


def _fold_weight(w_oihw):
    """(Cout, Cin, 4, 4) -> Wab (4, 4*Cin, Cout); Wab[2a+b, (2p+q)*Cin+c, co] =
    w[co, c, 2a+p, 2b+q]."""
    cout, cin, kh, kw = w_oihw.shape
    assert kh == 4 and kw == 4, "pyramid encoder uses 4x4 stride-2 convs"
    w = jnp.transpose(w_oihw, (2, 3, 1, 0)).reshape(2, 2, 2, 2, cin, cout)
    w = jnp.transpose(w, (0, 2, 1, 3, 4, 5))        # [a, b, p, q, c, co]
    return w.reshape(4, 4 * cin, cout)


def _pick_th(ho, wo, k4c, elt_bytes, target_rows=512, max_block_bytes=4 << 20):
    """Row-block height: ~target_rows output rows per block (sweepable), TH | Ho,
    input block kept well under the per-buffer VMEM budget on all generations."""
    th = max(1, min(ho, max(1, target_rows // max(wo, 1))))
    while ho % th:
        th -= 1
    while th > 1 and (th + 1) * (wo + 1) * k4c * elt_bytes > max_block_bytes:
        th -= 1
        while ho % th:
            th -= 1
    return th


def _prep_layer(x_nhwc, w_oihw, bn_scale, bn_bias, compute_dtype):
    n, h, w, cin = x_nhwc.shape
    cout = w_oihw.shape[0]
    ho, wo = h // 2, w // 2
    k4c = 4 * cin
    th = _pick_th(ho, wo, k4c, jnp.dtype(compute_dtype).itemsize)
    nblk = ho // th
    zb = _row_halo_blocks(_phase_pack(x_nhwc), th).astype(compute_dtype)
    wab = _fold_weight(w_oihw).astype(compute_dtype)
    s = bn_scale.reshape(1, cout).astype(jnp.float32)
    b = bn_bias.reshape(1, cout).astype(jnp.float32)
    return zb, wab, s, b, n, ho, wo, cout, k4c, th, nblk


def conv_bn_lrelu(x_nhwc, w_oihw, bn_scale, bn_bias, *, compute_dtype=jnp.bfloat16):
    zb, wab, s, b, n, ho, wo, cout, k4c, th, nblk = _prep_layer(
        x_nhwc, w_oihw, bn_scale, bn_bias, compute_dtype)
    kernel = functools.partial(_conv_bn_lrelu_kernel, th=th, wo=wo, k4c=k4c)
    out = pl.pallas_call(
        kernel,
        out_shape=jax.ShapeDtypeStruct((n, nblk, th * wo, cout), compute_dtype),
        grid_spec=pltpu.PrefetchScalarGridSpec(
            num_scalar_prefetch=0,
            grid=(n, nblk),
            in_specs=[
                pl.BlockSpec((None, None, th + 1, wo + 1, k4c),
                             lambda i, t: (i, t, 0, 0, 0)),
                pl.BlockSpec((4, k4c, cout), lambda i, t: (0, 0, 0)),
                pl.BlockSpec((1, cout), lambda i, t: (0, 0)),
                pl.BlockSpec((1, cout), lambda i, t: (0, 0)),
            ],
            out_specs=pl.BlockSpec((None, None, th * wo, cout),
                                   lambda i, t: (i, t, 0, 0)),
        ),
        compiler_params=pltpu.CompilerParams(
            dimension_semantics=("parallel", "parallel"),
            vmem_limit_bytes=_VMEM_LIMIT),
    )(zb, wab, s, b)
    return out.reshape(n, ho, wo, cout)


def conv_bn_lrelu_head(x_nhwc, w_oihw, bn_scale, bn_bias, w_out, *,
                       compute_dtype=jnp.bfloat16):
    zb, wab, s, b, n, ho, wo, cout, k4c, th, nblk = _prep_layer(
        x_nhwc, w_oihw, bn_scale, bn_bias, compute_dtype)
    wov = w_out.reshape(1, cout).astype(jnp.float32)
    kernel = functools.partial(_conv_bn_lrelu_head_kernel, th=th, wo=wo,
                               k4c=k4c, inv_area=1.0 / float(ho * wo))
    return pl.pallas_call(
        kernel,
        out_shape=jax.ShapeDtypeStruct((n, 1), jnp.float32),
        grid_spec=pltpu.PrefetchScalarGridSpec(
            num_scalar_prefetch=0,
            grid=(n, nblk),
            in_specs=[
                pl.BlockSpec((None, None, th + 1, wo + 1, k4c),
                             lambda i, t: (i, t, 0, 0, 0)),
                pl.BlockSpec((4, k4c, cout), lambda i, t: (0, 0, 0)),
                pl.BlockSpec((1, cout), lambda i, t: (0, 0)),
                pl.BlockSpec((1, cout), lambda i, t: (0, 0)),
                pl.BlockSpec((1, cout), lambda i, t: (0, 0)),
            ],
            # (N, 1) head output stays VMEM-resident across the whole grid and
            # is accumulated in-kernel -> both axes must be sequential.
            out_specs=pl.BlockSpec((n, 1), lambda i, t: (0, 0)),
        ),
        compiler_params=pltpu.CompilerParams(
            dimension_semantics=("arbitrary", "arbitrary"),
            vmem_limit_bytes=_VMEM_LIMIT),
    )(zb, wab, s, b, wov)


# --------------------------- model (params + forward) ----------------------

def init_params(key, image_size, nc=3, ndf=8, scale=8, w_std=0.1):
    n = int(np.log2(image_size))
    n_down = int(np.log2(scale))
    chans = [nc] + [ndf * (2 ** i) for i in range(n_down)]
    # the PyTorch output 1x1 conv expects ndf * 2**(n-4) input channels
    assert chans[-1] == ndf * 2 ** (n - 4), \
        "image_size/scale must satisfy scale == image_size // 8"
    params = []
    for i in range(n_down):
        key, k1 = jax.random.split(key)
        w = w_std * jax.random.normal(k1, (chans[i + 1], chans[i], 4, 4), jnp.float32)
        if i == 0:
            s = jnp.ones((chans[i + 1],), jnp.float32)            # no BN on block 0
            b = jnp.zeros((chans[i + 1],), jnp.float32)
        else:
            # eval-mode BatchNorm2d defaults: gamma=1, beta=0, mean=0, var=1
            s = jnp.ones((chans[i + 1],), jnp.float32) / jnp.sqrt(1.0 + BN_EPS)
            b = jnp.zeros((chans[i + 1],), jnp.float32)
        params.append((w, s, b))
    key, k2 = jax.random.split(key)
    w_out = w_std * jax.random.normal(k2, (1, chans[-1], 1, 1), jnp.float32)
    return params, w_out


def discriminator_forward(x_nchw, params, w_out, compute_dtype=jnp.bfloat16):
    x = jnp.transpose(x_nchw, (0, 2, 3, 1))                       # NCHW -> NHWC
    for li, (w, s, b) in enumerate(params):
        if li == len(params) - 1:
            return conv_bn_lrelu_head(x, w, s, b, w_out,
                                      compute_dtype=compute_dtype)  # (N, 1)
        x = conv_bn_lrelu(x, w, s, b, compute_dtype=compute_dtype)
    raise AssertionError("unreachable")


# ----------------------------- pure-JAX reference --------------------------

def reference_forward(x_nchw, params, w_out):
    x = jnp.transpose(x_nchw, (0, 2, 3, 1))
    for (w, s, b) in params:
        w_hwio = jnp.transpose(w, (2, 3, 1, 0))
        y = lax.conv_general_dilated(x, w_hwio, (2, 2), ((1, 1), (1, 1)),
                                     dimension_numbers=('NHWC', 'HWIO', 'NHWC'),
                                     precision=lax.Precision.HIGHEST)
        y = y * s + b
        x = jnp.where(y > 0, y, LRELU_SLOPE * y)
    y = jnp.einsum('nhwc,c->n', x, w_out.reshape(-1),
                   precision=lax.Precision.HIGHEST) / (x.shape[1] * x.shape[2])
    return y[:, None]


if __name__ == "__main__":
    key = jax.random.PRNGKey(0)
    image_size, nc, ndf, scale = 64, 3, 8, 8          # small ndf for a quick run
    kp, kx = jax.random.split(key)
    params, w_out = init_params(kp, image_size, nc=nc, ndf=ndf, scale=scale)
    x = jax.random.normal(kx, (2, nc, image_size, image_size), jnp.float32)

    ref = reference_forward(x, params, w_out)

    # exact-math path (f32 everywhere) -> tight check of the kernel indexing
    fwd_f32 = jax.jit(lambda xx: discriminator_forward(
        xx, params, w_out, compute_dtype=jnp.float32))
    out_f32 = jax.block_until_ready(fwd_f32(x))
    assert out_f32.shape == (2, 1), out_f32.shape
    assert jnp.allclose(out_f32, ref, atol=1e-3, rtol=1e-2), (out_f32, ref)

    # production path: bf16 activations/weights on the MXU, f32 accumulation
    fwd_bf16 = jax.jit(lambda xx: discriminator_forward(
        xx, params, w_out, compute_dtype=jnp.bfloat16))
    out_bf16 = jax.block_until_ready(fwd_bf16(x))
    assert out_bf16.shape == (2, 1), out_bf16.shape
    assert jnp.allclose(out_bf16, ref, atol=5e-2, rtol=2e-1), (out_bf16, ref)

    print("KERNEL_OK")
</pallas_src>

<mosaic_0001>
module attributes {stable_mosaic.version = 11 : i64} {
  func.func @_conv_bn_lrelu_kernel(%arg0: i32, %arg1: i32, %arg2: memref<1x1x17x33x12xf32, #tpu.memory_space<vmem>>, %arg3: memref<4x12x8xf32, #tpu.memory_space<vmem>>, %arg4: memref<1x8xf32, #tpu.memory_space<vmem>>, %arg5: memref<1x8xf32, #tpu.memory_space<vmem>>, %arg6: memref<1x1x512x8xf32, #tpu.memory_space<vmem>>) attributes {dimension_semantics = [#tpu.dimension_semantics<parallel>, #tpu.dimension_semantics<parallel>], iteration_bounds = array<i64: 2, 2>, scalar_prefetch = 0 : i64, scratch_operands = 0 : i64, tpu.core_type = #tpu.core_type<tc>, window_params = [{transform_indices = @transform_0, window_bounds = array<i64: 1, 1, 17, 33, 12>}, {pipeline_mode = #tpu.pipeline_mode<synchronous>, transform_indices = @transform_1, window_bounds = array<i64: 4, 12, 8>}, {pipeline_mode = #tpu.pipeline_mode<synchronous>, transform_indices = @transform_2, window_bounds = array<i64: 1, 8>}, {pipeline_mode = #tpu.pipeline_mode<synchronous>, transform_indices = @transform_3, window_bounds = array<i64: 1, 8>}, {transform_indices = @transform_4, window_bounds = array<i64: 1, 1, 512, 8>}]} {
    %cst = arith.constant 0.000000e+00 : f32
    %0 = vector.broadcast %cst : f32 to vector<512x8xf32>
    %c0 = arith.constant 0 : index
    %c0_0 = arith.constant 0 : index
    %c0_1 = arith.constant 0 : index
    %c0_2 = arith.constant 0 : index
    %c0_3 = arith.constant 0 : index
    %1 = vector.load %arg2[%c0, %c0_0, %c0_1, %c0_2, %c0_3] : memref<1x1x17x33x12xf32, #tpu.memory_space<vmem>>, vector<1x1x16x32x12xf32>
    %2 = vector.shape_cast %1 : vector<1x1x16x32x12xf32> to vector<16x32x12xf32>
    %3 = vector.shape_cast %2 : vector<16x32x12xf32> to vector<512x12xf32>
    %c0_4 = arith.constant 0 : index
    %c0_5 = arith.constant 0 : index
    %c0_6 = arith.constant 0 : index
    %4 = vector.load %arg3[%c0_4, %c0_5, %c0_6] : memref<4x12x8xf32, #tpu.memory_space<vmem>>, vector<1x12x8xf32>
    %5 = vector.shape_cast %4 : vector<1x12x8xf32> to vector<12x8xf32>
    %cst_7 = arith.constant dense<0.000000e+00> : vector<512x8xf32>
    %6 = tpu.matmul %3, %5, %cst_7 {dimension_numbers = #tpu.dot_dimension_numbers<[1], [0], [0], [1], [0, 0, 1, 1], [], []>} : vector<512x12xf32>, vector<12x8xf32>, vector<512x8xf32> -> vector<512x8xf32>
    %7 = arith.addf %0, %6 : vector<512x8xf32>
    %c0_8 = arith.constant 0 : index
    %c0_9 = arith.constant 0 : index
    %c0_10 = arith.constant 0 : index
    %c1 = arith.constant 1 : index
    %c0_11 = arith.constant 0 : index
    %8 = vector.load %arg2[%c0_8, %c0_9, %c0_10, %c1, %c0_11] : memref<1x1x17x33x12xf32, #tpu.memory_space<vmem>>, vector<1x1x16x32x12xf32>
    %9 = vector.shape_cast %8 : vector<1x1x16x32x12xf32> to vector<16x32x12xf32>
    %10 = vector.shape_cast %9 : vector<16x32x12xf32> to vector<512x12xf32>
    %c1_12 = arith.constant 1 : index
    %c0_13 = arith.constant 0 : index
    %c0_14 = arith.constant 0 : index
    %11 = vector.load %arg3[%c1_12, %c0_13, %c0_14] : memref<4x12x8xf32, #tpu.memory_space<vmem>>, vector<1x12x8xf32>
    %12 = vector.shape_cast %11 : vector<1x12x8xf32> to vector<12x8xf32>
    %cst_15 = arith.constant dense<0.000000e+00> : vector<512x8xf32>
    %13 = tpu.matmul %10, %12, %cst_15 {dimension_numbers = #tpu.dot_dimension_numbers<[1], [0], [0], [1], [0, 0, 1, 1], [], []>} : vector<512x12xf32>, vector<12x8xf32>, vector<512x8xf32> -> vector<512x8xf32>
    %14 = arith.addf %7, %13 : vector<512x8xf32>
    %c0_16 = arith.constant 0 : index
    %c0_17 = arith.constant 0 : index
    %c1_18 = arith.constant 1 : index
    %c0_19 = arith.constant 0 : index
    %c0_20 = arith.constant 0 : index
    %15 = vector.load %arg2[%c0_16, %c0_17, %c1_18, %c0_19, %c0_20] : memref<1x1x17x33x12xf32, #tpu.memory_space<vmem>>, vector<1x1x16x32x12xf32>
    %16 = vector.shape_cast %15 : vector<1x1x16x32x12xf32> to vector<16x32x12xf32>
    %17 = vector.shape_cast %16 : vector<16x32x12xf32> to vector<512x12xf32>
    %c2 = arith.constant 2 : index
    %c0_21 = arith.constant 0 : index
    %c0_22 = arith.constant 0 : index
    %18 = vector.load %arg3[%c2, %c0_21, %c0_22] : memref<4x12x8xf32, #tpu.memory_space<vmem>>, vector<1x12x8xf32>
    %19 = vector.shape_cast %18 : vector<1x12x8xf32> to vector<12x8xf32>
    %cst_23 = arith.constant dense<0.000000e+00> : vector<512x8xf32>
    %20 = tpu.matmul %17, %19, %cst_23 {dimension_numbers = #tpu.dot_dimension_numbers<[1], [0], [0], [1], [0, 0, 1, 1], [], []>} : vector<512x12xf32>, vector<12x8xf32>, vector<512x8xf32> -> vector<512x8xf32>
    %21 = arith.addf %14, %20 : vector<512x8xf32>
    %c0_24 = arith.constant 0 : index
    %c0_25 = arith.constant 0 : index
    %c1_26 = arith.constant 1 : index
    %c1_27 = arith.constant 1 : index
    %c0_28 = arith.constant 0 : index
    %22 = vector.load %arg2[%c0_24, %c0_25, %c1_26, %c1_27, %c0_28] : memref<1x1x17x33x12xf32, #tpu.memory_space<vmem>>, vector<1x1x16x32x12xf32>
    %23 = vector.shape_cast %22 : vector<1x1x16x32x12xf32> to vector<16x32x12xf32>
    %24 = vector.shape_cast %23 : vector<16x32x12xf32> to vector<512x12xf32>
    %c3 = arith.constant 3 : index
    %c0_29 = arith.constant 0 : index
    %c0_30 = arith.constant 0 : index
    %25 = vector.load %arg3[%c3, %c0_29, %c0_30] : memref<4x12x8xf32, #tpu.memory_space<vmem>>, vector<1x12x8xf32>
    %26 = vector.shape_cast %25 : vector<1x12x8xf32> to vector<12x8xf32>
    %cst_31 = arith.constant dense<0.000000e+00> : vector<512x8xf32>
    %27 = tpu.matmul %24, %26, %cst_31 {dimension_numbers = #tpu.dot_dimension_numbers<[1], [0], [0], [1], [0, 0, 1, 1], [], []>} : vector<512x12xf32>, vector<12x8xf32>, vector<512x8xf32> -> vector<512x8xf32>
    %28 = arith.addf %21, %27 : vector<512x8xf32>
    %c0_32 = arith.constant 0 : index
    %c0_33 = arith.constant 0 : index
    %29 = vector.load %arg4[%c0_32, %c0_33] : memref<1x8xf32, #tpu.memory_space<vmem>>, vector<1x8xf32>
    %30 = vector.broadcast %29 : vector<1x8xf32> to vector<512x8xf32>
    %31 = arith.mulf %28, %30 : vector<512x8xf32>
    %c0_34 = arith.constant 0 : index
    %c0_35 = arith.constant 0 : index
    %32 = vector.load %arg5[%c0_34, %c0_35] : memref<1x8xf32, #tpu.memory_space<vmem>>, vector<1x8xf32>
    %33 = vector.broadcast %32 : vector<1x8xf32> to vector<512x8xf32>
    %34 = arith.addf %31, %33 : vector<512x8xf32>
    %cst_36 = arith.constant 0.000000e+00 : f32
    %35 = vector.broadcast %cst_36 : f32 to vector<512x8xf32>
    %36 = arith.cmpf ogt, %34, %35 : vector<512x8xf32>
    %cst_37 = arith.constant 2.000000e-01 : f32
    %37 = vector.broadcast %cst_37 : f32 to vector<512x8xf32>
    %38 = arith.mulf %37, %34 : vector<512x8xf32>
    %39 = arith.select %36, %34, %38 : vector<512x8xi1>, vector<512x8xf32>
    %c0_38 = arith.constant 0 : index
    %c0_39 = arith.constant 0 : index
    %c0_40 = arith.constant 0 : index
    %c0_41 = arith.constant 0 : index
    %40 = vector.load %arg6[%c0_38, %c0_39, %c0_40, %c0_41] : memref<1x1x512x8xf32, #tpu.memory_space<vmem>>, vector<1x1x512x8xf32>
    %41 = vector.shape_cast %40 : vector<1x1x512x8xf32> to vector<512x8xf32>
    %42 = vector.shape_cast %39 : vector<512x8xf32> to vector<1x1x512x8xf32>
    tpu.vector_store %arg6[%c0_38, %c0_39, %c0_40, %c0_41], %42 {strides = array<i32>} : memref<1x1x512x8xf32, #tpu.memory_space<vmem>>, vector<1x1x512x8xf32>,
    return
  }
  func.func @transform_0(%arg0: i32, %arg1: i32) -> (i32, i32, i32, i32, i32) {
    %c0_i32 = arith.constant 0 : i32
    %c0_i32_0 = arith.constant 0 : i32
    %c0_i32_1 = arith.constant 0 : i32
    %c0_i32_2 = arith.constant 0 : i32
    return %arg0, %arg1, %c0_i32, %c0_i32_0, %c0_i32_1 : i32, i32, i32, i32, i32
  }
  func.func @transform_1(%arg0: i32, %arg1: i32) -> (i32, i32, i32) {
    %c0_i32 = arith.constant 0 : i32
    %c0_i32_0 = arith.constant 0 : i32
    %c0_i32_1 = arith.constant 0 : i32
    %c0_i32_2 = arith.constant 0 : i32
    return %c0_i32, %c0_i32_0, %c0_i32_1 : i32, i32, i32
  }
  func.func @transform_2(%arg0: i32, %arg1: i32) -> (i32, i32) {
    %c0_i32 = arith.constant 0 : i32
    %c0_i32_0 = arith.constant 0 : i32
    %c0_i32_1 = arith.constant 0 : i32
    return %c0_i32, %c0_i32_0 : i32, i32
  }
  func.func @transform_3(%arg0: i32, %arg1: i32) -> (i32, i32) {
    %c0_i32 = arith.constant 0 : i32
    %c0_i32_0 = arith.constant 0 : i32
    %c0_i32_1 = arith.constant 0 : i32
    return %c0_i32, %c0_i32_0 : i32, i32
  }
  func.func @transform_4(%arg0: i32, %arg1: i32) -> (i32, i32, i32, i32) {
    %c0_i32 = arith.constant 0 : i32
    %c0_i32_0 = arith.constant 0 : i32
    %c0_i32_1 = arith.constant 0 : i32
    return %arg0, %arg1, %c0_i32, %c0_i32_0 : i32, i32, i32, i32
  }
}

module attributes {stable_mosaic.version = 11 : i64} {
  func.func @_conv_bn_lrelu_kernel(%arg0: i32, %arg1: i32, %arg2: memref<1x1x17x17x32xf32, #tpu.memory_space<vmem>>, %arg3: memref<4x32x16xf32, #tpu.memory_space<vmem>>, %arg4: memref<1x16xf32, #tpu.memory_space<vmem>>, %arg5: memref<1x16xf32, #tpu.memory_space<vmem>>, %arg6: memref<1x1x256x16xf32, #tpu.memory_space<vmem>>) attributes {dimension_semantics = [#tpu.dimension_semantics<parallel>, #tpu.dimension_semantics<parallel>], iteration_bounds = array<i64: 2, 1>, scalar_prefetch = 0 : i64, scratch_operands = 0 : i64, tpu.core_type = #tpu.core_type<tc>, window_params = [{transform_indices = @transform_0, window_bounds = array<i64: 1, 1, 17, 17, 32>}, {pipeline_mode = #tpu.pipeline_mode<synchronous>, transform_indices = @transform_1, window_bounds = array<i64: 4, 32, 16>}, {pipeline_mode = #tpu.pipeline_mode<synchronous>, transform_indices = @transform_2, window_bounds = array<i64: 1, 16>}, {pipeline_mode = #tpu.pipeline_mode<synchronous>, transform_indices = @transform_3, window_bounds = array<i64: 1, 16>}, {transform_indices = @transform_4, window_bounds = array<i64: 1, 1, 256, 16>}]} {
    %cst = arith.constant 0.000000e+00 : f32
    %0 = vector.broadcast %cst : f32 to vector<256x16xf32>
    %c0 = arith.constant 0 : index
    %c0_0 = arith.constant 0 : index
    %c0_1 = arith.constant 0 : index
    %c0_2 = arith.constant 0 : index
    %c0_3 = arith.constant 0 : index
    %1 = vector.load %arg2[%c0, %c0_0, %c0_1, %c0_2, %c0_3] : memref<1x1x17x17x32xf32, #tpu.memory_space<vmem>>, vector<1x1x16x16x32xf32>
    %2 = vector.shape_cast %1 : vector<1x1x16x16x32xf32> to vector<16x16x32xf32>
    %3 = vector.shape_cast %2 : vector<16x16x32xf32> to vector<256x32xf32>
    %c0_4 = arith.constant 0 : index
    %c0_5 = arith.constant 0 : index
    %c0_6 = arith.constant 0 : index
    %4 = vector.load %arg3[%c0_4, %c0_5, %c0_6] : memref<4x32x16xf32, #tpu.memory_space<vmem>>, vector<1x32x16xf32>
    %5 = vector.shape_cast %4 : vector<1x32x16xf32> to vector<32x16xf32>
    %cst_7 = arith.constant dense<0.000000e+00> : vector<256x16xf32>
    %6 = tpu.matmul %3, %5, %cst_7 {dimension_numbers = #tpu.dot_dimension_numbers<[1], [0], [0], [1], [0, 0, 1, 1], [], []>} : vector<256x32xf32>, vector<32x16xf32>, vector<256x16xf32> -> vector<256x16xf32>
    %7 = arith.addf %0, %6 : vector<256x16xf32>
    %c0_8 = arith.constant 0 : index
    %c0_9 = arith.constant 0 : index
    %c0_10 = arith.constant 0 : index
    %c1 = arith.constant 1 : index
    %c0_11 = arith.constant 0 : index
    %8 = vector.load %arg2[%c0_8, %c0_9, %c0_10, %c1, %c0_11] : memref<1x1x17x17x32xf32, #tpu.memory_space<vmem>>, vector<1x1x16x16x32xf32>
    %9 = vector.shape_cast %8 : vector<1x1x16x16x32xf32> to vector<16x16x32xf32>
    %10 = vector.shape_cast %9 : vector<16x16x32xf32> to vector<256x32xf32>
    %c1_12 = arith.constant 1 : index
    %c0_13 = arith.constant 0 : index
    %c0_14 = arith.constant 0 : index
    %11 = vector.load %arg3[%c1_12, %c0_13, %c0_14] : memref<4x32x16xf32, #tpu.memory_space<vmem>>, vector<1x32x16xf32>
    %12 = vector.shape_cast %11 : vector<1x32x16xf32> to vector<32x16xf32>
    %cst_15 = arith.constant dense<0.000000e+00> : vector<256x16xf32>
    %13 = tpu.matmul %10, %12, %cst_15 {dimension_numbers = #tpu.dot_dimension_numbers<[1], [0], [0], [1], [0, 0, 1, 1], [], []>} : vector<256x32xf32>, vector<32x16xf32>, vector<256x16xf32> -> vector<256x16xf32>
    %14 = arith.addf %7, %13 : vector<256x16xf32>
    %c0_16 = arith.constant 0 : index
    %c0_17 = arith.constant 0 : index
    %c1_18 = arith.constant 1 : index
    %c0_19 = arith.constant 0 : index
    %c0_20 = arith.constant 0 : index
    %15 = vector.load %arg2[%c0_16, %c0_17, %c1_18, %c0_19, %c0_20] : memref<1x1x17x17x32xf32, #tpu.memory_space<vmem>>, vector<1x1x16x16x32xf32>
    %16 = vector.shape_cast %15 : vector<1x1x16x16x32xf32> to vector<16x16x32xf32>
    %17 = vector.shape_cast %16 : vector<16x16x32xf32> to vector<256x32xf32>
    %c2 = arith.constant 2 : index
    %c0_21 = arith.constant 0 : index
    %c0_22 = arith.constant 0 : index
    %18 = vector.load %arg3[%c2, %c0_21, %c0_22] : memref<4x32x16xf32, #tpu.memory_space<vmem>>, vector<1x32x16xf32>
    %19 = vector.shape_cast %18 : vector<1x32x16xf32> to vector<32x16xf32>
    %cst_23 = arith.constant dense<0.000000e+00> : vector<256x16xf32>
    %20 = tpu.matmul %17, %19, %cst_23 {dimension_numbers = #tpu.dot_dimension_numbers<[1], [0], [0], [1], [0, 0, 1, 1], [], []>} : vector<256x32xf32>, vector<32x16xf32>, vector<256x16xf32> -> vector<256x16xf32>
    %21 = arith.addf %14, %20 : vector<256x16xf32>
    %c0_24 = arith.constant 0 : index
    %c0_25 = arith.constant 0 : index
    %c1_26 = arith.constant 1 : index
    %c1_27 = arith.constant 1 : index
    %c0_28 = arith.constant 0 : index
    %22 = vector.load %arg2[%c0_24, %c0_25, %c1_26, %c1_27, %c0_28] : memref<1x1x17x17x32xf32, #tpu.memory_space<vmem>>, vector<1x1x16x16x32xf32>
    %23 = vector.shape_cast %22 : vector<1x1x16x16x32xf32> to vector<16x16x32xf32>
    %24 = vector.shape_cast %23 : vector<16x16x32xf32> to vector<256x32xf32>
    %c3 = arith.constant 3 : index
    %c0_29 = arith.constant 0 : index
    %c0_30 = arith.constant 0 : index
    %25 = vector.load %arg3[%c3, %c0_29, %c0_30] : memref<4x32x16xf32, #tpu.memory_space<vmem>>, vector<1x32x16xf32>
    %26 = vector.shape_cast %25 : vector<1x32x16xf32> to vector<32x16xf32>
    %cst_31 = arith.constant dense<0.000000e+00> : vector<256x16xf32>
    %27 = tpu.matmul %24, %26, %cst_31 {dimension_numbers = #tpu.dot_dimension_numbers<[1], [0], [0], [1], [0, 0, 1, 1], [], []>} : vector<256x32xf32>, vector<32x16xf32>, vector<256x16xf32> -> vector<256x16xf32>
    %28 = arith.addf %21, %27 : vector<256x16xf32>
    %c0_32 = arith.constant 0 : index
    %c0_33 = arith.constant 0 : index
    %29 = vector.load %arg4[%c0_32, %c0_33] : memref<1x16xf32, #tpu.memory_space<vmem>>, vector<1x16xf32>
    %30 = vector.broadcast %29 : vector<1x16xf32> to vector<256x16xf32>
    %31 = arith.mulf %28, %30 : vector<256x16xf32>
    %c0_34 = arith.constant 0 : index
    %c0_35 = arith.constant 0 : index
    %32 = vector.load %arg5[%c0_34, %c0_35] : memref<1x16xf32, #tpu.memory_space<vmem>>, vector<1x16xf32>
    %33 = vector.broadcast %32 : vector<1x16xf32> to vector<256x16xf32>
    %34 = arith.addf %31, %33 : vector<256x16xf32>
    %cst_36 = arith.constant 0.000000e+00 : f32
    %35 = vector.broadcast %cst_36 : f32 to vector<256x16xf32>
    %36 = arith.cmpf ogt, %34, %35 : vector<256x16xf32>
    %cst_37 = arith.constant 2.000000e-01 : f32
    %37 = vector.broadcast %cst_37 : f32 to vector<256x16xf32>
    %38 = arith.mulf %37, %34 : vector<256x16xf32>
    %39 = arith.select %36, %34, %38 : vector<256x16xi1>, vector<256x16xf32>
    %c0_38 = arith.constant 0 : index
    %c0_39 = arith.constant 0 : index
    %c0_40 = arith.constant 0 : index
    %c0_41 = arith.constant 0 : index
    %40 = vector.load %arg6[%c0_38, %c0_39, %c0_40, %c0_41] : memref<1x1x256x16xf32, #tpu.memory_space<vmem>>, vector<1x1x256x16xf32>
    %41 = vector.shape_cast %40 : vector<1x1x256x16xf32> to vector<256x16xf32>
    %42 = vector.shape_cast %39 : vector<256x16xf32> to vector<1x1x256x16xf32>
    tpu.vector_store %arg6[%c0_38, %c0_39, %c0_40, %c0_41], %42 {strides = array<i32>} : memref<1x1x256x16xf32, #tpu.memory_space<vmem>>, vector<1x1x256x16xf32>,
    return
  }
  func.func @transform_0(%arg0: i32, %arg1: i32) -> (i32, i32, i32, i32, i32) {
    %c0_i32 = arith.constant 0 : i32
    %c0_i32_0 = arith.constant 0 : i32
    %c0_i32_1 = arith.constant 0 : i32
    %c0_i32_2 = arith.constant 0 : i32
    return %arg0, %arg1, %c0_i32, %c0_i32_0, %c0_i32_1 : i32, i32, i32, i32, i32
  }
  func.func @transform_1(%arg0: i32, %arg1: i32) -> (i32, i32, i32) {
    %c0_i32 = arith.constant 0 : i32
    %c0_i32_0 = arith.constant 0 : i32
    %c0_i32_1 = arith.constant 0 : i32
    %c0_i32_2 = arith.constant 0 : i32
    return %c0_i32, %c0_i32_0, %c0_i32_1 : i32, i32, i32
  }
  func.func @transform_2(%arg0: i32, %arg1: i32) -> (i32, i32) {
    %c0_i32 = arith.constant 0 : i32
    %c0_i32_0 = arith.constant 0 : i32
    %c0_i32_1 = arith.constant 0 : i32
    return %c0_i32, %c0_i32_0 : i32, i32
  }
  func.func @transform_3(%arg0: i32, %arg1: i32) -> (i32, i32) {
    %c0_i32 = arith.constant 0 : i32
    %c0_i32_0 = arith.constant 0 : i32
    %c0_i32_1 = arith.constant 0 : i32
    return %c0_i32, %c0_i32_0 : i32, i32
  }
  func.func @transform_4(%arg0: i32, %arg1: i32) -> (i32, i32, i32, i32) {
    %c0_i32 = arith.constant 0 : i32
    %c0_i32_0 = arith.constant 0 : i32
    %c0_i32_1 = arith.constant 0 : i32
    return %arg0, %arg1, %c0_i32, %c0_i32_0 : i32, i32, i32, i32
  }
}

module attributes {stable_mosaic.version = 11 : i64} {
  func.func @_conv_bn_lrelu_head_kernel(%arg0: i32, %arg1: i32, %arg2: memref<1x1x9x9x64xf32, #tpu.memory_space<vmem>>, %arg3: memref<4x64x32xf32, #tpu.memory_space<vmem>>, %arg4: memref<1x32xf32, #tpu.memory_space<vmem>>, %arg5: memref<1x32xf32, #tpu.memory_space<vmem>>, %arg6: memref<1x32xf32, #tpu.memory_space<vmem>>, %arg7: memref<2x1xf32, #tpu.memory_space<vmem>>) attributes {dimension_semantics = [#tpu.dimension_semantics<arbitrary>, #tpu.dimension_semantics<arbitrary>], iteration_bounds = array<i64: 2, 1>, scalar_prefetch = 0 : i64, scratch_operands = 0 : i64, tpu.core_type = #tpu.core_type<tc>, window_params = [{transform_indices = @transform_0, window_bounds = array<i64: 1, 1, 9, 9, 64>}, {pipeline_mode = #tpu.pipeline_mode<synchronous>, transform_indices = @transform_1, window_bounds = array<i64: 4, 64, 32>}, {pipeline_mode = #tpu.pipeline_mode<synchronous>, transform_indices = @transform_2, window_bounds = array<i64: 1, 32>}, {pipeline_mode = #tpu.pipeline_mode<synchronous>, transform_indices = @transform_3, window_bounds = array<i64: 1, 32>}, {pipeline_mode = #tpu.pipeline_mode<synchronous>, transform_indices = @transform_4, window_bounds = array<i64: 1, 32>}, {pipeline_mode = #tpu.pipeline_mode<synchronous>, transform_indices = @transform_5, window_bounds = array<i64: 2, 1>}]} {
    %cst = arith.constant 0.000000e+00 : f32
    %0 = vector.broadcast %cst : f32 to vector<64x32xf32>
    %c0 = arith.constant 0 : index
    %c0_0 = arith.constant 0 : index
    %c0_1 = arith.constant 0 : index
    %c0_2 = arith.constant 0 : index
    %c0_3 = arith.constant 0 : index
    %1 = vector.load %arg2[%c0, %c0_0, %c0_1, %c0_2, %c0_3] : memref<1x1x9x9x64xf32, #tpu.memory_space<vmem>>, vector<1x1x8x8x64xf32>
    %2 = vector.shape_cast %1 : vector<1x1x8x8x64xf32> to vector<8x8x64xf32>
    %3 = vector.shape_cast %2 : vector<8x8x64xf32> to vector<64x64xf32>
    %c0_4 = arith.constant 0 : index
    %c0_5 = arith.constant 0 : index
    %c0_6 = arith.constant 0 : index
    %4 = vector.load %arg3[%c0_4, %c0_5, %c0_6] : memref<4x64x32xf32, #tpu.memory_space<vmem>>, vector<1x64x32xf32>
    %5 = vector.shape_cast %4 : vector<1x64x32xf32> to vector<64x32xf32>
    %cst_7 = arith.constant dense<0.000000e+00> : vector<64x32xf32>
    %6 = tpu.matmul %3, %5, %cst_7 {dimension_numbers = #tpu.dot_dimension_numbers<[1], [0], [0], [1], [0, 0, 1, 1], [], []>} : vector<64x64xf32>, vector<64x32xf32>, vector<64x32xf32> -> vector<64x32xf32>
    %7 = arith.addf %0, %6 : vector<64x32xf32>
    %c0_8 = arith.constant 0 : index
    %c0_9 = arith.constant 0 : index
    %c0_10 = arith.constant 0 : index
    %c1 = arith.constant 1 : index
    %c0_11 = arith.constant 0 : index
    %8 = vector.load %arg2[%c0_8, %c0_9, %c0_10, %c1, %c0_11] : memref<1x1x9x9x64xf32, #tpu.memory_space<vmem>>, vector<1x1x8x8x64xf32>
    %9 = vector.shape_cast %8 : vector<1x1x8x8x64xf32> to vector<8x8x64xf32>
    %10 = vector.shape_cast %9 : vector<8x8x64xf32> to vector<64x64xf32>
    %c1_12 = arith.constant 1 : index
    %c0_13 = arith.constant 0 : index
    %c0_14 = arith.constant 0 : index
    %11 = vector.load %arg3[%c1_12, %c0_13, %c0_14] : memref<4x64x32xf32, #tpu.memory_space<vmem>>, vector<1x64x32xf32>
    %12 = vector.shape_cast %11 : vector<1x64x32xf32> to vector<64x32xf32>
    %cst_15 = arith.constant dense<0.000000e+00> : vector<64x32xf32>
    %13 = tpu.matmul %10, %12, %cst_15 {dimension_numbers = #tpu.dot_dimension_numbers<[1], [0], [0], [1], [0, 0, 1, 1], [], []>} : vector<64x64xf32>, vector<64x32xf32>, vector<64x32xf32> -> vector<64x32xf32>
    %14 = arith.addf %7, %13 : vector<64x32xf32>
    %c0_16 = arith.constant 0 : index
    %c0_17 = arith.constant 0 : index
    %c1_18 = arith.constant 1 : index
    %c0_19 = arith.constant 0 : index
    %c0_20 = arith.constant 0 : index
    %15 = vector.load %arg2[%c0_16, %c0_17, %c1_18, %c0_19, %c0_20] : memref<1x1x9x9x64xf32, #tpu.memory_space<vmem>>, vector<1x1x8x8x64xf32>
    %16 = vector.shape_cast %15 : vector<1x1x8x8x64xf32> to vector<8x8x64xf32>
    %17 = vector.shape_cast %16 : vector<8x8x64xf32> to vector<64x64xf32>
    %c2 = arith.constant 2 : index
    %c0_21 = arith.constant 0 : index
    %c0_22 = arith.constant 0 : index
    %18 = vector.load %arg3[%c2, %c0_21, %c0_22] : memref<4x64x32xf32, #tpu.memory_space<vmem>>, vector<1x64x32xf32>
    %19 = vector.shape_cast %18 : vector<1x64x32xf32> to vector<64x32xf32>
    %cst_23 = arith.constant dense<0.000000e+00> : vector<64x32xf32>
    %20 = tpu.matmul %17, %19, %cst_23 {dimension_numbers = #tpu.dot_dimension_numbers<[1], [0], [0], [1], [0, 0, 1, 1], [], []>} : vector<64x64xf32>, vector<64x32xf32>, vector<64x32xf32> -> vector<64x32xf32>
    %21 = arith.addf %14, %20 : vector<64x32xf32>
    %c0_24 = arith.constant 0 : index
    %c0_25 = arith.constant 0 : index
    %c1_26 = arith.constant 1 : index
    %c1_27 = arith.constant 1 : index
    %c0_28 = arith.constant 0 : index
    %22 = vector.load %arg2[%c0_24, %c0_25, %c1_26, %c1_27, %c0_28] : memref<1x1x9x9x64xf32, #tpu.memory_space<vmem>>, vector<1x1x8x8x64xf32>
    %23 = vector.shape_cast %22 : vector<1x1x8x8x64xf32> to vector<8x8x64xf32>
    %24 = vector.shape_cast %23 : vector<8x8x64xf32> to vector<64x64xf32>
    %c3 = arith.constant 3 : index
    %c0_29 = arith.constant 0 : index
    %c0_30 = arith.constant 0 : index
    %25 = vector.load %arg3[%c3, %c0_29, %c0_30] : memref<4x64x32xf32, #tpu.memory_space<vmem>>, vector<1x64x32xf32>
    %26 = vector.shape_cast %25 : vector<1x64x32xf32> to vector<64x32xf32>
    %cst_31 = arith.constant dense<0.000000e+00> : vector<64x32xf32>
    %27 = tpu.matmul %24, %26, %cst_31 {dimension_numbers = #tpu.dot_dimension_numbers<[1], [0], [0], [1], [0, 0, 1, 1], [], []>} : vector<64x64xf32>, vector<64x32xf32>, vector<64x32xf32> -> vector<64x32xf32>
    %28 = arith.addf %21, %27 : vector<64x32xf32>
    %c0_32 = arith.constant 0 : index
    %c0_33 = arith.constant 0 : index
    %29 = vector.load %arg4[%c0_32, %c0_33] : memref<1x32xf32, #tpu.memory_space<vmem>>, vector<1x32xf32>
    %30 = vector.broadcast %29 : vector<1x32xf32> to vector<64x32xf32>
    %31 = arith.mulf %28, %30 : vector<64x32xf32>
    %c0_34 = arith.constant 0 : index
    %c0_35 = arith.constant 0 : index
    %32 = vector.load %arg5[%c0_34, %c0_35] : memref<1x32xf32, #tpu.memory_space<vmem>>, vector<1x32xf32>
    %33 = vector.broadcast %32 : vector<1x32xf32> to vector<64x32xf32>
    %34 = arith.addf %31, %33 : vector<64x32xf32>
    %cst_36 = arith.constant 0.000000e+00 : f32
    %35 = vector.broadcast %cst_36 : f32 to vector<64x32xf32>
    %36 = arith.cmpf ogt, %34, %35 : vector<64x32xf32>
    %cst_37 = arith.constant 2.000000e-01 : f32
    %37 = vector.broadcast %cst_37 : f32 to vector<64x32xf32>
    %38 = arith.mulf %37, %34 : vector<64x32xf32>
    %39 = arith.select %36, %34, %38 : vector<64x32xi1>, vector<64x32xf32>
    %c0_38 = arith.constant 0 : index
    %c0_39 = arith.constant 0 : index
    %40 = vector.load %arg6[%c0_38, %c0_39] : memref<1x32xf32, #tpu.memory_space<vmem>>, vector<1x32xf32>
    %41 = vector.broadcast %40 : vector<1x32xf32> to vector<64x32xf32>
    %42 = arith.mulf %39, %41 : vector<64x32xf32>
    %43 = vector.shape_cast %42 : vector<64x32xf32> to vector<1x64x32xf32>
    %cst_40 = arith.constant dense<0.000000e+00> : vector<1xf32>
    %44 = vector.multi_reduction <add>, %43, %cst_40 [1, 2] : vector<1x64x32xf32> to vector<1xf32>
    %45 = vector.shape_cast %44 : vector<1xf32> to vector<1x1x1xf32>
    %46 = vector.extract %45[0, 0, 0] : f32 from vector<1x1x1xf32>
    %cst_41 = arith.constant 1.562500e-02 : f32
    %47 = arith.mulf %46, %cst_41 : f32
    %c0_i32 = arith.constant 0 : i32
    %48 = arith.cmpi eq, %arg0, %c0_i32 : i32
    %c0_i32_42 = arith.constant 0 : i32
    %49 = arith.cmpi eq, %arg1, %c0_i32_42 : i32
    %50 = arith.andi %48, %49 : i1
    %51 = arith.extui %50 : i1 to i32
    %c0_i32_43 = arith.constant 0 : i32
    %52 = arith.cmpi ne, %51, %c0_i32_43 : i32
    scf.if %52 {
      %cst_49 = arith.constant 0.000000e+00 : f32
      %62 = vector.broadcast %cst_49 : f32 to vector<2x1xf32>
      %c0_50 = arith.constant 0 : index
      %c0_51 = arith.constant 0 : index
      %63 = vector.load %arg7[%c0_50, %c0_51] : memref<2x1xf32, #tpu.memory_space<vmem>>, vector<2x1xf32>
      tpu.vector_store %arg7[%c0_50, %c0_51], %62 {strides = array<i32>} : memref<2x1xf32, #tpu.memory_space<vmem>>, vector<2x1xf32>,
    } else {
    }
    %53 = tpu.iota {dimensions = array<i32: 0>} : vector<2x1xi32>
    %c0_44 = arith.constant 0 : index
    %c0_45 = arith.constant 0 : index
    %54 = vector.load %arg7[%c0_44, %c0_45] : memref<2x1xf32, #tpu.memory_space<vmem>>, vector<2x1xf32>
    %55 = vector.broadcast %arg0 : i32 to vector<2x1xi32>
    %56 = arith.cmpi eq, %53, %55 : vector<2x1xi32>
    %cst_46 = arith.constant 0.000000e+00 : f32
    %57 = vector.broadcast %47 : f32 to vector<2x1xf32>
    %58 = vector.broadcast %cst_46 : f32 to vector<2x1xf32>
    %59 = arith.select %56, %57, %58 : vector<2x1xi1>, vector<2x1xf32>
    %60 = arith.addf %54, %59 : vector<2x1xf32>
    %c0_47 = arith.constant 0 : index
    %c0_48 = arith.constant 0 : index
    %61 = vector.load %arg7[%c0_47, %c0_48] : memref<2x1xf32, #tpu.memory_space<vmem>>, vector<2x1xf32>
    tpu.vector_store %arg7[%c0_47, %c0_48], %60 {strides = array<i32>} : memref<2x1xf32, #tpu.memory_space<vmem>>, vector<2x1xf32>,
    return
  }
  func.func @transform_0(%arg0: i32, %arg1: i32) -> (i32, i32, i32, i32, i32) {
    %c0_i32 = arith.constant 0 : i32
    %c0_i32_0 = arith.constant 0 : i32
    %c0_i32_1 = arith.constant 0 : i32
    %c0_i32_2 = arith.constant 0 : i32
    return %arg0, %arg1, %c0_i32, %c0_i32_0, %c0_i32_1 : i32, i32, i32, i32, i32
  }
  func.func @transform_1(%arg0: i32, %arg1: i32) -> (i32, i32, i32) {
    %c0_i32 = arith.constant 0 : i32
    %c0_i32_0 = arith.constant 0 : i32
    %c0_i32_1 = arith.constant 0 : i32
    %c0_i32_2 = arith.constant 0 : i32
    return %c0_i32, %c0_i32_0, %c0_i32_1 : i32, i32, i32
  }
  func.func @transform_2(%arg0: i32, %arg1: i32) -> (i32, i32) {
    %c0_i32 = arith.constant 0 : i32
    %c0_i32_0 = arith.constant 0 : i32
    %c0_i32_1 = arith.constant 0 : i32
    return %c0_i32, %c0_i32_0 : i32, i32
  }
  func.func @transform_3(%arg0: i32, %arg1: i32) -> (i32, i32) {
    %c0_i32 = arith.constant 0 : i32
    %c0_i32_0 = arith.constant 0 : i32
    %c0_i32_1 = arith.constant 0 : i32
    return %c0_i32, %c0_i32_0 : i32, i32
  }
  func.func @transform_4(%arg0: i32, %arg1: i32) -> (i32, i32) {
    %c0_i32 = arith.constant 0 : i32
    %c0_i32_0 = arith.constant 0 : i32
    %c0_i32_1 = arith.constant 0 : i32
    return %c0_i32, %c0_i32_0 : i32, i32
  }
  func.func @transform_5(%arg0: i32, %arg1: i32) -> (i32, i32) {
    %c0_i32 = arith.constant 0 : i32
    %c0_i32_0 = arith.constant 0 : i32
    %c0_i32_1 = arith.constant 0 : i32
    return %c0_i32, %c0_i32_0 : i32, i32
  }
}

</mosaic_0001>

<bundles_post_ra>
// kernel: _lambda_.3
= control target key start
LH: loop header
LB: loop body
LE: loop exit
PB: predicated region body
PF: predicated region fallthrough
CT: control target
= control target key end

     0   :  { %s4844_s15 = smov 0   ;;  %s4846_s16 = smov 0   ;;  %s6090_s0 = inlined_call_operand.vmem [shape: f32[2,2,17,33,12], index: 0, kind: input, shape index: {}]   ;;  %s6091_s1 = inlined_call_operand.vmem [shape: f32[4,12,8], index: 1, kind: input, shape index: {}]   ;;  %s6092_s2 = inlined_call_operand.vmem [shape: f32[1,8], index: 2, kind: input, shape index: {}]   ;;  %s6093_s3 = inlined_call_operand.vmem [shape: f32[1,8], index: 3, kind: input, shape index: {}]   ;;  %s6094_s4 = inlined_call_operand.vmem [shape: f32[2,2,512,8], index: 4, kind: output, shape index: {}]  }
   0x1   :  { %s4848_s17 = smov 0   ;;  %s4850_s18 = smov 0  }
   0x2   :  { %s4852_s19 = smov 0  }
   0x3 LB: > { %s23_s20 = sadd.s32 1, %s4808_s17  ;;  %s26_s21 = sadd.s32 1, %s4812_s18  ;;  %s4816_s19 = sphi %s4852_s19, %s14_s19   ;;  %s4812_s18 = sphi %s4850_s18, %s6283_s18   ;;  %s4808_s17 = sphi %s4848_s17, %s6282_s17   ;;  %s4804_s16 = sphi %s4846_s16, %s6281_s16   ;;  %s4800_s15 = sphi %s4844_s15, %s6280_s15  }
   0x4   : > { %p24_p0 = scmp.ge.s32.totalorder %s23_s20, 2  ;;  %p3450_p1 = scmp.ge.s32.totalorder %s4816_s19, 1 }
   0x5   : > { %p182_p2 = scmp.lt.s32.totalorder %s4816_s19, 5 }
   0x6   : > { %s6285_s20 = smov (%p24_p0, %s23_s20), 0  ;;  %s6287_s21 = smov (!%p24_p0, %s26_s21), %s4812_s18 }
   0x7   : > { %p183_p3 = pnand %p3450_p1, %p182_p2  ;;  %p28_p4 = scmp.ge.s32.totalorder %s6287_s21, 2 }
   0x9   : > { %s6289_s21 = smov (%p28_p4, %s6287_s21), 0  ;;  %186 = sbr.rel (%p183_p3) target bundleno = 504 (0x1f8), region = 36 }
  0x10   : > { %v3455_v0 = vld [vmem:[%s6091_s1 + $0x10] sm:$0xff]  ;;  %v3456_v1 = vld [vmem:[%s6091_s1 + $0x18] sm:$0xf]  ;;  %vm560_vm0 = vcmask 1043456   ;;  %v3651_v2 = vld [vmem:[%s6091_s1 + $0x20] sm:$0xff]  ;;  %vm4818_vm1 = vmmov 1  }
  0x11   : > { %v4517_v3 = vpack.c.bf16 %v3456_v1, %v3455_v0  ;;  %vm4887_vm2 = vmpackc.low %vm560_vm0, %vm4818_vm1  ;;  %v3652_v5 = vld [vmem:[%s6091_s1 + $0x28] sm:$0xf]  ;;  %p216_p5 = scmp.lt.s32.totalorder %s4804_s16, 1  ;;  %p218_p6 = scmp.lt.s32.totalorder %s4800_s15, 1  ;;  %v298_v6 = vld [vmem:[%s6091_s1] sm:$0xff]  ;;  %vm367_vm3 = vcmask 97280  }
  0x12   : > { %v4529_v7 = vpack.c.bf16 %v3652_v5, %v3651_v2  ;;  %v299_v8 = vld [vmem:[%s6091_s1 + $0x8] sm:$0xf]  ;;  %v3782_v9 = vld [vmem:[%s6091_s1 + $0x30] sm:$0xff]  ;;  %v3783_v10 = vld [vmem:[%s6091_s1 + $0x38] sm:$0xf]  ;;  %vm3286_vm5 = vcmask 64512  }
  0x13   : > { %4519 = vmatprep.subr.msk.bf16.mxu1 %vm4887_vm2, %v4517_v3  ;;  %s6291_s16 = smov (!%p216_p5, %s4804_s16), 1  ;;  %v4523_v11 = vpack.c.bf16 %v299_v8, %v298_v6  ;;  %v4535_v12 = vpack.c.bf16 %v3783_v10, %v3782_v9  ;;  %s6293_s15 = smov (!%p218_p6, %s4800_s15), 1 }
  0x14   : > { %4531 = vmatprep.subr.msk.bf16.mxu0 %vm4887_vm2, %v4529_v7  ;;  %4522 = vmatpush3.bf16.msk.msra.mxu1 %vm4887_vm2, %v4517_v3  ;;  %s4734_s12 = smul.u32 170, %s6291_s16  ;;  %s3452_s26 = sshll.u32 %s6293_s15, 6 }
  0x15   : > { %4534 = vmatpush3.bf16.msk.msra.mxu0 %vm4887_vm2, %v4529_v7  ;;  %4525 = vmatprep.subr.msk.bf16.mxu1 %vm4887_vm2, %v4523_v11  ;;  %s4733_s13 = smul.u32 85, %s6293_s15  ;;  %s3453_s27 = sshll.u32 %s6291_s16, 7 }
  0x16   : > { %4537 = vmatprep.subr.msk.bf16.mxu0 %vm4887_vm2, %v4535_v12  ;;  %s231_s30 = sadd.s32 %s3453_s27, %s3452_s26 }
  0x17   : > { %s222_s14 = sadd.s32 %s4734_s12, %s4733_s13  ;;  %s3454_s15 = sshll.u32 %s231_s30, 3 }
  0x18   : > { %s3451_s22 = sshll.u32 %s222_s14, 3  ;;  %s5828_s8 = scalar_lea.vmem %s6094_s4, %s3454_s15 }
  0x19   : > { %s4931_s25 = scalar_lea.vmem %s6090_s0, %s3451_s22 }
  0x1a   : > { %v300_v13 = vld [vmem:[%s4931_s25 + $0x1] sm:$0xff]  ;;  %v301_v15 = vld [vmem:[%s4931_s25 + $0x9] sm:$0xff]  ;;  %v302_v17 = vld [vmem:[%s4931_s25 + $0x11] sm:$0xff] }
  0x1b   : > { %v4935_v14 = vld [vmem:[%s4931_s25 + $0x28] sm:$0xff]  ;;  %4121 = vmatprep.mubr.msk.f32.mxu1 %vm367_vm3, %v300_v13  ;;  %v4942_v16 = vld [vmem:[%s4931_s25 + $0x30] sm:$0xff]  ;;  %v4946_v18 = vld [vmem:[%s4931_s25 + $0x38] sm:$0xff] }
  0x1c   : > { %4321 = vmatprep.mubr.msk.f32.mxu0 %vm367_vm3, %v4935_v14  ;;  %4122 = vmatmul.mubr.msk.f32.vlgmr.msra.gmra.mrb[0].mxu1 %vm367_vm3, %v301_v15  ;;  %v303_v19 = vld [vmem:[%s4931_s25 + $0x19] sm:$0xff]  ;;  %v4963_v21 = vld [vmem:[%s4931_s25 + $0x29] sm:$0xff]  ;;  %v4976_v23 = vld [vmem:[%s4931_s25 + $0x31] sm:$0xff] }
  0x1d   : > { %4322 = vmatmul.mubr.msk.f32.vlgmr.msra.gmra.mrb[0].mxu0 %vm367_vm3, %v4942_v16  ;;  %4528 = vmatpush3.bf16.msk.msra.mxu1 %vm4887_vm2, %v4523_v11  ;;  %v4957_v20 = vld [vmem:[%s4931_s25 + $0x40] sm:$0xff]  ;;  %v4966_v22 = vld [vmem:[%s4931_s25 + $0x50] sm:$0xff]  ;;  %v4979_v24 = vld [vmem:[%s4931_s25 + $0x58] sm:$0xff] }
  0x1e   : > { %4540 = vmatpush3.bf16.msk.msra.mxu0 %vm4887_vm2, %v4535_v12  ;;  %4124 = vmatprep.mubr.msk.f32.mxu1 %vm367_vm3, %v302_v17  ;;  %v4982_v25 = vld [vmem:[%s4931_s25 + $0x39] sm:$0xff]  ;;  %v4996_v27 = vld [vmem:[%s4931_s25 + $0x41] sm:$0xff]  ;;  %v5002_v29 = vld [vmem:[%s4931_s25 + $0x51] sm:$0xff] }
  0x1f   : > { %4324 = vmatprep.mubr.msk.f32.mxu0 %vm367_vm3, %v4946_v18  ;;  %v4985_v26 = vld [vmem:[%s4931_s25 + $0x60] sm:$0xff]  ;;  %v4999_v28 = vld [vmem:[%s4931_s25 + $0x68] sm:$0xff]  ;;  %v5005_v30 = vld [vmem:[%s4931_s25 + $0x78] sm:$0xff] }
  0x20   : > { %4125 = vmatmul.mubr.msk.f32.gmra.mrb[2].mxu1 %vm367_vm3, %v303_v19  ;;  %v5016_v31 = vld [vmem:[%s4931_s25 + $0x59] sm:$0xff]  ;;  %v5022_v33 = vld [vmem:[%s4931_s25 + $0x61] sm:$0xff]  ;;  %v5036_v35 = vld [vmem:[%s4931_s25 + $0x69] sm:$0xff] }
  0x21   : > { %4325 = vmatmul.mubr.msk.f32.gmra.mrb[2].mxu0 %vm367_vm3, %v4957_v20  ;;  %4127 = vmatprep.mubr.msk.f32.mxu1 %vm367_vm3, %v4963_v21  ;;  %v5019_v32 = vld [vmem:[%s4931_s25 + $0x80] sm:$0xff]  ;;  %v5025_v34 = vld [vmem:[%s4931_s25 + $0x88] sm:$0xff]  ;;  %v5039_v36 = vld [vmem:[%s4931_s25 + $0x90] sm:$0xff] }
  0x22   : > { %4327 = vmatprep.mubr.msk.f32.mxu0 %vm367_vm3, %v4966_v22  ;;  %v5042_v37 = vld [vmem:[%s4931_s25 + $0x79] sm:$0xff]  ;;  %v5056_v39 = vld [vmem:[%s4931_s25 + $0x81] sm:$0xff]  ;;  %v5062_v41 = vld [vmem:[%s4931_s25 + $0x89] sm:$0xff] }
  0x23   : > { %v5045_v38 = vld [vmem:[%s4931_s25 + $0xa0] sm:$0xff]  ;;  %v5059_v40 = vld [vmem:[%s4931_s25 + $0xa8] sm:$0xff]  ;;  %v5065_v42 = vld [vmem:[%s4931_s25 + $0xb0] sm:$0xff] }
  0x24   : > { %4128 = vmatmul.mubr.msk.f32.gmra.mrb[4].mxu1 %vm367_vm3, %v4976_v23  ;;  %v5076_v43 = vld [vmem:[%s4931_s25 + $0x91] sm:$0xff]  ;;  %v5082_v45 = vld [vmem:[%s4931_s25 + $0xa1] sm:$0xff]  ;;  %v5096_v47 = vld [vmem:[%s4931_s25 + $0xa9] sm:$0xff] }
  0x25   : > { %4328 = vmatmul.mubr.msk.f32.gmra.mrb[4].mxu0 %vm367_vm3, %v4979_v24  ;;  %4130 = vmatprep.mubr.msk.f32.mxu1 %vm367_vm3, %v4982_v25  ;;  %v5079_v44 = vld [vmem:[%s4931_s25 + $0xb8] sm:$0xff]  ;;  %v5085_v46 = vld [vmem:[%s4931_s25 + $0xc8] sm:$0xff]  ;;  %v5099_v48 = vld [vmem:[%s4931_s25 + $0xd0] sm:$0xff] }
  0x26   : > { %4330 = vmatprep.mubr.msk.f32.mxu0 %vm367_vm3, %v4985_v26  ;;  %v5102_v49 = vld [vmem:[%s4931_s25 + $0xb1] sm:$0xff]  ;;  %v5116_v51 = vld [vmem:[%s4931_s25 + $0xb9] sm:$0xff]  ;;  %v5122_v53 = vld [vmem:[%s4931_s25 + $0xc9] sm:$0xff] }
  0x27   : > { %v5105_v50 = vld [vmem:[%s4931_s25 + $0xd8] sm:$0xff]  ;;  %v5119_v52 = vld [vmem:[%s4931_s25 + $0xe0] sm:$0xff]  ;;  %v5125_v54 = vld [vmem:[%s4931_s25 + $0xf0] sm:$0xff] }
  0x28   : > { %4131 = vmatmul.mubr.msk.f32.gmra.mrb[6].mxu1 %vm367_vm3, %v4996_v27  ;;  %v5136_v55 = vld [vmem:[%s4931_s25 + $0xd1] sm:$0xff]  ;;  %v5142_v57 = vld [vmem:[%s4931_s25 + $0xd9] sm:$0xff]  ;;  %v5156_v59 = vld [vmem:[%s4931_s25 + $0xe1] sm:$0xff] }
  0x29   : > { %4331 = vmatmul.mubr.msk.f32.gmra.mrb[6].mxu0 %vm367_vm3, %v4999_v28  ;;  %4133 = vmatprep.mubr.msk.f32.mxu1 %vm367_vm3, %v5002_v29  ;;  %v5139_v56 = vld [vmem:[%s4931_s25 + $0xf8] sm:$0xff]  ;;  %v5145_v58 = vld [vmem:[%s4931_s25 + $0x100] sm:$0xff]  ;;  %v5159_v60 = vld [vmem:[%s4931_s25 + $0x108] sm:$0xff] }
  0x2a   : > { %4333 = vmatprep.mubr.msk.f32.mxu0 %vm367_vm3, %v5005_v30  ;;  %v5162_v61 = vld [vmem:[%s4931_s25 + $0xf1] sm:$0xff]  ;;  %v5176_v63 = vld [vmem:[%s4931_s25 + $0xf9] sm:$0xff]  ;;  %v5182_v1 = vld [vmem:[%s4931_s25 + $0x101] sm:$0xff] }
  0x2b   : > { %v5165_v62 = vld [vmem:[%s4931_s25 + $0x118] sm:$0xff]  ;;  %v5179_v0 = vld [vmem:[%s4931_s25 + $0x120] sm:$0xff]  ;;  %v5185_v2 = vld [vmem:[%s4931_s25 + $0x128] sm:$0xff] }
  0x2c   : > { %4134 = vmatmul.mubr.msk.f32.gmra.mrb[8].mxu1 %vm367_vm3, %v5016_v31  ;;  %6158 = vst [vmem:[#allocation2_spill] sm:$0xff] %v5185_v2  ;;  %v5196_v3 = vld [vmem:[%s4931_s25 + $0x109] sm:$0xff]  ;;  %v5202_v5 = vld [vmem:[%s4931_s25 + $0x119] sm:$0xff]  ;;  %v5216_v7 = vld [vmem:[%s4931_s25 + $0x121] sm:$0xff] }
  0x2d   : > { %4334 = vmatmul.mubr.msk.f32.gmra.mrb[8].mxu0 %vm367_vm3, %v5019_v32  ;;  %4136 = vmatprep.mubr.msk.f32.mxu1 %vm367_vm3, %v5022_v33  ;;  %v5199_v4 = vld [vmem:[%s4931_s25 + $0x130] sm:$0xff]  ;;  %v5205_v6 = vld [vmem:[%s4931_s25 + $0x140] sm:$0xff]  ;;  %v5219_v8 = vld [vmem:[%s4931_s25 + $0x148] sm:$0xff] }
  0x2e   : > { %4336 = vmatprep.mubr.msk.f32.mxu0 %vm367_vm3, %v5025_v34  ;;  %6159 = vst [vmem:[#allocation3_spill] sm:$0xff] %v5199_v4  ;;  %6160 = vst [vmem:[#allocation4_spill] sm:$0xff] %v5205_v6  ;;  %v5222_v9 = vld [vmem:[%s4931_s25 + $0x129] sm:$0xff]  ;;  %v5236_v11 = vld [vmem:[%s4931_s25 + $0x131] sm:$0xff] }
  0x2f   : > { %6161 = vst [vmem:[#allocation5_spill] sm:$0xff] %v5219_v8  ;;  %v5225_v10 = vld [vmem:[%s4931_s25 + $0x150] sm:$0xff]  ;;  %v5239_v12 = vld [vmem:[%s4931_s25 + $0x158] sm:$0xff]  ;;  %v5242_v13 = vld [vmem:[%s4931_s25 + $0x141] sm:$0xff] }
  0x30   : > { %4137 = vmatmul.mubr.msk.f32.gmra.mrb[10].mxu1 %vm367_vm3, %v5036_v35  ;;  %6162 = vst [vmem:[#allocation6_spill] sm:$0xff] %v5225_v10  ;;  %6163 = vst [vmem:[#allocation7_spill] sm:$0xff] %v5239_v12  ;;  %v5245_v15 = vld [vmem:[%s4931_s25 + $0x168] sm:$0xff]  ;;  %v5259_v19 = vld [vmem:[%s4931_s25 + $0x170] sm:$0xff] }
  0x31   : > { %4337 = vmatmul.mubr.msk.f32.gmra.mrb[10].mxu0 %vm367_vm3, %v5039_v36  ;;  %4139 = vmatprep.mubr.msk.f32.mxu1 %vm367_vm3, %v5042_v37  ;;  %6164 = vst [vmem:[#allocation8_spill] sm:$0xff] %v5245_v15  ;;  %v5256_v17 = vld [vmem:[%s4931_s25 + $0x149] sm:$0xff]  ;;  %6165 = vst [vmem:[#allocation9_spill] sm:$0xff] %v5259_v19 }
  0x32   : > { %4339 = vmatprep.mubr.msk.f32.mxu0 %vm367_vm3, %v5045_v38 }
  0x34   : > { %4140 = vmatmul.mubr.msk.f32.gmra.mrb[12].mxu1 %vm367_vm3, %v5056_v39 }
  0x35   : > { %4340 = vmatmul.mubr.msk.f32.gmra.mrb[12].mxu0 %vm367_vm3, %v5059_v40  ;;  %4142 = vmatprep.mubr.msk.f32.mxu1 %vm367_vm3, %v5062_v41 }
  0x36   : > { %4342 = vmatprep.mubr.msk.f32.mxu0 %vm367_vm3, %v5065_v42 }
  0x38   : > { %4143 = vmatmul.mubr.msk.f32.gmra.mrb[14].mxu1 %vm367_vm3, %v5076_v43 }
  0x39   : > { %4343 = vmatmul.mubr.msk.f32.gmra.mrb[14].mxu0 %vm367_vm3, %v5079_v44  ;;  %4145 = vmatprep.mubr.msk.f32.mxu1 %vm367_vm3, %v5082_v45 }
  0x3a   : > { %4345 = vmatprep.mubr.msk.f32.mxu0 %vm367_vm3, %v5085_v46 }
  0x3c   : > { %4146 = vmatmul.mubr.msk.f32.gmra.mrb[16].mxu1 %vm367_vm3, %v5096_v47 }
  0x3d   : > { %4346 = vmatmul.mubr.msk.f32.gmra.mrb[16].mxu0 %vm367_vm3, %v5099_v48  ;;  %4148 = vmatprep.mubr.msk.f32.mxu1 %vm367_vm3, %v5102_v49 }
  0x3e   : > { %4348 = vmatprep.mubr.msk.f32.mxu0 %vm367_vm3, %v5105_v50 }
  0x40   : > { %4149 = vmatmul.mubr.msk.f32.gmra.mrb[18].mxu1 %vm367_vm3, %v5116_v51 }
  0x41   : > { %4349 = vmatmul.mubr.msk.f32.gmra.mrb[18].mxu0 %vm367_vm3, %v5119_v52  ;;  %4151 = vmatprep.mubr.msk.f32.mxu1 %vm367_vm3, %v5122_v53 }
  0x42   : > { %4351 = vmatprep.mubr.msk.f32.mxu0 %vm367_vm3, %v5125_v54 }
  0x44   : > { %4152 = vmatmul.mubr.msk.f32.gmra.mrb[20].mxu1 %vm367_vm3, %v5136_v55 }
  0x45   : > { %4352 = vmatmul.mubr.msk.f32.gmra.mrb[20].mxu0 %vm367_vm3, %v5139_v56  ;;  %4154 = vmatprep.mubr.msk.f32.mxu1 %vm367_vm3, %v5142_v57 }
  0x46   : > { %4354 = vmatprep.mubr.msk.f32.mxu0 %vm367_vm3, %v5145_v58 }
  0x48   : > { %4155 = vmatmul.mubr.msk.f32.gmra.mrb[22].mxu1 %vm367_vm3, %v5156_v59 }
  0x49   : > { %4355 = vmatmul.mubr.msk.f32.gmra.mrb[22].mxu0 %vm367_vm3, %v5159_v60  ;;  %4157 = vmatprep.mubr.msk.f32.mxu1 %vm367_vm3, %v5162_v61 }
  0x4a   : > { %4357 = vmatprep.mubr.msk.f32.mxu0 %vm367_vm3, %v5165_v62 }
  0x4c   : > { %4158 = vmatmul.mubr.msk.f32.gmra.mrb[24].mxu1 %vm367_vm3, %v5176_v63 }
  0x4d   : > { %4358 = vmatmul.mubr.msk.f32.gmra.mrb[24].mxu0 %vm367_vm3, %v5179_v0  ;;  %4160 = vmatprep.mubr.msk.f32.mxu1 %vm367_vm3, %v5182_v1 }
  0x4e   : > { %4360 = vmatprep.mubr.msk.f32.mxu0 %vm367_vm3, %v5185_v2  ;;  %v5305_v2 = vld [vmem:[%s4931_s25 + $0x1a0] sm:$0xff] }
  0x4f   : > { %6175 = vst [vmem:[#allocation19_spill] sm:$0xff] %v5305_v2 }
  0x50   : > { %4161 = vmatmul.mubr.msk.f32.gmra.mrb[26].mxu1 %vm367_vm3, %v5196_v3 }
  0x51   : > { %4361 = vmatmul.mubr.msk.f32.gmra.mrb[26].mxu0 %vm367_vm3, %v5199_v4  ;;  %4163 = vmatprep.mubr.msk.f32.mxu1 %vm367_vm3, %v5202_v5  ;;  %v5285_v4 = vld [vmem:[%s4931_s25 + $0x190] sm:$0xff] }
  0x52   : > { %4363 = vmatprep.mubr.msk.f32.mxu0 %vm367_vm3, %v5205_v6  ;;  %v5282_v6 = vld [vmem:[%s4931_s25 + $0x169] sm:$0xff]  ;;  %6171 = vst [vmem:[#allocation15_spill] sm:$0xff] %v5285_v4 }
  0x53   : > { %6170 = vst [vmem:[#allocation14_spill] sm:$0xff] %v5282_v6 }
  0x54   : > { %4164 = vmatmul.mubr.msk.f32.gmra.mrb[28].mxu1 %vm367_vm3, %v5216_v7 }
  0x55   : > { %4364 = vmatmul.mubr.msk.f32.gmra.mrb[28].mxu0 %vm367_vm3, %v5219_v8  ;;  %4166 = vmatprep.mubr.msk.f32.mxu1 %vm367_vm3, %v5222_v9  ;;  %v5265_v8 = vld [vmem:[%s4931_s25 + $0x178] sm:$0xff] }
  0x56   : > { %4366 = vmatprep.mubr.msk.f32.mxu0 %vm367_vm3, %v5225_v10  ;;  %v5262_v10 = vld [vmem:[%s4931_s25 + $0x151] sm:$0xff]  ;;  %6167 = vst [vmem:[#allocation11_spill] sm:$0xff] %v5265_v8 }
  0x57   : > { %6166 = vst [vmem:[#allocation10_spill] sm:$0xff] %v5262_v10 }
  0x58   : > { %4167 = vmatmul.mubr.msk.f32.gmra.mrb[30].mxu1 %vm367_vm3, %v5236_v11 }
  0x59   : > { %4367 = vmatmul.mubr.msk.f32.gmra.mrb[30].mxu0 %vm367_vm3, %v5239_v12  ;;  %4169 = vmatprep.mubr.msk.f32.mxu1 %vm367_vm3, %v5242_v13  ;;  %v5279_v12 = vld [vmem:[%s4931_s25 + $0x180] sm:$0xff] }
  0x5a   : > { %4369 = vmatprep.mubr.msk.f32.mxu0 %vm367_vm3, %v5245_v15  ;;  %v5276_v15 = vld [vmem:[%s4931_s25 + $0x159] sm:$0xff]  ;;  %6169 = vst [vmem:[#allocation13_spill] sm:$0xff] %v5279_v12 }
  0x5b   : > { %6168 = vst [vmem:[#allocation12_spill] sm:$0xff] %v5276_v15 }
  0x5c   : > { %4170 = vmatmul.mubr.msk.f32.gmra.mrb[32].mxu1 %vm367_vm3, %v5256_v17 }
  0x5d   : > { %4370 = vmatmul.mubr.msk.f32.gmra.mrb[32].mxu0 %vm367_vm3, %v5259_v19  ;;  %4172 = vmatprep.mubr.msk.f32.mxu1 %vm367_vm3, %v5262_v10  ;;  %v5299_v19 = vld [vmem:[%s4931_s25 + $0x198] sm:$0xff] }
  0x5e   : > { %4372 = vmatprep.mubr.msk.f32.mxu0 %vm367_vm3, %v5265_v8  ;;  %v5296_v8 = vld [vmem:[%s4931_s25 + $0x171] sm:$0xff]  ;;  %6173 = vst [vmem:[#allocation17_spill] sm:$0xff] %v5299_v19  ;;  %v5302_v10 = vld [vmem:[%s4931_s25 + $0x179] sm:$0xff] }
  0x5f   : > { %6172 = vst [vmem:[#allocation16_spill] sm:$0xff] %v5296_v8  ;;  %6174 = vst [vmem:[#allocation18_spill] sm:$0xff] %v5302_v10 }
  0x60   : > { %4173 = vmatmul.mubr.msk.f32.gmra.mrb[34].mxu1 %vm367_vm3, %v5276_v15  ;;  %v5325_v15 = vld [vmem:[%s4931_s25 + $0x1b8] sm:$0xff] }
  0x61   : > { %4373 = vmatmul.mubr.msk.f32.gmra.mrb[34].mxu0 %vm367_vm3, %v5279_v12  ;;  %4175 = vmatprep.mubr.msk.f32.mxu1 %vm367_vm3, %v5282_v6  ;;  %v5319_v12 = vld [vmem:[%s4931_s25 + $0x1a8] sm:$0xff]  ;;  %v5322_v6 = vld [vmem:[%s4931_s25 + $0x191] sm:$0xff]  ;;  %6179 = vst [vmem:[#allocation23_spill] sm:$0xff] %v5325_v15 }
  0x62   : > { %4375 = vmatprep.mubr.msk.f32.mxu0 %vm367_vm3, %v5285_v4  ;;  %v5316_v4 = vld [vmem:[%s4931_s25 + $0x181] sm:$0xff]  ;;  %6177 = vst [vmem:[#allocation21_spill] sm:$0xff] %v5319_v12  ;;  %6178 = vst [vmem:[#allocation22_spill] sm:$0xff] %v5322_v6 }
  0x63   : > { %6176 = vst [vmem:[#allocation20_spill] sm:$0xff] %v5316_v4 }
  0x64   : > { %4176 = vmatmul.mubr.msk.f32.gmra.mrb[36].mxu1 %vm367_vm3, %v5296_v8  ;;  %v5345_v8 = vld [vmem:[%s4931_s25 + $0x1c8] sm:$0xff] }
  0x65   : > { %4376 = vmatmul.mubr.msk.f32.gmra.mrb[36].mxu0 %vm367_vm3, %v5299_v19  ;;  %4178 = vmatprep.mubr.msk.f32.mxu1 %vm367_vm3, %v5302_v10  ;;  %v5339_v19 = vld [vmem:[%s4931_s25 + $0x1c0] sm:$0xff]  ;;  %6183 = vst [vmem:[#allocation27_spill] sm:$0xff] %v5345_v8 }
  0x66   : > { %4378 = vmatprep.mubr.msk.f32.mxu0 %vm367_vm3, %v5305_v2  ;;  %v5336_v2 = vld [vmem:[%s4931_s25 + $0x199] sm:$0xff]  ;;  %6181 = vst [vmem:[#allocation25_spill] sm:$0xff] %v5339_v19  ;;  %v5342_v10 = vld [vmem:[%s4931_s25 + $0x1a1] sm:$0xff] }
  0x67   : > { %6180 = vst [vmem:[#allocation24_spill] sm:$0xff] %v5336_v2  ;;  %6182 = vst [vmem:[#allocation26_spill] sm:$0xff] %v5342_v10 }
  0x68   : > { %4179 = vmatmul.mubr.msk.f32.gmra.mrb[38].mxu1 %vm367_vm3, %v5316_v4  ;;  %v5365_v4 = vld [vmem:[%s4931_s25 + $0x1e0] sm:$0xff] }
  0x69   : > { %4379 = vmatmul.mubr.msk.f32.gmra.mrb[38].mxu0 %vm367_vm3, %v5319_v12  ;;  %4181 = vmatprep.mubr.msk.f32.mxu1 %vm367_vm3, %v5322_v6  ;;  %v5359_v12 = vld [vmem:[%s4931_s25 + $0x1d0] sm:$0xff]  ;;  %v5362_v6 = vld [vmem:[%s4931_s25 + $0x1b9] sm:$0xff]  ;;  %6187 = vst [vmem:[#allocation31_spill] sm:$0xff] %v5365_v4 }
  0x6a   : > { %4381 = vmatprep.mubr.msk.f32.mxu0 %vm367_vm3, %v5325_v15  ;;  %v5356_v15 = vld [vmem:[%s4931_s25 + $0x1a9] sm:$0xff]  ;;  %6185 = vst [vmem:[#allocation29_spill] sm:$0xff] %v5359_v12  ;;  %6186 = vst [vmem:[#allocation30_spill] sm:$0xff] %v5362_v6 }
  0x6b   : > { %6184 = vst [vmem:[#allocation28_spill] sm:$0xff] %v5356_v15 }
  0x6c   : > { %4182 = vmatmul.mubr.msk.f32.gmra.mrb[40].mxu1 %vm367_vm3, %v5336_v2  ;;  %v5385_v2 = vld [vmem:[%s4931_s25 + $0x1f0] sm:$0xff] }
  0x6d   : > { %4382 = vmatmul.mubr.msk.f32.gmra.mrb[40].mxu0 %vm367_vm3, %v5339_v19  ;;  %4184 = vmatprep.mubr.msk.f32.mxu1 %vm367_vm3, %v5342_v10  ;;  %v5379_v19 = vld [vmem:[%s4931_s25 + $0x1e8] sm:$0xff]  ;;  %6191 = vst [vmem:[#allocation35_spill] sm:$0xff] %v5385_v2 }
  0x6e   : > { %4384 = vmatprep.mubr.msk.f32.mxu0 %vm367_vm3, %v5345_v8  ;;  %v5376_v8 = vld [vmem:[%s4931_s25 + $0x1c1] sm:$0xff]  ;;  %6189 = vst [vmem:[#allocation33_spill] sm:$0xff] %v5379_v19  ;;  %v5382_v10 = vld [vmem:[%s4931_s25 + $0x1c9] sm:$0xff] }
  0x6f   : > { %6188 = vst [vmem:[#allocation32_spill] sm:$0xff] %v5376_v8  ;;  %6190 = vst [vmem:[#allocation34_spill] sm:$0xff] %v5382_v10 }
  0x70   : > { %4185 = vmatmul.mubr.msk.f32.gmra.mrb[42].mxu1 %vm367_vm3, %v5356_v15  ;;  %v5405_v15 = vld [vmem:[%s4931_s25 + $0x208] sm:$0xff] }
  0x71   : > { %4385 = vmatmul.mubr.msk.f32.gmra.mrb[42].mxu0 %vm367_vm3, %v5359_v12  ;;  %4187 = vmatprep.mubr.msk.f32.mxu1 %vm367_vm3, %v5362_v6  ;;  %v5399_v12 = vld [vmem:[%s4931_s25 + $0x1f8] sm:$0xff]  ;;  %v5402_v6 = vld [vmem:[%s4931_s25 + $0x1e1] sm:$0xff]  ;;  %6195 = vst [vmem:[#allocation39_spill] sm:$0xff] %v5405_v15 }
  0x72   : > { %4387 = vmatprep.mubr.msk.f32.mxu0 %vm367_vm3, %v5365_v4  ;;  %v5396_v4 = vld [vmem:[%s4931_s25 + $0x1d1] sm:$0xff]  ;;  %6193 = vst [vmem:[#allocation37_spill] sm:$0xff] %v5399_v12  ;;  %6194 = vst [vmem:[#allocation38_spill] sm:$0xff] %v5402_v6 }
  0x73   : > { %6192 = vst [vmem:[#allocation36_spill] sm:$0xff] %v5396_v4 }
  0x74   : > { %4188 = vmatmul.mubr.msk.f32.gmra.mrb[44].mxu1 %vm367_vm3, %v5376_v8  ;;  %v5425_v8 = vld [vmem:[%s4931_s25 + $0x218] sm:$0xff] }
  0x75   : > { %4388 = vmatmul.mubr.msk.f32.gmra.mrb[44].mxu0 %vm367_vm3, %v5379_v19  ;;  %4190 = vmatprep.mubr.msk.f32.mxu1 %vm367_vm3, %v5382_v10  ;;  %v5419_v19 = vld [vmem:[%s4931_s25 + $0x210] sm:$0xff]  ;;  %6199 = vst [vmem:[#allocation43_spill] sm:$0xff] %v5425_v8 }
  0x76   : > { %4390 = vmatprep.mubr.msk.f32.mxu0 %vm367_vm3, %v5385_v2  ;;  %v5416_v2 = vld [vmem:[%s4931_s25 + $0x1e9] sm:$0xff]  ;;  %6197 = vst [vmem:[#allocation41_spill] sm:$0xff] %v5419_v19  ;;  %v5422_v10 = vld [vmem:[%s4931_s25 + $0x1f1] sm:$0xff] }
  0x77   : > { %6196 = vst [vmem:[#allocation40_spill] sm:$0xff] %v5416_v2  ;;  %6198 = vst [vmem:[#allocation42_spill] sm:$0xff] %v5422_v10 }
  0x78   : > { %4191 = vmatmul.mubr.msk.f32.gmra.mrb[46].mxu1 %vm367_vm3, %v5396_v4  ;;  %v5445_v4 = vld [vmem:[%s4931_s25 + $0x230] sm:$0xff] }
  0x79   : > { %4391 = vmatmul.mubr.msk.f32.gmra.mrb[46].mxu0 %vm367_vm3, %v5399_v12  ;;  %4193 = vmatprep.mubr.msk.f32.mxu1 %vm367_vm3, %v5402_v6  ;;  %v5439_v12 = vld [vmem:[%s4931_s25 + $0x220] sm:$0xff]  ;;  %v5442_v6 = vld [vmem:[%s4931_s25 + $0x209] sm:$0xff]  ;;  %6203 = vst [vmem:[#allocation47_spill] sm:$0xff] %v5445_v4 }
  0x7a   : > { %4393 = vmatprep.mubr.msk.f32.mxu0 %vm367_vm3, %v5405_v15  ;;  %v5436_v15 = vld [vmem:[%s4931_s25 + $0x1f9] sm:$0xff]  ;;  %6201 = vst [vmem:[#allocation45_spill] sm:$0xff] %v5439_v12  ;;  %6202 = vst [vmem:[#allocation46_spill] sm:$0xff] %v5442_v6 }
  0x7b   : > { %6200 = vst [vmem:[#allocation44_spill] sm:$0xff] %v5436_v15 }
  0x7c   : > { %4194 = vmatmul.mubr.msk.f32.gmra.mrb[48].mxu1 %vm367_vm3, %v5416_v2  ;;  %v5465_v2 = vld [vmem:[%s4931_s25 + $0x240] sm:$0xff] }
  0x7d   : > { %4394 = vmatmul.mubr.msk.f32.gmra.mrb[48].mxu0 %vm367_vm3, %v5419_v19  ;;  %4196 = vmatprep.mubr.msk.f32.mxu1 %vm367_vm3, %v5422_v10  ;;  %v5459_v19 = vld [vmem:[%s4931_s25 + $0x238] sm:$0xff]  ;;  %6207 = vst [vmem:[#allocation51_spill] sm:$0xff] %v5465_v2 }
  0x7e   : > { %4396 = vmatprep.mubr.msk.f32.mxu0 %vm367_vm3, %v5425_v8  ;;  %v5456_v8 = vld [vmem:[%s4931_s25 + $0x211] sm:$0xff]  ;;  %6205 = vst [vmem:[#allocation49_spill] sm:$0xff] %v5459_v19  ;;  %v5462_v10 = vld [vmem:[%s4931_s25 + $0x219] sm:$0xff] }
  0x7f   : > { %6204 = vst [vmem:[#allocation48_spill] sm:$0xff] %v5456_v8  ;;  %6206 = vst [vmem:[#allocation50_spill] sm:$0xff] %v5462_v10 }
  0x80   : > { %4197 = vmatmul.mubr.msk.f32.gmra.mrb[50].mxu1 %vm367_vm3, %v5436_v15  ;;  %v5485_v15 = vld [vmem:[%s4931_s25 + $0x258] sm:$0xff] }
  0x81   : > { %4397 = vmatmul.mubr.msk.f32.gmra.mrb[50].mxu0 %vm367_vm3, %v5439_v12  ;;  %4199 = vmatprep.mubr.msk.f32.mxu1 %vm367_vm3, %v5442_v6  ;;  %v5479_v12 = vld [vmem:[%s4931_s25 + $0x248] sm:$0xff]  ;;  %v5482_v6 = vld [vmem:[%s4931_s25 + $0x231] sm:$0xff]  ;;  %6211 = vst [vmem:[#allocation55_spill] sm:$0xff] %v5485_v15 }
  0x82   : > { %4399 = vmatprep.mubr.msk.f32.mxu0 %vm367_vm3, %v5445_v4  ;;  %v5476_v4 = vld [vmem:[%s4931_s25 + $0x221] sm:$0xff]  ;;  %6209 = vst [vmem:[#allocation53_spill] sm:$0xff] %v5479_v12  ;;  %6210 = vst [vmem:[#allocation54_spill] sm:$0xff] %v5482_v6 }
  0x83   : > { %6208 = vst [vmem:[#allocation52_spill] sm:$0xff] %v5476_v4 }
  0x84   : > { %4200 = vmatmul.mubr.msk.f32.gmra.mrb[52].mxu1 %vm367_vm3, %v5456_v8  ;;  %v5505_v8 = vld [vmem:[%s4931_s25 + $0x268] sm:$0xff] }
  0x85   : > { %4400 = vmatmul.mubr.msk.f32.gmra.mrb[52].mxu0 %vm367_vm3, %v5459_v19  ;;  %4202 = vmatprep.mubr.msk.f32.mxu1 %vm367_vm3, %v5462_v10  ;;  %v5499_v19 = vld [vmem:[%s4931_s25 + $0x260] sm:$0xff]  ;;  %6215 = vst [vmem:[#allocation59_spill] sm:$0xff] %v5505_v8 }
  0x86   : > { %4402 = vmatprep.mubr.msk.f32.mxu0 %vm367_vm3, %v5465_v2  ;;  %v5496_v2 = vld [vmem:[%s4931_s25 + $0x239] sm:$0xff]  ;;  %6213 = vst [vmem:[#allocation57_spill] sm:$0xff] %v5499_v19  ;;  %v5502_v10 = vld [vmem:[%s4931_s25 + $0x241] sm:$0xff] }
  0x87   : > { %6212 = vst [vmem:[#allocation56_spill] sm:$0xff] %v5496_v2  ;;  %6214 = vst [vmem:[#allocation58_spill] sm:$0xff] %v5502_v10 }
  0x88   : > { %4203 = vmatmul.mubr.msk.f32.gmra.mrb[54].mxu1 %vm367_vm3, %v5476_v4  ;;  %v3647_v4 = vld [vmem:[%s4931_s25 + $0x280] sm:$0xff] }
  0x89   : > { %4403 = vmatmul.mubr.msk.f32.gmra.mrb[54].mxu0 %vm367_vm3, %v5479_v12  ;;  %4205 = vmatprep.mubr.msk.f32.mxu1 %vm367_vm3, %v5482_v6  ;;  %v5519_v12 = vld [vmem:[%s4931_s25 + $0x270] sm:$0xff]  ;;  %v5522_v6 = vld [vmem:[%s4931_s25 + $0x259] sm:$0xff] }
  0x8a   : > { %4405 = vmatprep.mubr.msk.f32.mxu0 %vm367_vm3, %v5485_v15  ;;  %v5516_v15 = vld [vmem:[%s4931_s25 + $0x249] sm:$0xff]  ;;  %6216 = vst [vmem:[#allocation60_spill] sm:$0xff] %v5519_v12  ;;  %6217 = vst [vmem:[#allocation61_spill] sm:$0xff] %v5522_v6 }
  0x8c   : > { %4206 = vmatmul.mubr.msk.f32.gmra.mrb[56].mxu1 %vm367_vm3, %v5496_v2  ;;  %v3649_v2 = vld [vmem:[%s4931_s25 + $0x290] sm:$0xff] }
  0x8d   : > { %4406 = vmatmul.mubr.msk.f32.gmra.mrb[56].mxu0 %vm367_vm3, %v5499_v19  ;;  %4208 = vmatprep.mubr.msk.f32.mxu1 %vm367_vm3, %v5502_v10  ;;  %v3648_v19 = vld [vmem:[%s4931_s25 + $0x288] sm:$0xff] }
  0x8e   : > { %4408 = vmatprep.mubr.msk.f32.mxu0 %vm367_vm3, %v5505_v8  ;;  %v5533_v8 = vld [vmem:[%s4931_s25 + $0x261] sm:$0xff]  ;;  %v5537_v10 = vld [vmem:[%s4931_s25 + $0x269] sm:$0xff] }
  0x8f   : > { %6218 = vst [vmem:[#allocation62_spill] sm:$0xff] %v5533_v8 }
  0x90   : > { %4209 = vmatmul.mubr.msk.f32.gmra.mrb[58].mxu1 %vm367_vm3, %v5516_v15 }
  0x91   : > { %4409 = vmatmul.mubr.msk.f32.gmra.mrb[58].mxu0 %vm367_vm3, %v5519_v12  ;;  %4211 = vmatprep.mubr.msk.f32.mxu1 %vm367_vm3, %v5522_v6  ;;  %v3650_v12 = vld [vmem:[%s4931_s25 + $0x298] sm:$0xff]  ;;  %v234_v6 = vld [vmem:[%s4931_s25] sm:$0xff] }
  0x92   : > { %4411 = vmatprep.mubr.msk.f32.mxu0 %vm367_vm3, %v3647_v4  ;;  %v5547_v4 = vld [vmem:[%s4931_s25 + $0x271] sm:$0xff] }
  0x94   : > { %4212 = vmatmul.mubr.msk.f32.gmra.mrb[60].mxu1 %vm367_vm3, %v5533_v8  ;;  %v236_v8 = vld [vmem:[%s4931_s25 + $0x10] sm:$0xff] }
  0x95   : > { %4412 = vmatmul.mubr.msk.f32.gmra.mrb[60].mxu0 %vm367_vm3, %v3648_v19  ;;  %4214 = vmatprep.mubr.msk.f32.mxu1 %vm367_vm3, %v5537_v10  ;;  %v235_v19 = vld [vmem:[%s4931_s25 + $0x8] sm:$0xff] }
  0x96   : > { %4414 = vmatprep.mubr.msk.f32.mxu0 %vm367_vm3, %v3649_v2  ;;  %v237_v2 = vld [vmem:[%s4931_s25 + $0x18] sm:$0xff] }
  0x98   : > { %4215 = vmatmul.mubr.msk.f32.gmra.mrb[62].mxu1 %vm367_vm3, %v5547_v4 }
  0x99   : > { %4415 = vmatmul.mubr.msk.f32.gmra.mrb[62].mxu0 %vm367_vm3, %v3650_v12  ;;  %4221 = vmatprep.mubr.msk.f32.mxu1 %vm367_vm3, %v234_v6  ;;  %v6270_v6 = vld [vmem:[#allocation47_spill] sm:$0xff] }
  0x9a   : > { %4421 = vmatprep.mubr.msk.f32.mxu0 %vm367_vm3, %v4963_v21  ;;  %v6223_v21 = vld [vmem:[#allocation4_spill] sm:$0xff]  ;;  %v3778_v12 = vld [vmem:[%s4931_s25 + $0x281] sm:$0xff] }
  0x9c   : > { %4222 = vmatmul.mubr.msk.f32.vlgmr.msra.gmra.mrb[0].mxu1 %vm367_vm3, %v235_v19  ;;  %v3780_v19 = vld [vmem:[%s4931_s25 + $0x291] sm:$0xff] }
  0x9d   : > { %4422 = vmatmul.mubr.msk.f32.vlgmr.msra.gmra.mrb[0].mxu0 %vm367_vm3, %v4976_v23  ;;  %4224 = vmatprep.mubr.msk.f32.mxu1 %vm367_vm3, %v236_v8  ;;  %v6225_v23 = vld [vmem:[#allocation5_spill] sm:$0xff] }
  0x9e   : > { %4424 = vmatprep.mubr.msk.f32.mxu0 %vm367_vm3, %v4982_v25  ;;  %v6227_v25 = vld [vmem:[#allocation6_spill] sm:$0xff]  ;;  %v6272_v8 = vld [vmem:[#allocation49_spill] sm:$0xff] }
  0xa0   : > { %4225 = vmatmul.mubr.msk.f32.gmra.mrb[2].mxu1 %vm367_vm3, %v237_v2  ;;  %v6277_v2 = vld [vmem:[#allocation57_spill] sm:$0xff] }
  0xa1   : > { %4425 = vmatmul.mubr.msk.f32.gmra.mrb[2].mxu0 %vm367_vm3, %v4996_v27  ;;  %4227 = vmatprep.mubr.msk.f32.mxu1 %vm367_vm3, %v4935_v14  ;;  %v6219_v14 = vld [vmem:[#allocation2_spill] sm:$0xff]  ;;  %v6229_v27 = vld [vmem:[#allocation7_spill] sm:$0xff] }
  0xa2   : > { %4427 = vmatprep.mubr.msk.f32.mxu0 %vm367_vm3, %v5002_v29  ;;  %v6231_v29 = vld [vmem:[#allocation8_spill] sm:$0xff] }
  0xa4   : > { %4228 = vmatmul.mubr.msk.f32.gmra.mrb[4].mxu1 %vm367_vm3, %v4942_v16  ;;  %v6220_v16 = vld [vmem:[#allocation10_spill] sm:$0xff] }
  0xa5   : > { %4428 = vmatmul.mubr.msk.f32.gmra.mrb[4].mxu0 %vm367_vm3, %v5016_v31  ;;  %4230 = vmatprep.mubr.msk.f32.mxu1 %vm367_vm3, %v4946_v18  ;;  %v6221_v18 = vld [vmem:[#allocation3_spill] sm:$0xff]  ;;  %v6233_v31 = vld [vmem:[#allocation9_spill] sm:$0xff] }
  0xa6   : > { %4430 = vmatprep.mubr.msk.f32.mxu0 %vm367_vm3, %v5022_v33  ;;  %v6235_v33 = vld [vmem:[#allocation11_spill] sm:$0xff] }
  0xa8   : > { %4231 = vmatmul.mubr.msk.f32.gmra.mrb[6].mxu1 %vm367_vm3, %v4957_v20  ;;  %v6222_v20 = vld [vmem:[#allocation12_spill] sm:$0xff] }
  0xa9   : > { %4431 = vmatmul.mubr.msk.f32.gmra.mrb[6].mxu0 %vm367_vm3, %v5036_v35  ;;  %4233 = vmatprep.mubr.msk.f32.mxu1 %vm367_vm3, %v4966_v22  ;;  %v6224_v22 = vld [vmem:[#allocation14_spill] sm:$0xff]  ;;  %v6237_v35 = vld [vmem:[#allocation13_spill] sm:$0xff] }
  0xaa   : > { %4433 = vmatprep.mubr.msk.f32.mxu0 %vm367_vm3, %v5042_v37  ;;  %v6239_v37 = vld [vmem:[#allocation15_spill] sm:$0xff] }
  0xac   : > { %4234 = vmatmul.mubr.msk.f32.gmra.mrb[8].mxu1 %vm367_vm3, %v4979_v24  ;;  %v6226_v24 = vld [vmem:[#allocation16_spill] sm:$0xff] }
  0xad   : > { %4434 = vmatmul.mubr.msk.f32.gmra.mrb[8].mxu0 %vm367_vm3, %v5056_v39  ;;  %4236 = vmatprep.mubr.msk.f32.mxu1 %vm367_vm3, %v4985_v26  ;;  %v6228_v26 = vld [vmem:[#allocation18_spill] sm:$0xff]  ;;  %v6241_v39 = vld [vmem:[#allocation17_spill] sm:$0xff] }
  0xae   : > { %4436 = vmatprep.mubr.msk.f32.mxu0 %vm367_vm3, %v5062_v41  ;;  %v6243_v41 = vld [vmem:[#allocation19_spill] sm:$0xff] }
  0xb0   : > { %4237 = vmatmul.mubr.msk.f32.gmra.mrb[10].mxu1 %vm367_vm3, %v4999_v28  ;;  %v6230_v28 = vld [vmem:[#allocation20_spill] sm:$0xff] }
  0xb1   : > { %4437 = vmatmul.mubr.msk.f32.gmra.mrb[10].mxu0 %vm367_vm3, %v5076_v43  ;;  %4239 = vmatprep.mubr.msk.f32.mxu1 %vm367_vm3, %v5005_v30  ;;  %v6232_v30 = vld [vmem:[#allocation22_spill] sm:$0xff]  ;;  %v6245_v43 = vld [vmem:[#allocation21_spill] sm:$0xff] }
  0xb2   : > { %4439 = vmatprep.mubr.msk.f32.mxu0 %vm367_vm3, %v5082_v45  ;;  %v6247_v45 = vld [vmem:[#allocation23_spill] sm:$0xff] }
  0xb4   : > { %4240 = vmatmul.mubr.msk.f32.gmra.mrb[12].mxu1 %vm367_vm3, %v5019_v32  ;;  %v6234_v32 = vld [vmem:[#allocation24_spill] sm:$0xff] }
  0xb5   : > { %4440 = vmatmul.mubr.msk.f32.gmra.mrb[12].mxu0 %vm367_vm3, %v5096_v47  ;;  %4242 = vmatprep.mubr.msk.f32.mxu1 %vm367_vm3, %v5025_v34  ;;  %v6236_v34 = vld [vmem:[#allocation26_spill] sm:$0xff]  ;;  %v6249_v47 = vld [vmem:[#allocation25_spill] sm:$0xff] }
  0xb6   : > { %4442 = vmatprep.mubr.msk.f32.mxu0 %vm367_vm3, %v5102_v49  ;;  %v6251_v49 = vld [vmem:[#allocation27_spill] sm:$0xff] }
  0xb8   : > { %4243 = vmatmul.mubr.msk.f32.gmra.mrb[14].mxu1 %vm367_vm3, %v5039_v36  ;;  %v6238_v36 = vld [vmem:[#allocation28_spill] sm:$0xff] }
  0xb9   : > { %4443 = vmatmul.mubr.msk.f32.gmra.mrb[14].mxu0 %vm367_vm3, %v5116_v51  ;;  %4245 = vmatprep.mubr.msk.f32.mxu1 %vm367_vm3, %v5045_v38  ;;  %v6240_v38 = vld [vmem:[#allocation30_spill] sm:$0xff]  ;;  %v6253_v51 = vld [vmem:[#allocation29_spill] sm:$0xff] }
  0xba   : > { %4445 = vmatprep.mubr.msk.f32.mxu0 %vm367_vm3, %v5122_v53  ;;  %v6255_v53 = vld [vmem:[#allocation31_spill] sm:$0xff] }
  0xbc   : > { %4246 = vmatmul.mubr.msk.f32.gmra.mrb[16].mxu1 %vm367_vm3, %v5059_v40  ;;  %v6242_v40 = vld [vmem:[#allocation32_spill] sm:$0xff] }
  0xbd   : > { %4446 = vmatmul.mubr.msk.f32.gmra.mrb[16].mxu0 %vm367_vm3, %v5136_v55  ;;  %4248 = vmatprep.mubr.msk.f32.mxu1 %vm367_vm3, %v5065_v42  ;;  %v6244_v42 = vld [vmem:[#allocation34_spill] sm:$0xff]  ;;  %v6257_v55 = vld [vmem:[#allocation33_spill] sm:$0xff] }
  0xbe   : > { %4448 = vmatprep.mubr.msk.f32.mxu0 %vm367_vm3, %v5142_v57  ;;  %v6259_v57 = vld [vmem:[#allocation35_spill] sm:$0xff] }
  0xc0   : > { %4249 = vmatmul.mubr.msk.f32.gmra.mrb[18].mxu1 %vm367_vm3, %v5079_v44  ;;  %v6246_v44 = vld [vmem:[#allocation36_spill] sm:$0xff] }
  0xc1   : > { %4449 = vmatmul.mubr.msk.f32.gmra.mrb[18].mxu0 %vm367_vm3, %v5156_v59  ;;  %4251 = vmatprep.mubr.msk.f32.mxu1 %vm367_vm3, %v5085_v46  ;;  %v6248_v46 = vld [vmem:[#allocation38_spill] sm:$0xff]  ;;  %v6261_v59 = vld [vmem:[#allocation37_spill] sm:$0xff] }
  0xc2   : > { %4451 = vmatprep.mubr.msk.f32.mxu0 %vm367_vm3, %v5162_v61  ;;  %v6263_v61 = vld [vmem:[#allocation39_spill] sm:$0xff] }
  0xc4   : > { %4252 = vmatmul.mubr.msk.f32.gmra.mrb[20].mxu1 %vm367_vm3, %v5099_v48  ;;  %v6250_v48 = vld [vmem:[#allocation40_spill] sm:$0xff] }
  0xc5   : > { %4452 = vmatmul.mubr.msk.f32.gmra.mrb[20].mxu0 %vm367_vm3, %v5176_v63  ;;  %4254 = vmatprep.mubr.msk.f32.mxu1 %vm367_vm3, %v5105_v50  ;;  %v6252_v50 = vld [vmem:[#allocation42_spill] sm:$0xff]  ;;  %v6265_v63 = vld [vmem:[#allocation41_spill] sm:$0xff] }
  0xc6   : > { %4454 = vmatprep.mubr.msk.f32.mxu0 %vm367_vm3, %v5182_v1  ;;  %v6267_v1 = vld [vmem:[#allocation43_spill] sm:$0xff] }
  0xc8   : > { %4255 = vmatmul.mubr.msk.f32.gmra.mrb[22].mxu1 %vm367_vm3, %v5119_v52  ;;  %v6254_v52 = vld [vmem:[#allocation44_spill] sm:$0xff] }
  0xc9   : > { %4455 = vmatmul.mubr.msk.f32.gmra.mrb[22].mxu0 %vm367_vm3, %v5196_v3  ;;  %4257 = vmatprep.mubr.msk.f32.mxu1 %vm367_vm3, %v5125_v54  ;;  %v6256_v54 = vld [vmem:[#allocation46_spill] sm:$0xff] }
  0xca   : > { %4457 = vmatprep.mubr.msk.f32.mxu0 %vm367_vm3, %v5202_v5  ;;  %v6268_v3 = vld [vmem:[#allocation58_spill] sm:$0xff]  ;;  %v6269_v5 = vld [vmem:[#allocation45_spill] sm:$0xff] }
  0xcc   : > { %4258 = vmatmul.mubr.msk.f32.gmra.mrb[24].mxu1 %vm367_vm3, %v5139_v56  ;;  %v6258_v56 = vld [vmem:[#allocation48_spill] sm:$0xff] }
  0xcd   : > { %4458 = vmatmul.mubr.msk.f32.gmra.mrb[24].mxu0 %vm367_vm3, %v5216_v7  ;;  %4260 = vmatprep.mubr.msk.f32.mxu1 %vm367_vm3, %v5145_v58  ;;  %v6260_v58 = vld [vmem:[#allocation50_spill] sm:$0xff]  ;;  %v6271_v7 = vld [vmem:[#allocation61_spill] sm:$0xff] }
  0xce   : > { %4460 = vmatprep.mubr.msk.f32.mxu0 %vm367_vm3, %v5222_v9  ;;  %v6273_v9 = vld [vmem:[#allocation62_spill] sm:$0xff] }
  0xd0   : > { %4261 = vmatmul.mubr.msk.f32.gmra.mrb[26].mxu1 %vm367_vm3, %v5159_v60  ;;  %v6262_v60 = vld [vmem:[#allocation52_spill] sm:$0xff] }
  0xd1   : > { %4461 = vmatmul.mubr.msk.f32.gmra.mrb[26].mxu0 %vm367_vm3, %v5236_v11  ;;  %4263 = vmatprep.mubr.msk.f32.mxu1 %vm367_vm3, %v5165_v62  ;;  %v6264_v62 = vld [vmem:[#allocation54_spill] sm:$0xff]  ;;  %v6274_v11 = vld [vmem:[#allocation51_spill] sm:$0xff] }
  0xd2   : > { %4463 = vmatprep.mubr.msk.f32.mxu0 %vm367_vm3, %v5242_v13  ;;  %v6275_v13 = vld [vmem:[#allocation53_spill] sm:$0xff] }
  0xd4   : > { %4264 = vmatmul.mubr.msk.f32.gmra.mrb[28].mxu1 %vm367_vm3, %v5179_v0  ;;  %v6266_v0 = vld [vmem:[#allocation56_spill] sm:$0xff] }
  0xd5   : > { %4464 = vmatmul.mubr.msk.f32.gmra.mrb[28].mxu0 %vm367_vm3, %v5256_v17  ;;  %4266 = vmatprep.mubr.msk.f32.mxu1 %vm367_vm3, %v6219_v14  ;;  %v3779_v17 = vld [vmem:[%s4931_s25 + $0x289] sm:$0xff]  ;;  %v3781_v14 = vld [vmem:[%s4931_s25 + $0x299] sm:$0xff] }
  0xd6   : > { %4466 = vmatprep.mubr.msk.f32.mxu0 %vm367_vm3, %v6220_v16  ;;  %v6279_v16 = vld [vmem:[#allocation60_spill] sm:$0xff] }
  0xd8   : > { %4267 = vmatmul.mubr.msk.f32.gmra.mrb[30].mxu1 %vm367_vm3, %v6221_v18 }
  0xd9   : > { %4467 = vmatmul.mubr.msk.f32.gmra.mrb[30].mxu0 %vm367_vm3, %v6222_v20  ;;  %4269 = vmatprep.mubr.msk.f32.mxu1 %vm367_vm3, %v6223_v21  ;;  %v5814_v20 = vld [vmem:[%s6092_s2] ss:$0 sm:$0xff] }
  0xda   : > { %4469 = vmatprep.mubr.msk.f32.mxu0 %vm367_vm3, %v6224_v22 }
  0xdc   : > { %4270 = vmatmul.mubr.msk.f32.gmra.mrb[32].mxu1 %vm367_vm3, %v6225_v23 }
  0xdd   : > { %4470 = vmatmul.mubr.msk.f32.gmra.mrb[32].mxu0 %vm367_vm3, %v6226_v24  ;;  %4272 = vmatprep.mubr.msk.f32.mxu1 %vm367_vm3, %v6227_v25  ;;  %v5819_v24 = vld [vmem:[%s6093_s3] ss:$0 sm:$0xff] }
  0xde   : > { %4472 = vmatprep.mubr.msk.f32.mxu0 %vm367_vm3, %v6228_v26 }
  0xe0   : > { %4273 = vmatmul.mubr.msk.f32.gmra.mrb[34].mxu1 %vm367_vm3, %v6229_v27 }
  0xe1   : > { %4473 = vmatmul.mubr.msk.f32.gmra.mrb[34].mxu0 %vm367_vm3, %v6230_v28  ;;  %4275 = vmatprep.mubr.msk.f32.mxu1 %vm367_vm3, %v6231_v29 }
  0xe2   : > { %4475 = vmatprep.mubr.msk.f32.mxu0 %vm367_vm3, %v6232_v30 }
  0xe4   : > { %4276 = vmatmul.mubr.msk.f32.gmra.mrb[36].mxu1 %vm367_vm3, %v6233_v31 }
  0xe5   : > { %4476 = vmatmul.mubr.msk.f32.gmra.mrb[36].mxu0 %vm367_vm3, %v6234_v32  ;;  %4278 = vmatprep.mubr.msk.f32.mxu1 %vm367_vm3, %v6235_v33 }
  0xe6   : > { %4478 = vmatprep.mubr.msk.f32.mxu0 %vm367_vm3, %v6236_v34 }
  0xe8   : > { %4279 = vmatmul.mubr.msk.f32.gmra.mrb[38].mxu1 %vm367_vm3, %v6237_v35 }
  0xe9   : > { %4479 = vmatmul.mubr.msk.f32.gmra.mrb[38].mxu0 %vm367_vm3, %v6238_v36  ;;  %4281 = vmatprep.mubr.msk.f32.mxu1 %vm367_vm3, %v6239_v37 }
  0xea   : > { %4481 = vmatprep.mubr.msk.f32.mxu0 %vm367_vm3, %v6240_v38 }
  0xec   : > { %4282 = vmatmul.mubr.msk.f32.gmra.mrb[40].mxu1 %vm367_vm3, %v6241_v39 }
  0xed   : > { %4482 = vmatmul.mubr.msk.f32.gmra.mrb[40].mxu0 %vm367_vm3, %v6242_v40  ;;  %4284 = vmatprep.mubr.msk.f32.mxu1 %vm367_vm3, %v6243_v41 }
  0xee   : > { %4484 = vmatprep.mubr.msk.f32.mxu0 %vm367_vm3, %v6244_v42 }
  0xf0   : > { %4285 = vmatmul.mubr.msk.f32.gmra.mrb[42].mxu1 %vm367_vm3, %v6245_v43 }
  0xf1   : > { %4485 = vmatmul.mubr.msk.f32.gmra.mrb[42].mxu0 %vm367_vm3, %v6246_v44  ;;  %4287 = vmatprep.mubr.msk.f32.mxu1 %vm367_vm3, %v6247_v45 }
  0xf2   : > { %4487 = vmatprep.mubr.msk.f32.mxu0 %vm367_vm3, %v6248_v46 }
  0xf4   : > { %4288 = vmatmul.mubr.msk.f32.gmra.mrb[44].mxu1 %vm367_vm3, %v6249_v47 }
  0xf5   : > { %4488 = vmatmul.mubr.msk.f32.gmra.mrb[44].mxu0 %vm367_vm3, %v6250_v48  ;;  %4290 = vmatprep.mubr.msk.f32.mxu1 %vm367_vm3, %v6251_v49 }
  0xf6   : > { %4490 = vmatprep.mubr.msk.f32.mxu0 %vm367_vm3, %v6252_v50 }
  0xf8   : > { %4291 = vmatmul.mubr.msk.f32.gmra.mrb[46].mxu1 %vm367_vm3, %v6253_v51 }
  0xf9   : > { %4491 = vmatmul.mubr.msk.f32.gmra.mrb[46].mxu0 %vm367_vm3, %v6254_v52  ;;  %4293 = vmatprep.mubr.msk.f32.mxu1 %vm367_vm3, %v6255_v53 }
  0xfa   : > { %4493 = vmatprep.mubr.msk.f32.mxu0 %vm367_vm3, %v6256_v54 }
  0xfc   : > { %4294 = vmatmul.mubr.msk.f32.gmra.mrb[48].mxu1 %vm367_vm3, %v6257_v55 }
  0xfd   : > { %4494 = vmatmul.mubr.msk.f32.gmra.mrb[48].mxu0 %vm367_vm3, %v6258_v56  ;;  %4296 = vmatprep.mubr.msk.f32.mxu1 %vm367_vm3, %v6259_v57 }
  0xfe   : > { %4496 = vmatprep.mubr.msk.f32.mxu0 %vm367_vm3, %v6260_v58 }
 0x100   : > { %4297 = vmatmul.mubr.msk.f32.gmra.mrb[50].mxu1 %vm367_vm3, %v6261_v59 }
 0x101   : > { %4497 = vmatmul.mubr.msk.f32.gmra.mrb[50].mxu0 %vm367_vm3, %v6262_v60  ;;  %4299 = vmatprep.mubr.msk.f32.mxu1 %vm367_vm3, %v6263_v61 }
 0x102   : > { %4499 = vmatprep.mubr.msk.f32.mxu0 %vm367_vm3, %v6264_v62 }
 0x104   : > { %4300 = vmatmul.mubr.msk.f32.gmra.mrb[52].mxu1 %vm367_vm3, %v6265_v63 }
 0x105   : > { %4500 = vmatmul.mubr.msk.f32.gmra.mrb[52].mxu0 %vm367_vm3, %v6266_v0  ;;  %4302 = vmatprep.mubr.msk.f32.mxu1 %vm367_vm3, %v6267_v1 }
 0x106   : > { %4502 = vmatprep.mubr.msk.f32.mxu0 %vm367_vm3, %v6268_v3 }
 0x108   : > { %4303 = vmatmul.mubr.msk.f32.gmra.mrb[54].mxu1 %vm367_vm3, %v6269_v5 }
 0x109   : > { %4503 = vmatmul.mubr.msk.f32.gmra.mrb[54].mxu0 %vm367_vm3, %v5516_v15  ;;  %4305 = vmatprep.mubr.msk.f32.mxu1 %vm367_vm3, %v6270_v6  ;;  %v6276_v15 = vld [vmem:[#allocation55_spill] sm:$0xff] }
 0x10a   : > { %4505 = vmatprep.mubr.msk.f32.mxu0 %vm367_vm3, %v6271_v7 }
 0x10c   : > { %4306 = vmatmul.mubr.msk.f32.gmra.mrb[56].mxu1 %vm367_vm3, %v6272_v8 }
 0x10d   : > { %4506 = vmatmul.mubr.msk.f32.gmra.mrb[56].mxu0 %vm367_vm3, %v6273_v9  ;;  %4308 = vmatprep.mubr.msk.f32.mxu1 %vm367_vm3, %v6274_v11 }
 0x10e   : > { %4508 = vmatprep.mubr.msk.f32.mxu0 %vm367_vm3, %v5537_v10  ;;  %v6278_v10 = vld [vmem:[#allocation59_spill] sm:$0xff] }
 0x110   : > { %4309 = vmatmul.mubr.msk.f32.gmra.mrb[58].mxu1 %vm367_vm3, %v6275_v13 }
 0x111   : > { %4509 = vmatmul.mubr.msk.f32.gmra.mrb[58].mxu0 %vm367_vm3, %v5547_v4  ;;  %4311 = vmatprep.mubr.msk.f32.mxu1 %vm367_vm3, %v6276_v15 }
 0x112   : > { %4511 = vmatprep.mubr.msk.f32.mxu0 %vm367_vm3, %v3778_v12 }
 0x114   : > { %4312 = vmatmul.mubr.msk.f32.gmra.mrb[60].mxu1 %vm367_vm3, %v6277_v2 }
 0x115   : > { %4512 = vmatmul.mubr.msk.f32.gmra.mrb[60].mxu0 %vm367_vm3, %v3779_v17  ;;  %4314 = vmatprep.mubr.msk.f32.mxu1 %vm367_vm3, %v6278_v10 }
 0x116   : > { %4514 = vmatprep.mubr.msk.f32.mxu0 %vm367_vm3, %v3780_v19 }
 0x118   : > { %4315 = vmatmul.mubr.msk.f32.gmra.mrb[62].mxu1 %vm367_vm3, %v6279_v16 }
 0x119   : > { %4515 = vmatmul.mubr.msk.f32.gmra.mrb[62].mxu0 %vm367_vm3, %v3781_v14 }
 0x16f   : > { %v4223_v4 = vpop.f32.mrb[0].mxu1 }
 0x170   : > { %v4423_v18 = vpop.f32.mrb[0].mxu0  ;;  %v1210_v22 = vpop.f32.mrb[1].mxu1 }
 0x171   : > { %v4541_v21 = vadd.f32 %v4423_v18, %v4223_v4  ;;  %v2569_v23 = vpop.f32.mrb[1].mxu0 }
 0x172   : > { %v4542_v25 = vadd.f32 %v2569_v23, %v1210_v22 }
 0x173   : > { %v2960_v26 = vmul.f32 %v4541_v21, %v5814_v20  ;;  %v4226_v28 = vpop.f32.mrb[2].mxu1 }
 0x174   : > { %v2959_v27 = vmul.f32 %v4542_v25, %v5814_v20  ;;  %v4426_v29 = vpop.f32.mrb[2].mxu0  ;;  %v1220_v32 = vpop.f32.mrb[3].mxu1 }
 0x175   : > { %v3031_v30 = vadd.f32 %v5819_v24, %v2960_v26  ;;  %v4543_v31 = vadd.f32 %v4426_v29, %v4226_v28  ;;  %v2579_v33 = vpop.f32.mrb[3].mxu0 }
 0x176   : > { %v3030_v34 = vadd.f32 %v5819_v24, %v2959_v27  ;;  %v4544_v35 = vadd.f32 %v2579_v33, %v1220_v32 }
 0x177   : > { %vm3095_vm4 = vcmp.gt.f32.partialorder %v3031_v30, 0.0  ;;  %v3159_v36 = vmul.f32 0.2, %v3031_v30  ;;  %v2962_v37 = vmul.f32 %v4543_v31, %v5814_v20  ;;  %v4229_v40 = vpop.f32.mrb[4].mxu1 }
 0x178   : > { %vm3094_vm6 = vcmp.gt.f32.partialorder %v3030_v34, 0.0  ;;  %v3158_v38 = vmul.f32 0.2, %v3030_v34  ;;  %v2961_v39 = vmul.f32 %v4544_v35, %v5814_v20  ;;  %v4429_v41 = vpop.f32.mrb[4].mxu0  ;;  %v1230_v45 = vpop.f32.mrb[5].mxu1 }
 0x179   : > { %v3223_v42 = vsel %vm3095_vm4, %v3031_v30, %v3159_v36  ;;  %v3033_v43 = vadd.f32 %v5819_v24, %v2962_v37  ;;  %v4545_v44 = vadd.f32 %v4429_v41, %v4229_v40  ;;  %v2589_v46 = vpop.f32.mrb[5].mxu0 }
 0x17a   : > { %3288 = vst.msk [vmem:[%s5828_s8 + $0x8] sm:$0xff] %vm3286_vm5, %v3223_v42  ;;  %v3222_v47 = vsel %vm3094_vm6, %v3030_v34, %v3158_v38  ;;  %v3032_v48 = vadd.f32 %v5819_v24, %v2961_v39  ;;  %v4546_v49 = vadd.f32 %v2589_v46, %v1230_v45 }
 0x17b   : > { %3287 = vst.msk [vmem:[%s5828_s8] sm:$0xff] %vm3286_vm5, %v3222_v47  ;;  %vm3097_vm7 = vcmp.gt.f32.partialorder %v3033_v43, 0.0  ;;  %v3161_v50 = vmul.f32 0.2, %v3033_v43  ;;  %v2964_v51 = vmul.f32 %v4545_v44, %v5814_v20  ;;  %v4232_v54 = vpop.f32.mrb[6].mxu1 }
 0x17c   : > { %vm3096_vm8 = vcmp.gt.f32.partialorder %v3032_v48, 0.0  ;;  %v3160_v52 = vmul.f32 0.2, %v3032_v48  ;;  %v2963_v53 = vmul.f32 %v4546_v49, %v5814_v20  ;;  %v4432_v55 = vpop.f32.mrb[6].mxu0  ;;  %v1240_v59 = vpop.f32.mrb[7].mxu1 }
 0x17d   : > { %v3225_v56 = vsel %vm3097_vm7, %v3033_v43, %v3161_v50  ;;  %v3035_v57 = vadd.f32 %v5819_v24, %v2964_v51  ;;  %v4547_v58 = vadd.f32 %v4432_v55, %v4232_v54  ;;  %v2599_v60 = vpop.f32.mrb[7].mxu0 }
 0x17e   : > { %3290 = vst.msk [vmem:[%s5828_s8 + $0x18] sm:$0xff] %vm3286_vm5, %v3225_v56  ;;  %v3224_v61 = vsel %vm3096_vm8, %v3032_v48, %v3160_v52  ;;  %v3034_v62 = vadd.f32 %v5819_v24, %v2963_v53  ;;  %v4548_v63 = vadd.f32 %v2599_v60, %v1240_v59 }
 0x17f   : > { %3289 = vst.msk [vmem:[%s5828_s8 + $0x10] sm:$0xff] %vm3286_vm5, %v3224_v61  ;;  %vm3099_vm9 = vcmp.gt.f32.partialorder %v3035_v57, 0.0  ;;  %v3163_v0 = vmul.f32 0.2, %v3035_v57  ;;  %v2966_v1 = vmul.f32 %v4547_v58, %v5814_v20  ;;  %v4235_v6 = vpop.f32.mrb[8].mxu1 }
 0x180   : > { %vm3098_vm10 = vcmp.gt.f32.partialorder %v3034_v62, 0.0  ;;  %v3162_v3 = vmul.f32 0.2, %v3034_v62  ;;  %v2965_v5 = vmul.f32 %v4548_v63, %v5814_v20  ;;  %v4435_v7 = vpop.f32.mrb[8].mxu0  ;;  %v1250_v12 = vpop.f32.mrb[9].mxu1 }
 0x181   : > { %v3227_v8 = vsel %vm3099_vm9, %v3035_v57, %v3163_v0  ;;  %v3037_v9 = vadd.f32 %v5819_v24, %v2966_v1  ;;  %v4549_v11 = vadd.f32 %v4435_v7, %v4235_v6  ;;  %v2609_v13 = vpop.f32.mrb[9].mxu0 }
 0x182   : > { %3292 = vst.msk [vmem:[%s5828_s8 + $0x28] sm:$0xff] %vm3286_vm5, %v3227_v8  ;;  %v3226_v15 = vsel %vm3098_vm10, %v3034_v62, %v3162_v3  ;;  %v3036_v17 = vadd.f32 %v5819_v24, %v2965_v5  ;;  %v4550_v19 = vadd.f32 %v2609_v13, %v1250_v12 }
 0x183   : > { %3291 = vst.msk [vmem:[%s5828_s8 + $0x20] sm:$0xff] %vm3286_vm5, %v3226_v15  ;;  %vm3101_vm11 = vcmp.gt.f32.partialorder %v3037_v9, 0.0  ;;  %v3165_v2 = vmul.f32 0.2, %v3037_v9  ;;  %v2968_v10 = vmul.f32 %v4549_v11, %v5814_v20  ;;  %v4238_v4 = vpop.f32.mrb[10].mxu1 }
 0x184   : > { %vm3100_vm12 = vcmp.gt.f32.partialorder %v3036_v17, 0.0  ;;  %v3164_v14 = vmul.f32 0.2, %v3036_v17  ;;  %v2967_v16 = vmul.f32 %v4550_v19, %v5814_v20  ;;  %v4438_v18 = vpop.f32.mrb[10].mxu0  ;;  %v1260_v25 = vpop.f32.mrb[11].mxu1 }
 0x185   : > { %v3229_v21 = vsel %vm3101_vm11, %v3037_v9, %v3165_v2  ;;  %v3039_v22 = vadd.f32 %v5819_v24, %v2968_v10  ;;  %v4551_v23 = vadd.f32 %v4438_v18, %v4238_v4  ;;  %v2619_v26 = vpop.f32.mrb[11].mxu0 }
 0x186   : > { %3294 = vst.msk [vmem:[%s5828_s8 + $0x38] sm:$0xff] %vm3286_vm5, %v3229_v21  ;;  %v3228_v27 = vsel %vm3100_vm12, %v3036_v17, %v3164_v14  ;;  %v3038_v28 = vadd.f32 %v5819_v24, %v2967_v16  ;;  %v4552_v29 = vadd.f32 %v2619_v26, %v1260_v25 }
 0x187   : > { %3293 = vst.msk [vmem:[%s5828_s8 + $0x30] sm:$0xff] %vm3286_vm5, %v3228_v27  ;;  %vm3103_vm13 = vcmp.gt.f32.partialorder %v3039_v22, 0.0  ;;  %v3167_v30 = vmul.f32 0.2, %v3039_v22  ;;  %v2970_v31 = vmul.f32 %v4551_v23, %v5814_v20  ;;  %v4241_v34 = vpop.f32.mrb[12].mxu1 }
 0x188   : > { %vm3102_vm14 = vcmp.gt.f32.partialorder %v3038_v28, 0.0  ;;  %v3166_v32 = vmul.f32 0.2, %v3038_v28  ;;  %v2969_v33 = vmul.f32 %v4552_v29, %v5814_v20  ;;  %v4441_v35 = vpop.f32.mrb[12].mxu0  ;;  %v1270_v39 = vpop.f32.mrb[13].mxu1 }
 0x189   : > { %v3231_v36 = vsel %vm3103_vm13, %v3039_v22, %v3167_v30  ;;  %v3041_v37 = vadd.f32 %v5819_v24, %v2970_v31  ;;  %v4553_v38 = vadd.f32 %v4441_v35, %v4241_v34  ;;  %v2629_v40 = vpop.f32.mrb[13].mxu0 }
 0x18a   : > { %3296 = vst.msk [vmem:[%s5828_s8 + $0x48] sm:$0xff] %vm3286_vm5, %v3231_v36  ;;  %v3230_v41 = vsel %vm3102_vm14, %v3038_v28, %v3166_v32  ;;  %v3040_v42 = vadd.f32 %v5819_v24, %v2969_v33  ;;  %v4554_v43 = vadd.f32 %v2629_v40, %v1270_v39 }
 0x18b   : > { %3295 = vst.msk [vmem:[%s5828_s8 + $0x40] sm:$0xff] %vm3286_vm5, %v3230_v41  ;;  %vm3105_vm15 = vcmp.gt.f32.partialorder %v3041_v37, 0.0  ;;  %v3169_v44 = vmul.f32 0.2, %v3041_v37  ;;  %v2972_v45 = vmul.f32 %v4553_v38, %v5814_v20  ;;  %v4244_v48 = vpop.f32.mrb[14].mxu1 }
 0x18c   : > { %vm3104_vm0 = vcmp.gt.f32.partialorder %v3040_v42, 0.0  ;;  %v3168_v46 = vmul.f32 0.2, %v3040_v42  ;;  %v2971_v47 = vmul.f32 %v4554_v43, %v5814_v20  ;;  %v4444_v49 = vpop.f32.mrb[14].mxu0  ;;  %v1280_v53 = vpop.f32.mrb[15].mxu1 }
 0x18d   : > { %v3233_v50 = vsel %vm3105_vm15, %v3041_v37, %v3169_v44  ;;  %v3043_v51 = vadd.f32 %v5819_v24, %v2972_v45  ;;  %v4555_v52 = vadd.f32 %v4444_v49, %v4244_v48  ;;  %v2639_v54 = vpop.f32.mrb[15].mxu0 }
 0x18e   : > { %3298 = vst.msk [vmem:[%s5828_s8 + $0x58] sm:$0xff] %vm3286_vm5, %v3233_v50  ;;  %v3232_v55 = vsel %vm3104_vm0, %v3040_v42, %v3168_v46  ;;  %v3042_v56 = vadd.f32 %v5819_v24, %v2971_v47  ;;  %v4556_v57 = vadd.f32 %v2639_v54, %v1280_v53 }
 0x18f   : > { %3297 = vst.msk [vmem:[%s5828_s8 + $0x50] sm:$0xff] %vm3286_vm5, %v3232_v55  ;;  %vm3107_vm1 = vcmp.gt.f32.partialorder %v3043_v51, 0.0  ;;  %v3171_v58 = vmul.f32 0.2, %v3043_v51  ;;  %v2974_v59 = vmul.f32 %v4555_v52, %v5814_v20  ;;  %v4247_v62 = vpop.f32.mrb[16].mxu1 }
 0x190   : > { %vm3106_vm2 = vcmp.gt.f32.partialorder %v3042_v56, 0.0  ;;  %v3170_v60 = vmul.f32 0.2, %v3042_v56  ;;  %v2973_v61 = vmul.f32 %v4556_v57, %v5814_v20  ;;  %v4447_v63 = vpop.f32.mrb[16].mxu0  ;;  %v1290_v5 = vpop.f32.mrb[17].mxu1 }
 0x191   : > { %v3235_v0 = vsel %vm3107_vm1, %v3043_v51, %v3171_v58  ;;  %v3045_v1 = vadd.f32 %v5819_v24, %v2974_v59  ;;  %v4557_v3 = vadd.f32 %v4447_v63, %v4247_v62  ;;  %v2649_v6 = vpop.f32.mrb[17].mxu0 }
 0x192   : > { %3300 = vst.msk [vmem:[%s5828_s8 + $0x68] sm:$0xff] %vm3286_vm5, %v3235_v0  ;;  %v3234_v7 = vsel %vm3106_vm2, %v3042_v56, %v3170_v60  ;;  %v3044_v8 = vadd.f32 %v5819_v24, %v2973_v61  ;;  %v4558_v9 = vadd.f32 %v2649_v6, %v1290_v5 }
 0x193   : > { %3299 = vst.msk [vmem:[%s5828_s8 + $0x60] sm:$0xff] %vm3286_vm5, %v3234_v7  ;;  %vm3109_vm3 = vcmp.gt.f32.partialorder %v3045_v1, 0.0  ;;  %v3173_v11 = vmul.f32 0.2, %v3045_v1  ;;  %v2976_v12 = vmul.f32 %v4557_v3, %v5814_v20  ;;  %v4250_v17 = vpop.f32.mrb[18].mxu1 }
 0x194   : > { %vm3108_vm4 = vcmp.gt.f32.partialorder %v3044_v8, 0.0  ;;  %v3172_v13 = vmul.f32 0.2, %v3044_v8  ;;  %v2975_v15 = vmul.f32 %v4558_v9, %v5814_v20  ;;  %v4450_v19 = vpop.f32.mrb[18].mxu0  ;;  %v1300_v16 = vpop.f32.mrb[19].mxu1 }
 0x195   : > { %v3237_v2 = vsel %vm3109_vm3, %v3045_v1, %v3173_v11  ;;  %v3047_v10 = vadd.f32 %v5819_v24, %v2976_v12  ;;  %v4559_v14 = vadd.f32 %v4450_v19, %v4250_v17  ;;  %v2659_v4 = vpop.f32.mrb[19].mxu0 }
 0x196   : > { %3302 = vst.msk [vmem:[%s5828_s8 + $0x78] sm:$0xff] %vm3286_vm5, %v3237_v2  ;;  %v3236_v18 = vsel %vm3108_vm4, %v3044_v8, %v3172_v13  ;;  %v3046_v21 = vadd.f32 %v5819_v24, %v2975_v15  ;;  %v4560_v22 = vadd.f32 %v2659_v4, %v1300_v16 }
 0x197   : > { %3301 = vst.msk [vmem:[%s5828_s8 + $0x70] sm:$0xff] %vm3286_vm5, %v3236_v18  ;;  %vm3111_vm6 = vcmp.gt.f32.partialorder %v3047_v10, 0.0  ;;  %v3175_v23 = vmul.f32 0.2, %v3047_v10  ;;  %v2978_v25 = vmul.f32 %v4559_v14, %v5814_v20  ;;  %v4253_v28 = vpop.f32.mrb[20].mxu1 }
 0x198   : > { %vm3110_vm7 = vcmp.gt.f32.partialorder %v3046_v21, 0.0  ;;  %v3174_v26 = vmul.f32 0.2, %v3046_v21  ;;  %v2977_v27 = vmul.f32 %v4560_v22, %v5814_v20  ;;  %v4453_v29 = vpop.f32.mrb[20].mxu0  ;;  %v1310_v33 = vpop.f32.mrb[21].mxu1 }
 0x199   : > { %v3239_v30 = vsel %vm3111_vm6, %v3047_v10, %v3175_v23  ;;  %v3049_v31 = vadd.f32 %v5819_v24, %v2978_v25  ;;  %v4561_v32 = vadd.f32 %v4453_v29, %v4253_v28  ;;  %v2669_v34 = vpop.f32.mrb[21].mxu0 }
 0x19a   : > { %3304 = vst.msk [vmem:[%s5828_s8 + $0x88] sm:$0xff] %vm3286_vm5, %v3239_v30  ;;  %v3238_v35 = vsel %vm3110_vm7, %v3046_v21, %v3174_v26  ;;  %v3048_v36 = vadd.f32 %v5819_v24, %v2977_v27  ;;  %v4562_v37 = vadd.f32 %v2669_v34, %v1310_v33 }
 0x19b   : > { %3303 = vst.msk [vmem:[%s5828_s8 + $0x80] sm:$0xff] %vm3286_vm5, %v3238_v35  ;;  %vm3113_vm8 = vcmp.gt.f32.partialorder %v3049_v31, 0.0  ;;  %v3177_v38 = vmul.f32 0.2, %v3049_v31  ;;  %v2980_v39 = vmul.f32 %v4561_v32, %v5814_v20  ;;  %v4256_v42 = vpop.f32.mrb[22].mxu1 }
 0x19c   : > { %vm3112_vm9 = vcmp.gt.f32.partialorder %v3048_v36, 0.0  ;;  %v3176_v40 = vmul.f32 0.2, %v3048_v36  ;;  %v2979_v41 = vmul.f32 %v4562_v37, %v5814_v20  ;;  %v4456_v43 = vpop.f32.mrb[22].mxu0  ;;  %v1320_v47 = vpop.f32.mrb[23].mxu1 }
 0x19d   : > { %v3241_v44 = vsel %vm3113_vm8, %v3049_v31, %v3177_v38  ;;  %v3051_v45 = vadd.f32 %v5819_v24, %v2980_v39  ;;  %v4563_v46 = vadd.f32 %v4456_v43, %v4256_v42  ;;  %v2679_v48 = vpop.f32.mrb[23].mxu0 }
 0x19e   : > { %3306 = vst.msk [vmem:[%s5828_s8 + $0x98] sm:$0xff] %vm3286_vm5, %v3241_v44  ;;  %v3240_v49 = vsel %vm3112_vm9, %v3048_v36, %v3176_v40  ;;  %v3050_v50 = vadd.f32 %v5819_v24, %v2979_v41  ;;  %v4564_v51 = vadd.f32 %v2679_v48, %v1320_v47 }
 0x19f   : > { %3305 = vst.msk [vmem:[%s5828_s8 + $0x90] sm:$0xff] %vm3286_vm5, %v3240_v49  ;;  %vm3115_vm10 = vcmp.gt.f32.partialorder %v3051_v45, 0.0  ;;  %v3179_v52 = vmul.f32 0.2, %v3051_v45  ;;  %v2982_v53 = vmul.f32 %v4563_v46, %v5814_v20  ;;  %v4259_v56 = vpop.f32.mrb[24].mxu1 }
 0x1a0   : > { %vm3114_vm11 = vcmp.gt.f32.partialorder %v3050_v50, 0.0  ;;  %v3178_v54 = vmul.f32 0.2, %v3050_v50  ;;  %v2981_v55 = vmul.f32 %v4564_v51, %v5814_v20  ;;  %v4459_v57 = vpop.f32.mrb[24].mxu0  ;;  %v1330_v61 = vpop.f32.mrb[25].mxu1 }
 0x1a1   : > { %v3243_v58 = vsel %vm3115_vm10, %v3051_v45, %v3179_v52  ;;  %v3053_v59 = vadd.f32 %v5819_v24, %v2982_v53  ;;  %v4565_v60 = vadd.f32 %v4459_v57, %v4259_v56  ;;  %v2689_v62 = vpop.f32.mrb[25].mxu0 }
 0x1a2   : > { %3308 = vst.msk [vmem:[%s5828_s8 + $0xa8] sm:$0xff] %vm3286_vm5, %v3243_v58  ;;  %v3242_v63 = vsel %vm3114_vm11, %v3050_v50, %v3178_v54  ;;  %v3052_v0 = vadd.f32 %v5819_v24, %v2981_v55  ;;  %v4566_v1 = vadd.f32 %v2689_v62, %v1330_v61 }
 0x1a3   : > { %3307 = vst.msk [vmem:[%s5828_s8 + $0xa0] sm:$0xff] %vm3286_vm5, %v3242_v63  ;;  %vm3117_vm12 = vcmp.gt.f32.partialorder %v3053_v59, 0.0  ;;  %v3181_v3 = vmul.f32 0.2, %v3053_v59  ;;  %v2984_v5 = vmul.f32 %v4565_v60, %v5814_v20  ;;  %v4262_v8 = vpop.f32.mrb[26].mxu1 }
 0x1a4   : > { %vm3116_vm13 = vcmp.gt.f32.partialorder %v3052_v0, 0.0  ;;  %v3180_v6 = vmul.f32 0.2, %v3052_v0  ;;  %v2983_v7 = vmul.f32 %v4566_v1, %v5814_v20  ;;  %v4462_v9 = vpop.f32.mrb[26].mxu0  ;;  %v1340_v15 = vpop.f32.mrb[27].mxu1 }
 0x1a5   : > { %v3245_v11 = vsel %vm3117_vm12, %v3053_v59, %v3181_v3  ;;  %v3055_v12 = vadd.f32 %v5819_v24, %v2984_v5  ;;  %v4567_v13 = vadd.f32 %v4462_v9, %v4262_v8  ;;  %v2699_v17 = vpop.f32.mrb[27].mxu0 }
 0x1a6   : > { %3310 = vst.msk [vmem:[%s5828_s8 + $0xb8] sm:$0xff] %vm3286_vm5, %v3245_v11  ;;  %v3244_v19 = vsel %vm3116_vm13, %v3052_v0, %v3180_v6  ;;  %v3054_v2 = vadd.f32 %v5819_v24, %v2983_v7  ;;  %v4568_v10 = vadd.f32 %v2699_v17, %v1340_v15 }
 0x1a7   : > { %3309 = vst.msk [vmem:[%s5828_s8 + $0xb0] sm:$0xff] %vm3286_vm5, %v3244_v19  ;;  %vm3119_vm14 = vcmp.gt.f32.partialorder %v3055_v12, 0.0  ;;  %v3183_v14 = vmul.f32 0.2, %v3055_v12  ;;  %v2986_v16 = vmul.f32 %v4567_v13, %v5814_v20  ;;  %v4265_v21 = vpop.f32.mrb[28].mxu1 }
 0x1a8   : > { %vm3118_vm15 = vcmp.gt.f32.partialorder %v3054_v2, 0.0  ;;  %v3182_v4 = vmul.f32 0.2, %v3054_v2  ;;  %v2985_v18 = vmul.f32 %v4568_v10, %v5814_v20  ;;  %v4465_v22 = vpop.f32.mrb[28].mxu0  ;;  %v1350_v27 = vpop.f32.mrb[29].mxu1 }
 0x1a9   : > { %v3247_v23 = vsel %vm3119_vm14, %v3055_v12, %v3183_v14  ;;  %v3057_v25 = vadd.f32 %v5819_v24, %v2986_v16  ;;  %v4569_v26 = vadd.f32 %v4465_v22, %v4265_v21  ;;  %v2709_v28 = vpop.f32.mrb[29].mxu0 }
 0x1aa   : > { %3312 = vst.msk [vmem:[%s5828_s8 + $0xc8] sm:$0xff] %vm3286_vm5, %v3247_v23  ;;  %v3246_v29 = vsel %vm3118_vm15, %v3054_v2, %v3182_v4  ;;  %v3056_v30 = vadd.f32 %v5819_v24, %v2985_v18  ;;  %v4570_v31 = vadd.f32 %v2709_v28, %v1350_v27 }
 0x1ab   : > { %3311 = vst.msk [vmem:[%s5828_s8 + $0xc0] sm:$0xff] %vm3286_vm5, %v3246_v29  ;;  %vm3121_vm0 = vcmp.gt.f32.partialorder %v3057_v25, 0.0  ;;  %v3185_v32 = vmul.f32 0.2, %v3057_v25  ;;  %v2988_v33 = vmul.f32 %v4569_v26, %v5814_v20  ;;  %v4268_v36 = vpop.f32.mrb[30].mxu1 }
 0x1ac   : > { %vm3120_vm1 = vcmp.gt.f32.partialorder %v3056_v30, 0.0  ;;  %v3184_v34 = vmul.f32 0.2, %v3056_v30  ;;  %v2987_v35 = vmul.f32 %v4570_v31, %v5814_v20  ;;  %v4468_v37 = vpop.f32.mrb[30].mxu0  ;;  %v1360_v41 = vpop.f32.mrb[31].mxu1 }
 0x1ad   : > { %v3249_v38 = vsel %vm3121_vm0, %v3057_v25, %v3185_v32  ;;  %v3059_v39 = vadd.f32 %v5819_v24, %v2988_v33  ;;  %v4571_v40 = vadd.f32 %v4468_v37, %v4268_v36  ;;  %v2719_v42 = vpop.f32.mrb[31].mxu0 }
 0x1ae   : > { %3314 = vst.msk [vmem:[%s5828_s8 + $0xd8] sm:$0xff] %vm3286_vm5, %v3249_v38  ;;  %v3248_v43 = vsel %vm3120_vm1, %v3056_v30, %v3184_v34  ;;  %v3058_v44 = vadd.f32 %v5819_v24, %v2987_v35  ;;  %v4572_v45 = vadd.f32 %v2719_v42, %v1360_v41 }
 0x1af   : > { %3313 = vst.msk [vmem:[%s5828_s8 + $0xd0] sm:$0xff] %vm3286_vm5, %v3248_v43  ;;  %vm3123_vm2 = vcmp.gt.f32.partialorder %v3059_v39, 0.0  ;;  %v3187_v46 = vmul.f32 0.2, %v3059_v39  ;;  %v2990_v47 = vmul.f32 %v4571_v40, %v5814_v20  ;;  %v4271_v50 = vpop.f32.mrb[32].mxu1 }
 0x1b0   : > { %vm3122_vm3 = vcmp.gt.f32.partialorder %v3058_v44, 0.0  ;;  %v3186_v48 = vmul.f32 0.2, %v3058_v44  ;;  %v2989_v49 = vmul.f32 %v4572_v45, %v5814_v20  ;;  %v4471_v51 = vpop.f32.mrb[32].mxu0  ;;  %v1370_v55 = vpop.f32.mrb[33].mxu1 }
 0x1b1   : > { %v3251_v52 = vsel %vm3123_vm2, %v3059_v39, %v3187_v46  ;;  %v3061_v53 = vadd.f32 %v5819_v24, %v2990_v47  ;;  %v4573_v54 = vadd.f32 %v4471_v51, %v4271_v50  ;;  %v2729_v56 = vpop.f32.mrb[33].mxu0 }
 0x1b2   : > { %3316 = vst.msk [vmem:[%s5828_s8 + $0xe8] sm:$0xff] %vm3286_vm5, %v3251_v52  ;;  %v3250_v57 = vsel %vm3122_vm3, %v3058_v44, %v3186_v48  ;;  %v3060_v58 = vadd.f32 %v5819_v24, %v2989_v49  ;;  %v4574_v59 = vadd.f32 %v2729_v56, %v1370_v55 }
 0x1b3   : > { %3315 = vst.msk [vmem:[%s5828_s8 + $0xe0] sm:$0xff] %vm3286_vm5, %v3250_v57  ;;  %vm3125_vm4 = vcmp.gt.f32.partialorder %v3061_v53, 0.0  ;;  %v3189_v60 = vmul.f32 0.2, %v3061_v53  ;;  %v2992_v61 = vmul.f32 %v4573_v54, %v5814_v20  ;;  %v4274_v0 = vpop.f32.mrb[34].mxu1 }
 0x1b4   : > { %vm3124_vm6 = vcmp.gt.f32.partialorder %v3060_v58, 0.0  ;;  %v3188_v62 = vmul.f32 0.2, %v3060_v58  ;;  %v2991_v63 = vmul.f32 %v4574_v59, %v5814_v20  ;;  %v4474_v1 = vpop.f32.mrb[34].mxu0  ;;  %v1380_v7 = vpop.f32.mrb[35].mxu1 }
 0x1b5   : > { %v3253_v3 = vsel %vm3125_vm4, %v3061_v53, %v3189_v60  ;;  %v3063_v5 = vadd.f32 %v5819_v24, %v2992_v61  ;;  %v4575_v6 = vadd.f32 %v4474_v1, %v4274_v0  ;;  %v2739_v8 = vpop.f32.mrb[35].mxu0 }
 0x1b6   : > { %3318 = vst.msk [vmem:[%s5828_s8 + $0xf8] sm:$0xff] %vm3286_vm5, %v3253_v3  ;;  %v3252_v9 = vsel %vm3124_vm6, %v3060_v58, %v3188_v62  ;;  %v3062_v11 = vadd.f32 %v5819_v24, %v2991_v63  ;;  %v4576_v12 = vadd.f32 %v2739_v8, %v1380_v7 }
 0x1b7   : > { %3317 = vst.msk [vmem:[%s5828_s8 + $0xf0] sm:$0xff] %vm3286_vm5, %v3252_v9  ;;  %vm3127_vm7 = vcmp.gt.f32.partialorder %v3063_v5, 0.0  ;;  %v3191_v13 = vmul.f32 0.2, %v3063_v5  ;;  %v2994_v15 = vmul.f32 %v4575_v6, %v5814_v20  ;;  %v4277_v2 = vpop.f32.mrb[36].mxu1 }
 0x1b8   : > { %vm3126_vm8 = vcmp.gt.f32.partialorder %v3062_v11, 0.0  ;;  %v3190_v17 = vmul.f32 0.2, %v3062_v11  ;;  %v2993_v19 = vmul.f32 %v4576_v12, %v5814_v20  ;;  %v4477_v10 = vpop.f32.mrb[36].mxu0  ;;  %v1390_v18 = vpop.f32.mrb[37].mxu1 }
 0x1b9   : > { %v3255_v14 = vsel %vm3127_vm7, %v3063_v5, %v3191_v13  ;;  %v3065_v16 = vadd.f32 %v5819_v24, %v2994_v15  ;;  %v4577_v4 = vadd.f32 %v4477_v10, %v4277_v2  ;;  %v2749_v21 = vpop.f32.mrb[37].mxu0 }
 0x1ba   : > { %3320 = vst.msk [vmem:[%s5828_s8 + $0x108] sm:$0xff] %vm3286_vm5, %v3255_v14  ;;  %v3254_v22 = vsel %vm3126_vm8, %v3062_v11, %v3190_v17  ;;  %v3064_v23 = vadd.f32 %v5819_v24, %v2993_v19  ;;  %v4578_v25 = vadd.f32 %v2749_v21, %v1390_v18 }
 0x1bb   : > { %3319 = vst.msk [vmem:[%s5828_s8 + $0x100] sm:$0xff] %vm3286_vm5, %v3254_v22  ;;  %vm3129_vm9 = vcmp.gt.f32.partialorder %v3065_v16, 0.0  ;;  %v3193_v26 = vmul.f32 0.2, %v3065_v16  ;;  %v2996_v27 = vmul.f32 %v4577_v4, %v5814_v20  ;;  %v4280_v30 = vpop.f32.mrb[38].mxu1 }
 0x1bc   : > { %vm3128_vm10 = vcmp.gt.f32.partialorder %v3064_v23, 0.0  ;;  %v3192_v28 = vmul.f32 0.2, %v3064_v23  ;;  %v2995_v29 = vmul.f32 %v4578_v25, %v5814_v20  ;;  %v4480_v31 = vpop.f32.mrb[38].mxu0  ;;  %v1400_v35 = vpop.f32.mrb[39].mxu1 }
 0x1bd   : > { %v3257_v32 = vsel %vm3129_vm9, %v3065_v16, %v3193_v26  ;;  %v3067_v33 = vadd.f32 %v5819_v24, %v2996_v27  ;;  %v4579_v34 = vadd.f32 %v4480_v31, %v4280_v30  ;;  %v2759_v36 = vpop.f32.mrb[39].mxu0 }
 0x1be   : > { %3322 = vst.msk [vmem:[%s5828_s8 + $0x118] sm:$0xff] %vm3286_vm5, %v3257_v32  ;;  %v3256_v37 = vsel %vm3128_vm10, %v3064_v23, %v3192_v28  ;;  %v3066_v38 = vadd.f32 %v5819_v24, %v2995_v29  ;;  %v4580_v39 = vadd.f32 %v2759_v36, %v1400_v35 }
 0x1bf   : > { %3321 = vst.msk [vmem:[%s5828_s8 + $0x110] sm:$0xff] %vm3286_vm5, %v3256_v37  ;;  %vm3131_vm11 = vcmp.gt.f32.partialorder %v3067_v33, 0.0  ;;  %v3195_v40 = vmul.f32 0.2, %v3067_v33  ;;  %v2998_v41 = vmul.f32 %v4579_v34, %v5814_v20  ;;  %v4283_v44 = vpop.f32.mrb[40].mxu1 }
 0x1c0   : > { %vm3130_vm12 = vcmp.gt.f32.partialorder %v3066_v38, 0.0  ;;  %v3194_v42 = vmul.f32 0.2, %v3066_v38  ;;  %v2997_v43 = vmul.f32 %v4580_v39, %v5814_v20  ;;  %v4483_v45 = vpop.f32.mrb[40].mxu0  ;;  %v1410_v49 = vpop.f32.mrb[41].mxu1 }
 0x1c1   : > { %v3259_v46 = vsel %vm3131_vm11, %v3067_v33, %v3195_v40  ;;  %v3069_v47 = vadd.f32 %v5819_v24, %v2998_v41  ;;  %v4581_v48 = vadd.f32 %v4483_v45, %v4283_v44  ;;  %v2769_v50 = vpop.f32.mrb[41].mxu0 }
 0x1c2   : > { %3324 = vst.msk [vmem:[%s5828_s8 + $0x128] sm:$0xff] %vm3286_vm5, %v3259_v46  ;;  %v3258_v51 = vsel %vm3130_vm12, %v3066_v38, %v3194_v42  ;;  %v3068_v52 = vadd.f32 %v5819_v24, %v2997_v43  ;;  %v4582_v53 = vadd.f32 %v2769_v50, %v1410_v49 }
 0x1c3   : > { %3323 = vst.msk [vmem:[%s5828_s8 + $0x120] sm:$0xff] %vm3286_vm5, %v3258_v51  ;;  %vm3133_vm13 = vcmp.gt.f32.partialorder %v3069_v47, 0.0  ;;  %v3197_v54 = vmul.f32 0.2, %v3069_v47  ;;  %v3000_v55 = vmul.f32 %v4581_v48, %v5814_v20  ;;  %v4286_v58 = vpop.f32.mrb[42].mxu1 }
 0x1c4   : > { %vm3132_vm14 = vcmp.gt.f32.partialorder %v3068_v52, 0.0  ;;  %v3196_v56 = vmul.f32 0.2, %v3068_v52  ;;  %v2999_v57 = vmul.f32 %v4582_v53, %v5814_v20  ;;  %v4486_v59 = vpop.f32.mrb[42].mxu0  ;;  %v1420_v63 = vpop.f32.mrb[43].mxu1 }
 0x1c5   : > { %v3261_v60 = vsel %vm3133_vm13, %v3069_v47, %v3197_v54  ;;  %v3071_v61 = vadd.f32 %v5819_v24, %v3000_v55  ;;  %v4583_v62 = vadd.f32 %v4486_v59, %v4286_v58  ;;  %v2779_v0 = vpop.f32.mrb[43].mxu0 }
 0x1c6   : > { %3326 = vst.msk [vmem:[%s5828_s8 + $0x138] sm:$0xff] %vm3286_vm5, %v3261_v60  ;;  %v3260_v1 = vsel %vm3132_vm14, %v3068_v52, %v3196_v56  ;;  %v3070_v3 = vadd.f32 %v5819_v24, %v2999_v57  ;;  %v4584_v5 = vadd.f32 %v2779_v0, %v1420_v63 }
 0x1c7   : > { %3325 = vst.msk [vmem:[%s5828_s8 + $0x130] sm:$0xff] %vm3286_vm5, %v3260_v1  ;;  %vm3135_vm15 = vcmp.gt.f32.partialorder %v3071_v61, 0.0  ;;  %v3199_v6 = vmul.f32 0.2, %v3071_v61  ;;  %v3002_v7 = vmul.f32 %v4583_v62, %v5814_v20  ;;  %v4289_v11 = vpop.f32.mrb[44].mxu1 }
 0x1c8   : > { %vm3134_vm0 = vcmp.gt.f32.partialorder %v3070_v3, 0.0  ;;  %v3198_v8 = vmul.f32 0.2, %v3070_v3  ;;  %v3001_v9 = vmul.f32 %v4584_v5, %v5814_v20  ;;  %v4489_v12 = vpop.f32.mrb[44].mxu0  ;;  %v1430_v19 = vpop.f32.mrb[45].mxu1 }
 0x1c9   : > { %v3263_v13 = vsel %vm3135_vm15, %v3071_v61, %v3199_v6  ;;  %v3073_v15 = vadd.f32 %v5819_v24, %v3002_v7  ;;  %v4585_v17 = vadd.f32 %v4489_v12, %v4289_v11  ;;  %v2789_v2 = vpop.f32.mrb[45].mxu0 }
 0x1ca   : > { %3328 = vst.msk [vmem:[%s5828_s8 + $0x148] sm:$0xff] %vm3286_vm5, %v3263_v13  ;;  %v3262_v10 = vsel %vm3134_vm0, %v3070_v3, %v3198_v8  ;;  %v3072_v14 = vadd.f32 %v5819_v24, %v3001_v9  ;;  %v4586_v16 = vadd.f32 %v2789_v2, %v1430_v19 }
 0x1cb   : > { %3327 = vst.msk [vmem:[%s5828_s8 + $0x140] sm:$0xff] %vm3286_vm5, %v3262_v10  ;;  %vm3137_vm1 = vcmp.gt.f32.partialorder %v3073_v15, 0.0  ;;  %v3201_v4 = vmul.f32 0.2, %v3073_v15  ;;  %v3004_v18 = vmul.f32 %v4585_v17, %v5814_v20  ;;  %v4292_v23 = vpop.f32.mrb[46].mxu1 }
 0x1cc   : > { %vm3136_vm2 = vcmp.gt.f32.partialorder %v3072_v14, 0.0  ;;  %v3200_v21 = vmul.f32 0.2, %v3072_v14  ;;  %v3003_v22 = vmul.f32 %v4586_v16, %v5814_v20  ;;  %v4492_v25 = vpop.f32.mrb[46].mxu0  ;;  %v1440_v29 = vpop.f32.mrb[47].mxu1 }
 0x1cd   : > { %v3265_v26 = vsel %vm3137_vm1, %v3073_v15, %v3201_v4  ;;  %v3075_v27 = vadd.f32 %v5819_v24, %v3004_v18  ;;  %v4587_v28 = vadd.f32 %v4492_v25, %v4292_v23  ;;  %v2799_v30 = vpop.f32.mrb[47].mxu0 }
 0x1ce   : > { %3330 = vst.msk [vmem:[%s5828_s8 + $0x158] sm:$0xff] %vm3286_vm5, %v3265_v26  ;;  %v3264_v31 = vsel %vm3136_vm2, %v3072_v14, %v3200_v21  ;;  %v3074_v32 = vadd.f32 %v5819_v24, %v3003_v22  ;;  %v4588_v33 = vadd.f32 %v2799_v30, %v1440_v29 }
 0x1cf   : > { %3329 = vst.msk [vmem:[%s5828_s8 + $0x150] sm:$0xff] %vm3286_vm5, %v3264_v31  ;;  %vm3139_vm3 = vcmp.gt.f32.partialorder %v3075_v27, 0.0  ;;  %v3203_v34 = vmul.f32 0.2, %v3075_v27  ;;  %v3006_v35 = vmul.f32 %v4587_v28, %v5814_v20  ;;  %v4295_v38 = vpop.f32.mrb[48].mxu1 }
 0x1d0   : > { %vm3138_vm4 = vcmp.gt.f32.partialorder %v3074_v32, 0.0  ;;  %v3202_v36 = vmul.f32 0.2, %v3074_v32  ;;  %v3005_v37 = vmul.f32 %v4588_v33, %v5814_v20  ;;  %v4495_v39 = vpop.f32.mrb[48].mxu0  ;;  %v1450_v43 = vpop.f32.mrb[49].mxu1 }
 0x1d1   : > { %v3267_v40 = vsel %vm3139_vm3, %v3075_v27, %v3203_v34  ;;  %v3077_v41 = vadd.f32 %v5819_v24, %v3006_v35  ;;  %v4589_v42 = vadd.f32 %v4495_v39, %v4295_v38  ;;  %v2809_v44 = vpop.f32.mrb[49].mxu0 }
 0x1d2   : > { %3332 = vst.msk [vmem:[%s5828_s8 + $0x168] sm:$0xff] %vm3286_vm5, %v3267_v40  ;;  %v3266_v45 = vsel %vm3138_vm4, %v3074_v32, %v3202_v36  ;;  %v3076_v46 = vadd.f32 %v5819_v24, %v3005_v37  ;;  %v4590_v47 = vadd.f32 %v2809_v44, %v1450_v43 }
 0x1d3   : > { %3331 = vst.msk [vmem:[%s5828_s8 + $0x160] sm:$0xff] %vm3286_vm5, %v3266_v45  ;;  %vm3141_vm6 = vcmp.gt.f32.partialorder %v3077_v41, 0.0  ;;  %v3205_v48 = vmul.f32 0.2, %v3077_v41  ;;  %v3008_v49 = vmul.f32 %v4589_v42, %v5814_v20  ;;  %v4298_v52 = vpop.f32.mrb[50].mxu1 }
 0x1d4   : > { %vm3140_vm7 = vcmp.gt.f32.partialorder %v3076_v46, 0.0  ;;  %v3204_v50 = vmul.f32 0.2, %v3076_v46  ;;  %v3007_v51 = vmul.f32 %v4590_v47, %v5814_v20  ;;  %v4498_v53 = vpop.f32.mrb[50].mxu0  ;;  %v1460_v57 = vpop.f32.mrb[51].mxu1 }
 0x1d5   : > { %v3269_v54 = vsel %vm3141_vm6, %v3077_v41, %v3205_v48  ;;  %v3079_v55 = vadd.f32 %v5819_v24, %v3008_v49  ;;  %v4591_v56 = vadd.f32 %v4498_v53, %v4298_v52  ;;  %v2819_v58 = vpop.f32.mrb[51].mxu0 }
 0x1d6   : > { %3334 = vst.msk [vmem:[%s5828_s8 + $0x178] sm:$0xff] %vm3286_vm5, %v3269_v54  ;;  %v3268_v59 = vsel %vm3140_vm7, %v3076_v46, %v3204_v50  ;;  %v3078_v60 = vadd.f32 %v5819_v24, %v3007_v51  ;;  %v4592_v61 = vadd.f32 %v2819_v58, %v1460_v57  ;;  %v4776_v54 = vld [vmem:[%s6093_s3] ss:$0 sm:$0xff] }
 0x1d7   : > { %3333 = vst.msk [vmem:[%s5828_s8 + $0x170] sm:$0xff] %vm3286_vm5, %v3268_v59  ;;  %vm3143_vm8 = vcmp.gt.f32.partialorder %v3079_v55, 0.0  ;;  %v3207_v62 = vmul.f32 0.2, %v3079_v55  ;;  %v3010_v63 = vmul.f32 %v4591_v56, %v5814_v20  ;;  %v4301_v3 = vpop.f32.mrb[52].mxu1 }
 0x1d8   : > { %vm3142_vm9 = vcmp.gt.f32.partialorder %v3078_v60, 0.0  ;;  %v3206_v0 = vmul.f32 0.2, %v3078_v60  ;;  %v3009_v1 = vmul.f32 %v4592_v61, %v5814_v20  ;;  %v4501_v5 = vpop.f32.mrb[52].mxu0  ;;  %v1470_v9 = vpop.f32.mrb[53].mxu1 }
 0x1d9   : > { %v3271_v6 = vsel %vm3143_vm8, %v3079_v55, %v3207_v62  ;;  %v3081_v7 = vadd.f32 %v5819_v24, %v3010_v63  ;;  %v4593_v8 = vadd.f32 %v4501_v5, %v4301_v3  ;;  %v2829_v11 = vpop.f32.mrb[53].mxu0 }
 0x1da   : > { %3336 = vst.msk [vmem:[%s5828_s8 + $0x188] sm:$0xff] %vm3286_vm5, %v3271_v6  ;;  %v3270_v12 = vsel %vm3142_vm9, %v3078_v60, %v3206_v0  ;;  %v3080_v13 = vadd.f32 %v5819_v24, %v3009_v1  ;;  %v4594_v15 = vadd.f32 %v2829_v11, %v1470_v9 }
 0x1db   : > { %3335 = vst.msk [vmem:[%s5828_s8 + $0x180] sm:$0xff] %vm3286_vm5, %v3270_v12  ;;  %vm3145_vm10 = vcmp.gt.f32.partialorder %v3081_v7, 0.0  ;;  %v3209_v17 = vmul.f32 0.2, %v3081_v7  ;;  %v3012_v19 = vmul.f32 %v4593_v8, %v5814_v20  ;;  %v4304_v14 = vpop.f32.mrb[54].mxu1 }
 0x1dc   : > { %vm3144_vm11 = vcmp.gt.f32.partialorder %v3080_v13, 0.0  ;;  %v3208_v2 = vmul.f32 0.2, %v3080_v13  ;;  %v3011_v10 = vmul.f32 %v4594_v15, %v5814_v20  ;;  %v4504_v16 = vpop.f32.mrb[54].mxu0  ;;  %v1480_v22 = vpop.f32.mrb[55].mxu1 }
 0x1dd   : > { %v3273_v4 = vsel %vm3145_vm10, %v3081_v7, %v3209_v17  ;;  %v3083_v18 = vadd.f32 %v5819_v24, %v3012_v19  ;;  %v4595_v21 = vadd.f32 %v4504_v16, %v4304_v14  ;;  %v2839_v23 = vpop.f32.mrb[55].mxu0 }
 0x1de   : > { %3338 = vst.msk [vmem:[%s5828_s8 + $0x198] sm:$0xff] %vm3286_vm5, %v3273_v4  ;;  %v3272_v25 = vsel %vm3144_vm11, %v3080_v13, %v3208_v2  ;;  %v3082_v26 = vadd.f32 %v5819_v24, %v3011_v10  ;;  %v4596_v27 = vadd.f32 %v2839_v23, %v1480_v22 }
 0x1df   : > { %3337 = vst.msk [vmem:[%s5828_s8 + $0x190] sm:$0xff] %vm3286_vm5, %v3272_v25  ;;  %vm3147_vm12 = vcmp.gt.f32.partialorder %v3083_v18, 0.0  ;;  %v3211_v28 = vmul.f32 0.2, %v3083_v18  ;;  %v3014_v29 = vmul.f32 %v4595_v21, %v5814_v20  ;;  %v4307_v32 = vpop.f32.mrb[56].mxu1 }
 0x1e0   : > { %vm3146_vm13 = vcmp.gt.f32.partialorder %v3082_v26, 0.0  ;;  %v3210_v30 = vmul.f32 0.2, %v3082_v26  ;;  %v3013_v31 = vmul.f32 %v4596_v27, %v5814_v20  ;;  %v4507_v33 = vpop.f32.mrb[56].mxu0  ;;  %v1490_v37 = vpop.f32.mrb[57].mxu1 }
 0x1e1   : > { %v3275_v34 = vsel %vm3147_vm12, %v3083_v18, %v3211_v28  ;;  %v3085_v35 = vadd.f32 %v5819_v24, %v3014_v29  ;;  %v4597_v36 = vadd.f32 %v4507_v33, %v4307_v32  ;;  %v2849_v38 = vpop.f32.mrb[57].mxu0 }
 0x1e2   : > { %3340 = vst.msk [vmem:[%s5828_s8 + $0x1a8] sm:$0xff] %vm3286_vm5, %v3275_v34  ;;  %v3274_v39 = vsel %vm3146_vm13, %v3082_v26, %v3210_v30  ;;  %v3084_v40 = vadd.f32 %v5819_v24, %v3013_v31  ;;  %v4598_v41 = vadd.f32 %v2849_v38, %v1490_v37 }
 0x1e3   : > { %3339 = vst.msk [vmem:[%s5828_s8 + $0x1a0] sm:$0xff] %vm3286_vm5, %v3274_v39  ;;  %vm3149_vm14 = vcmp.gt.f32.partialorder %v3085_v35, 0.0  ;;  %v3213_v42 = vmul.f32 0.2, %v3085_v35  ;;  %v3016_v43 = vmul.f32 %v4597_v36, %v5814_v20  ;;  %v4310_v46 = vpop.f32.mrb[58].mxu1 }
 0x1e4   : > { %vm3148_vm15 = vcmp.gt.f32.partialorder %v3084_v40, 0.0  ;;  %v3212_v44 = vmul.f32 0.2, %v3084_v40  ;;  %v3015_v45 = vmul.f32 %v4598_v41, %v5814_v20  ;;  %v4510_v47 = vpop.f32.mrb[58].mxu0  ;;  %v1500_v51 = vpop.f32.mrb[59].mxu1 }
 0x1e5   : > { %v3277_v48 = vsel %vm3149_vm14, %v3085_v35, %v3213_v42  ;;  %v3087_v49 = vadd.f32 %v5819_v24, %v3016_v43  ;;  %v4599_v50 = vadd.f32 %v4510_v47, %v4310_v46  ;;  %v2859_v52 = vpop.f32.mrb[59].mxu0  ;;  %v4777_v24 = vld [vmem:[%s6092_s2] ss:$0 sm:$0xff] }
 0x1e6   : > { %3342 = vst.msk [vmem:[%s5828_s8 + $0x1b8] sm:$0xff] %vm3286_vm5, %v3277_v48  ;;  %v3276_v53 = vsel %vm3148_vm15, %v3084_v40, %v3212_v44  ;;  %v3086_v55 = vadd.f32 %v4776_v54, %v3015_v45  ;;  %v4600_v56 = vadd.f32 %v2859_v52, %v1500_v51 }
 0x1e7   : > { %3341 = vst.msk [vmem:[%s5828_s8 + $0x1b0] sm:$0xff] %vm3286_vm5, %v3276_v53  ;;  %vm3151_vm0 = vcmp.gt.f32.partialorder %v3087_v49, 0.0  ;;  %v3215_v20 = vmul.f32 0.2, %v3087_v49  ;;  %v3018_v57 = vmul.f32 %v4777_v24, %v4599_v50  ;;  %v4313_v60 = vpop.f32.mrb[60].mxu1 }
 0x1e8   : > { %vm3150_vm1 = vcmp.gt.f32.partialorder %v3086_v55, 0.0  ;;  %v3214_v58 = vmul.f32 0.2, %v3086_v55  ;;  %v3017_v59 = vmul.f32 %v4777_v24, %v4600_v56  ;;  %v4513_v61 = vpop.f32.mrb[60].mxu0  ;;  %v1510_v1 = vpop.f32.mrb[61].mxu1 }
 0x1e9   : > { %v3279_v62 = vsel %vm3151_vm0, %v3087_v49, %v3215_v20  ;;  %v3089_v63 = vadd.f32 %v4776_v54, %v3018_v57  ;;  %v4601_v0 = vadd.f32 %v4513_v61, %v4313_v60  ;;  %v2869_v3 = vpop.f32.mrb[61].mxu0 }
 0x1ea   : > { %3344 = vst.msk [vmem:[%s5828_s8 + $0x1c8] sm:$0xff] %vm3286_vm5, %v3279_v62  ;;  %v3278_v5 = vsel %vm3150_vm1, %v3086_v55, %v3214_v58  ;;  %v3088_v6 = vadd.f32 %v4776_v54, %v3017_v59  ;;  %v4602_v7 = vadd.f32 %v2869_v3, %v1510_v1 }
 0x1eb   : > { %3343 = vst.msk [vmem:[%s5828_s8 + $0x1c0] sm:$0xff] %vm3286_vm5, %v3278_v5  ;;  %vm3153_vm2 = vcmp.gt.f32.partialorder %v3089_v63, 0.0  ;;  %v3217_v8 = vmul.f32 0.2, %v3089_v63  ;;  %v3020_v9 = vmul.f32 %v4777_v24, %v4601_v0  ;;  %v4316_v13 = vpop.f32.mrb[62].mxu1 }
 0x1ec   : > { %vm3152_vm3 = vcmp.gt.f32.partialorder %v3088_v6, 0.0  ;;  %v3216_v11 = vmul.f32 0.2, %v3088_v6  ;;  %v3019_v12 = vmul.f32 %v4777_v24, %v4602_v7  ;;  %v4516_v15 = vpop.f32.mrb[62].mxu0  ;;  %v1520_v10 = vpop.f32.mrb[63].mxu1 }
 0x1ed   : > { %v3281_v17 = vsel %vm3153_vm2, %v3089_v63, %v3217_v8  ;;  %v3091_v19 = vadd.f32 %v4776_v54, %v3020_v9  ;;  %v4603_v2 = vadd.f32 %v4516_v15, %v4316_v13  ;;  %v2879_v14 = vpop.f32.mrb[63].mxu0 }
 0x1ee   : > { %3346 = vst.msk [vmem:[%s5828_s8 + $0x1d8] sm:$0xff] %vm3286_vm5, %v3281_v17  ;;  %v3280_v16 = vsel %vm3152_vm3, %v3088_v6, %v3216_v11  ;;  %v3090_v4 = vadd.f32 %v4776_v54, %v3019_v12  ;;  %v4604_v18 = vadd.f32 %v2879_v14, %v1520_v10 }
 0x1ef   : > { %3345 = vst.msk [vmem:[%s5828_s8 + $0x1d0] sm:$0xff] %vm3286_vm5, %v3280_v16  ;;  %vm3155_vm4 = vcmp.gt.f32.partialorder %v3091_v19, 0.0  ;;  %v3219_v21 = vmul.f32 0.2, %v3091_v19  ;;  %v3022_v22 = vmul.f32 %v4777_v24, %v4603_v2 }
 0x1f0   : > { %vm3154_vm6 = vcmp.gt.f32.partialorder %v3090_v4, 0.0  ;;  %v3218_v23 = vmul.f32 0.2, %v3090_v4  ;;  %v3021_v25 = vmul.f32 %v4777_v24, %v4604_v18 }
 0x1f1   : > { %v3283_v26 = vsel %vm3155_vm4, %v3091_v19, %v3219_v21  ;;  %v3093_v27 = vadd.f32 %v4776_v54, %v3022_v22 }
 0x1f2   : > { %3348 = vst.msk [vmem:[%s5828_s8 + $0x1e8] sm:$0xff] %vm3286_vm5, %v3283_v26  ;;  %v3282_v28 = vsel %vm3154_vm6, %v3090_v4, %v3218_v23  ;;  %v3092_v29 = vadd.f32 %v4776_v54, %v3021_v25 }
 0x1f3   : > { %3347 = vst.msk [vmem:[%s5828_s8 + $0x1e0] sm:$0xff] %vm3286_vm5, %v3282_v28  ;;  %vm3157_vm7 = vcmp.gt.f32.partialorder %v3093_v27, 0.0  ;;  %v3221_v30 = vmul.f32 0.2, %v3093_v27 }
 0x1f4   : > { %vm3156_vm8 = vcmp.gt.f32.partialorder %v3092_v29, 0.0  ;;  %v3220_v31 = vmul.f32 0.2, %v3092_v29 }
 0x1f5   : > { %v3285_v32 = vsel %vm3157_vm7, %v3093_v27, %v3221_v30 }
 0x1f6   : > { %3350 = vst.msk [vmem:[%s5828_s8 + $0x1f8] sm:$0xff] %vm3286_vm5, %v3285_v32  ;;  %v3284_v33 = vsel %vm3156_vm8, %v3092_v29, %v3220_v31 }
 0x1f7   : > { %3349 = vst.msk [vmem:[%s5828_s8 + $0x1f0] sm:$0xff] %vm3286_vm5, %v3284_v33 }
 0x1f8 PF: > { %s14_s19 = sadd.s32 1, %s4816_s19   ;;  %s6280_s15 = smov %s4808_s17 }
 0x1f9   : > { %p11_p7 = scmp.ge.s32.totalorder %s14_s19, 6   ;;  %s6281_s16 = smov %s4812_s18 }
 0x1fa   : > { %s6282_s17 = smov %s6285_s20  ;;  %s6283_s18 = smov %s6289_s21 }
 0x1fb   :  { %13 = sbr.rel (!%p11_p7) target bundleno = 3 (0x3), region = 70 }

// kernel: _lambda_.4
= control target key start
LH: loop header
LB: loop body
LE: loop exit
PB: predicated region body
PF: predicated region fallthrough
CT: control target
= control target key end

     0   :  { %s2817_s15 = smov 0   ;;  %s2819_s16 = smov 0   ;;  %s3480_s0 = inlined_call_operand.vmem [shape: f32[2,1,17,17,32], index: 0, kind: input, shape index: {}]   ;;  %s3481_s1 = inlined_call_operand.vmem [shape: f32[4,32,16], index: 1, kind: input, shape index: {}]   ;;  %s3482_s2 = inlined_call_operand.vmem [shape: f32[1,16], index: 2, kind: input, shape index: {}]   ;;  %s3483_s3 = inlined_call_operand.vmem [shape: f32[1,16], index: 3, kind: input, shape index: {}]   ;;  %s3484_s4 = inlined_call_operand.vmem [shape: f32[2,1,256,16], index: 4, kind: output, shape index: {}]  }
   0x1   :  { %s2821_s17 = smov 0  }
   0x2 LB: > { %s26_s18 = sadd.s32 1, %s2786_s16  ;;  %p2034_p0 = scmp.ge.s32.totalorder %s2790_s17, 1  ;;  %s2790_s17 = sphi %s2821_s17, %s14_s17   ;;  %s2786_s16 = sphi %s2819_s16, %s3486_s16   ;;  %s2782_s15 = sphi %s2817_s15, %s3485_s15  }
   0x3   : > { %p28_p1 = scmp.ge.s32.totalorder %s26_s18, 2  ;;  %p182_p2 = scmp.lt.s32.totalorder %s2790_s17, 3 }
   0x5   : > { %s3488_s18 = smov (%p28_p1, %s26_s18), 0  ;;  %p183_p3 = pnand %p2034_p0, %p182_p2 }
   0x6   : > { %v2038_v0 = vld [vmem:[%s3481_s1 + $0x20] sm:$0xff] (!%p183_p3)  ;;  %v2039_v1 = vld [vmem:[%s3481_s1 + $0x28] sm:$0xff] (!%p183_p3)  ;;  %p216_p4 = scmp.lt.s32.totalorder (!%p183_p3), %s2782_s15, 1  ;;  %v2040_v5 = vld [vmem:[%s3481_s1 + $0x30] sm:$0xff] (!%p183_p3)  ;;  %vm307_vm0 = vcmask (!%p183_p3), 261120   ;;  %vm1905_vm2 = vcmask (!%p183_p3), 130048  }
   0x7   : > { %186 = sbr.rel (%p183_p3) target bundleno = 367 (0x16f), region = 36  ;;  %v2138_v2 = vld [vmem:[%s3481_s1 + $0x40] sm:$0xff] (!%p183_p3)  ;;  %v2615_v3 = vpack.c.bf16 (!%p183_p3), %v2039_v1, %v2038_v0  ;;  %v2139_v4 = vld [vmem:[%s3481_s1 + $0x48] sm:$0xff] (!%p183_p3)  ;;  %v2041_v6 = vld [vmem:[%s3481_s1 + $0x38] sm:$0xff] (!%p183_p3) }
   0x8   : > { %v2631_v7 = vpack.c.bf16 (!%p183_p3), %v2139_v4, %v2138_v2  ;;  %v2619_v8 = vpack.c.bf16 (!%p183_p3), %v2041_v6, %v2040_v5  ;;  %v2140_v9 = vld [vmem:[%s3481_s1 + $0x50] sm:$0xff] (!%p183_p3)  ;;  %v2141_v10 = vld [vmem:[%s3481_s1 + $0x58] sm:$0xff] (!%p183_p3)  ;;  %v266_v11 = vld [vmem:[%s3481_s1] sm:$0xff] (!%p183_p3) }
   0x9   : > { %2616 = vmatprep.subr.bf16.mxu1 (!%p183_p3), %v2615_v3  ;;  %v2635_v12 = vpack.c.bf16 (!%p183_p3), %v2141_v10, %v2140_v9  ;;  %v267_v13 = vld [vmem:[%s3481_s1 + $0x8] sm:$0xff] (!%p183_p3)  ;;  %v2206_v14 = vld [vmem:[%s3481_s1 + $0x60] sm:$0xff] (!%p183_p3)  ;;  %v268_v18 = vld [vmem:[%s3481_s1 + $0x10] sm:$0xff] (!%p183_p3) }
   0xa   : > { %v2207_v15 = vld [vmem:[%s3481_s1 + $0x68] sm:$0xff] (!%p183_p3)  ;;  %2632 = vmatprep.subr.bf16.mxu0 (!%p183_p3), %v2631_v7  ;;  %2618 = vmatpush3.bf16.msra.mxu1 (!%p183_p3), %v2615_v3  ;;  %v2623_v16 = vpack.c.bf16 (!%p183_p3), %v267_v13, %v266_v11  ;;  %v269_v21 = vld [vmem:[%s3481_s1 + $0x18] sm:$0xff] (!%p183_p3)  ;;  %v2208_v23 = vld [vmem:[%s3481_s1 + $0x70] sm:$0xff] (!%p183_p3) }
   0xb   : > { %2634 = vmatpush3.bf16.msra.mxu0 (!%p183_p3), %v2631_v7  ;;  %2620 = vmatprep.subr.bf16.mxu1 (!%p183_p3), %v2619_v8  ;;  %v2639_v17 = vpack.c.bf16 (!%p183_p3), %v2207_v15, %v2206_v14  ;;  %v2209_v24 = vld [vmem:[%s3481_s1 + $0x78] sm:$0xff] (!%p183_p3)  ;;  %v2627_v27 = vpack.c.bf16 (!%p183_p3), %v269_v21, %v268_v18 }
   0xc   : > { %2636 = vmatprep.subr.bf16.mxu0 (!%p183_p3), %v2635_v12  ;;  %v2643_v29 = vpack.c.bf16 (!%p183_p3), %v2209_v24, %v2208_v23 }
   0xe   : > { %s3490_s15 = smov (!%p216_p4, %s2782_s15), 1  ;;  %2622 = vmatpush3.bf16.msra.mxu1 %v2619_v8 }
   0xf   : > { %s2743_s21 = smul.u32 408, %s3490_s15  ;;  %2638 = vmatpush3.bf16.msra.mxu0 %v2635_v12  ;;  %2624 = vmatprep.subr.bf16.mxu1 %v2623_v16  ;;  %s2246_s11 = sshll.u32 %s3490_s15, 8 }
  0x10   : > { %2640 = vmatprep.subr.bf16.mxu0 %v2639_v17  ;;  %s3345_s14 = scalar_lea.vmem %s3484_s4, %s2246_s11 }
  0x11   : > { %s2877_s24 = scalar_lea.vmem %s3480_s0, %s2743_s21 }
  0x12   : > { %v270_v19 = vld [vmem:[%s2877_s24 + $0x1] sm:$0xff]  ;;  %v2884_v20 = vld [vmem:[%s2877_s24 + $0x18] sm:$0xff]  ;;  %v271_v22 = vld [vmem:[%s2877_s24 + $0x9] sm:$0xff] }
  0x13   : > { %2399 = vmatprep.mubr.msk.f32.mxu1 %vm307_vm0, %v270_v19  ;;  %2511 = vmatprep.mubr.msk.f32.mxu0 %vm307_vm0, %v2884_v20  ;;  %v2900_v25 = vld [vmem:[%s2877_s24 + $0x20] sm:$0xff]  ;;  %v2907_v28 = vld [vmem:[%s2877_s24 + $0x30] sm:$0xff]  ;;  %v2917_v31 = vld [vmem:[%s2877_s24 + $0x38] sm:$0xff] }
  0x14   : > { %v2903_v26 = vld [vmem:[%s2877_s24 + $0x19] sm:$0xff]  ;;  %2400 = vmatmul.mubr.msk.f32.vlgmr.msra.gmra.mrb[0].mxu1 %vm307_vm0, %v271_v22  ;;  %2512 = vmatmul.mubr.msk.f32.vlgmr.msra.gmra.mrb[0].mxu0 %vm307_vm0, %v2900_v25  ;;  %v2912_v30 = vld [vmem:[%s2877_s24 + $0x21] sm:$0xff]  ;;  %v2920_v32 = vld [vmem:[%s2877_s24 + $0x31] sm:$0xff] }
  0x15   : > { %2626 = vmatpush3.bf16.msra.mxu1 %v2623_v16  ;;  %2642 = vmatpush3.bf16.msra.mxu0 %v2639_v17  ;;  %v2925_v33 = vld [vmem:[%s2877_s24 + $0x48] sm:$0xff]  ;;  %v2934_v34 = vld [vmem:[%s2877_s24 + $0x39] sm:$0xff]  ;;  %v2939_v35 = vld [vmem:[%s2877_s24 + $0x50] sm:$0xff] }
  0x16   : > { %2402 = vmatprep.mubr.msk.f32.mxu1 %vm307_vm0, %v2903_v26  ;;  %2514 = vmatprep.mubr.msk.f32.mxu0 %vm307_vm0, %v2907_v28  ;;  %v2942_v36 = vld [vmem:[%s2877_s24 + $0x49] sm:$0xff]  ;;  %v2945_v37 = vld [vmem:[%s2877_s24 + $0x60] sm:$0xff]  ;;  %v2954_v38 = vld [vmem:[%s2877_s24 + $0x51] sm:$0xff] }
  0x17   : > { %2628 = vmatprep.subr.bf16.mxu1 %v2627_v27  ;;  %2644 = vmatprep.subr.bf16.mxu0 %v2643_v29  ;;  %v2959_v39 = vld [vmem:[%s2877_s24 + $0x68] sm:$0xff]  ;;  %v2965_v41 = vld [vmem:[%s2877_s24 + $0x78] sm:$0xff]  ;;  %v2979_v43 = vld [vmem:[%s2877_s24 + $0x80] sm:$0xff] }
  0x18   : > { %2403 = vmatmul.mubr.msk.f32.gmra.mrb[2].mxu1 %vm307_vm0, %v2912_v30  ;;  %2515 = vmatmul.mubr.msk.f32.gmra.mrb[2].mxu0 %vm307_vm0, %v2917_v31  ;;  %v2962_v40 = vld [vmem:[%s2877_s24 + $0x61] sm:$0xff]  ;;  %v2974_v42 = vld [vmem:[%s2877_s24 + $0x69] sm:$0xff]  ;;  %v2982_v44 = vld [vmem:[%s2877_s24 + $0x79] sm:$0xff] }
  0x19   : > { %2405 = vmatprep.mubr.msk.f32.mxu1 %vm307_vm0, %v2920_v32  ;;  %2517 = vmatprep.mubr.msk.f32.mxu0 %vm307_vm0, %v2925_v33  ;;  %v2985_v45 = vld [vmem:[%s2877_s24 + $0x90] sm:$0xff]  ;;  %v2994_v46 = vld [vmem:[%s2877_s24 + $0x81] sm:$0xff]  ;;  %v2999_v47 = vld [vmem:[%s2877_s24 + $0x98] sm:$0xff] }
  0x1a   : > { %2630 = vmatpush3.bf16.msra.mxu1 %v2627_v27  ;;  %2646 = vmatpush3.bf16.msra.mxu0 %v2643_v29  ;;  %v3002_v48 = vld [vmem:[%s2877_s24 + $0x91] sm:$0xff]  ;;  %v3005_v49 = vld [vmem:[%s2877_s24 + $0xa8] sm:$0xff]  ;;  %v3014_v50 = vld [vmem:[%s2877_s24 + $0x99] sm:$0xff] }
  0x1b   : > { %v3019_v51 = vld [vmem:[%s2877_s24 + $0xb0] sm:$0xff]  ;;  %v3025_v53 = vld [vmem:[%s2877_s24 + $0xc0] sm:$0xff]  ;;  %v3039_v55 = vld [vmem:[%s2877_s24 + $0xc8] sm:$0xff] }
  0x1c   : > { %2406 = vmatmul.mubr.msk.f32.gmra.mrb[4].mxu1 %vm307_vm0, %v2934_v34  ;;  %2518 = vmatmul.mubr.msk.f32.gmra.mrb[4].mxu0 %vm307_vm0, %v2939_v35  ;;  %v3022_v52 = vld [vmem:[%s2877_s24 + $0xa9] sm:$0xff]  ;;  %v3034_v54 = vld [vmem:[%s2877_s24 + $0xb1] sm:$0xff]  ;;  %v3042_v56 = vld [vmem:[%s2877_s24 + $0xc1] sm:$0xff] }
  0x1d   : > { %2408 = vmatprep.mubr.msk.f32.mxu1 %vm307_vm0, %v2942_v36  ;;  %2520 = vmatprep.mubr.msk.f32.mxu0 %vm307_vm0, %v2945_v37  ;;  %v3045_v57 = vld [vmem:[%s2877_s24 + $0xd8] sm:$0xff]  ;;  %v3054_v58 = vld [vmem:[%s2877_s24 + $0xc9] sm:$0xff]  ;;  %v3059_v59 = vld [vmem:[%s2877_s24 + $0xe0] sm:$0xff] }
  0x1e   : > { %v3062_v60 = vld [vmem:[%s2877_s24 + $0xd9] sm:$0xff]  ;;  %v3065_v61 = vld [vmem:[%s2877_s24 + $0xf0] sm:$0xff]  ;;  %v3074_v62 = vld [vmem:[%s2877_s24 + $0xe1] sm:$0xff] }
  0x1f   : > { %v3079_v63 = vld [vmem:[%s2877_s24 + $0xf8] sm:$0xff]  ;;  %v3085_v1 = vld [vmem:[%s2877_s24 + $0x108] sm:$0xff]  ;;  %v3099_v3 = vld [vmem:[%s2877_s24 + $0x110] sm:$0xff] }
  0x20   : > { %2409 = vmatmul.mubr.msk.f32.gmra.mrb[6].mxu1 %vm307_vm0, %v2954_v38  ;;  %2521 = vmatmul.mubr.msk.f32.gmra.mrb[6].mxu0 %vm307_vm0, %v2959_v39  ;;  %v3082_v0 = vld [vmem:[%s2877_s24 + $0xf1] sm:$0xff]  ;;  %v3094_v2 = vld [vmem:[%s2877_s24 + $0xf9] sm:$0xff]  ;;  %v3102_v4 = vld [vmem:[%s2877_s24 + $0x109] sm:$0xff] }
  0x21   : > { %2411 = vmatprep.mubr.msk.f32.mxu1 %vm307_vm0, %v2962_v40  ;;  %2523 = vmatprep.mubr.msk.f32.mxu0 %vm307_vm0, %v2965_v41  ;;  %v3105_v5 = vld [vmem:[%s2877_s24 + $0x120] sm:$0xff]  ;;  %v3114_v6 = vld [vmem:[%s2877_s24 + $0x111] sm:$0xff]  ;;  %v3119_v7 = vld [vmem:[%s2877_s24 + $0x128] sm:$0xff] }
  0x22   : > { %v3122_v8 = vld [vmem:[%s2877_s24 + $0x121] sm:$0xff]  ;;  %v3125_v9 = vld [vmem:[%s2877_s24 + $0x138] sm:$0xff]  ;;  %v3134_v10 = vld [vmem:[%s2877_s24 + $0x129] sm:$0xff] }
  0x23   : > { %v3139_v11 = vld [vmem:[%s2877_s24 + $0x140] sm:$0xff]  ;;  %v3145_v13 = vld [vmem:[%s2877_s24 + $0x150] sm:$0xff]  ;;  %v3159_v15 = vld [vmem:[%s2877_s24 + $0x158] sm:$0xff] }
  0x24   : > { %2412 = vmatmul.mubr.msk.f32.gmra.mrb[8].mxu1 %vm307_vm0, %v2974_v42  ;;  %2524 = vmatmul.mubr.msk.f32.gmra.mrb[8].mxu0 %vm307_vm0, %v2979_v43  ;;  %v3142_v12 = vld [vmem:[%s2877_s24 + $0x139] sm:$0xff]  ;;  %v3154_v14 = vld [vmem:[%s2877_s24 + $0x141] sm:$0xff]  ;;  %v3162_v16 = vld [vmem:[%s2877_s24 + $0x151] sm:$0xff] }
  0x25   : > { %2414 = vmatprep.mubr.msk.f32.mxu1 %vm307_vm0, %v2982_v44  ;;  %2526 = vmatprep.mubr.msk.f32.mxu0 %vm307_vm0, %v2985_v45  ;;  %v3165_v17 = vld [vmem:[%s2877_s24 + $0x168] sm:$0xff]  ;;  %v3174_v18 = vld [vmem:[%s2877_s24 + $0x159] sm:$0xff]  ;;  %v3179_v19 = vld [vmem:[%s2877_s24 + $0x170] sm:$0xff] }
  0x26   : > { %v3182_v21 = vld [vmem:[%s2877_s24 + $0x169] sm:$0xff]  ;;  %v2136_v22 = vld [vmem:[%s2877_s24 + $0x180] sm:$0xff]  ;;  %v3192_v23 = vld [vmem:[%s2877_s24 + $0x171] sm:$0xff] }
  0x27   : > { %v2137_v24 = vld [vmem:[%s2877_s24 + $0x188] sm:$0xff]  ;;  %v234_v27 = vld [vmem:[%s2877_s24] sm:$0xff] }
  0x28   : > { %2415 = vmatmul.mubr.msk.f32.gmra.mrb[10].mxu1 %vm307_vm0, %v2994_v46  ;;  %2527 = vmatmul.mubr.msk.f32.gmra.mrb[10].mxu0 %vm307_vm0, %v2999_v47  ;;  %v235_v29 = vld [vmem:[%s2877_s24 + $0x8] sm:$0xff] }
  0x29   : > { %2417 = vmatprep.mubr.msk.f32.mxu1 %vm307_vm0, %v3002_v48  ;;  %2529 = vmatprep.mubr.msk.f32.mxu0 %vm307_vm0, %v3005_v49 }
  0x2c   : > { %2418 = vmatmul.mubr.msk.f32.gmra.mrb[12].mxu1 %vm307_vm0, %v3014_v50  ;;  %2530 = vmatmul.mubr.msk.f32.gmra.mrb[12].mxu0 %vm307_vm0, %v3019_v51 }
  0x2d   : > { %2420 = vmatprep.mubr.msk.f32.mxu1 %vm307_vm0, %v3022_v52  ;;  %2532 = vmatprep.mubr.msk.f32.mxu0 %vm307_vm0, %v3025_v53 }
  0x30   : > { %2421 = vmatmul.mubr.msk.f32.gmra.mrb[14].mxu1 %vm307_vm0, %v3034_v54  ;;  %2533 = vmatmul.mubr.msk.f32.gmra.mrb[14].mxu0 %vm307_vm0, %v3039_v55 }
  0x31   : > { %2423 = vmatprep.mubr.msk.f32.mxu1 %vm307_vm0, %v3042_v56  ;;  %2535 = vmatprep.mubr.msk.f32.mxu0 %vm307_vm0, %v3045_v57 }
  0x34   : > { %2424 = vmatmul.mubr.msk.f32.gmra.mrb[16].mxu1 %vm307_vm0, %v3054_v58  ;;  %2536 = vmatmul.mubr.msk.f32.gmra.mrb[16].mxu0 %vm307_vm0, %v3059_v59 }
  0x35   : > { %2426 = vmatprep.mubr.msk.f32.mxu1 %vm307_vm0, %v3062_v60  ;;  %2538 = vmatprep.mubr.msk.f32.mxu0 %vm307_vm0, %v3065_v61 }
  0x38   : > { %2427 = vmatmul.mubr.msk.f32.gmra.mrb[18].mxu1 %vm307_vm0, %v3074_v62  ;;  %2539 = vmatmul.mubr.msk.f32.gmra.mrb[18].mxu0 %vm307_vm0, %v3079_v63 }
  0x39   : > { %2429 = vmatprep.mubr.msk.f32.mxu1 %vm307_vm0, %v3082_v0  ;;  %2541 = vmatprep.mubr.msk.f32.mxu0 %vm307_vm0, %v3085_v1 }
  0x3c   : > { %2430 = vmatmul.mubr.msk.f32.gmra.mrb[20].mxu1 %vm307_vm0, %v3094_v2  ;;  %2542 = vmatmul.mubr.msk.f32.gmra.mrb[20].mxu0 %vm307_vm0, %v3099_v3 }
  0x3d   : > { %2432 = vmatprep.mubr.msk.f32.mxu1 %vm307_vm0, %v3102_v4  ;;  %2544 = vmatprep.mubr.msk.f32.mxu0 %vm307_vm0, %v3105_v5 }
  0x40   : > { %2433 = vmatmul.mubr.msk.f32.gmra.mrb[22].mxu1 %vm307_vm0, %v3114_v6  ;;  %2545 = vmatmul.mubr.msk.f32.gmra.mrb[22].mxu0 %vm307_vm0, %v3119_v7 }
  0x41   : > { %2435 = vmatprep.mubr.msk.f32.mxu1 %vm307_vm0, %v3122_v8  ;;  %2547 = vmatprep.mubr.msk.f32.mxu0 %vm307_vm0, %v3125_v9 }
  0x44   : > { %2436 = vmatmul.mubr.msk.f32.gmra.mrb[24].mxu1 %vm307_vm0, %v3134_v10  ;;  %2548 = vmatmul.mubr.msk.f32.gmra.mrb[24].mxu0 %vm307_vm0, %v3139_v11 }
  0x45   : > { %2438 = vmatprep.mubr.msk.f32.mxu1 %vm307_vm0, %v3142_v12  ;;  %2550 = vmatprep.mubr.msk.f32.mxu0 %vm307_vm0, %v3145_v13 }
  0x48   : > { %2439 = vmatmul.mubr.msk.f32.gmra.mrb[26].mxu1 %vm307_vm0, %v3154_v14  ;;  %2551 = vmatmul.mubr.msk.f32.gmra.mrb[26].mxu0 %vm307_vm0, %v3159_v15 }
  0x49   : > { %2441 = vmatprep.mubr.msk.f32.mxu1 %vm307_vm0, %v3162_v16  ;;  %2553 = vmatprep.mubr.msk.f32.mxu0 %vm307_vm0, %v3165_v17 }
  0x4c   : > { %2442 = vmatmul.mubr.msk.f32.gmra.mrb[28].mxu1 %vm307_vm0, %v3174_v18  ;;  %2554 = vmatmul.mubr.msk.f32.gmra.mrb[28].mxu0 %vm307_vm0, %v3179_v19 }
  0x4d   : > { %2444 = vmatprep.mubr.msk.f32.mxu1 %vm307_vm0, %v3182_v21  ;;  %2556 = vmatprep.mubr.msk.f32.mxu0 %vm307_vm0, %v2136_v22 }
  0x50   : > { %2445 = vmatmul.mubr.msk.f32.gmra.mrb[30].mxu1 %vm307_vm0, %v3192_v23  ;;  %2557 = vmatmul.mubr.msk.f32.gmra.mrb[30].mxu0 %vm307_vm0, %v2137_v24 }
  0x51   : > { %2455 = vmatprep.mubr.msk.f32.mxu1 %vm307_vm0, %v234_v27  ;;  %2567 = vmatprep.mubr.msk.f32.mxu0 %vm307_vm0, %v2903_v26 }
  0x54   : > { %2456 = vmatmul.mubr.msk.f32.vlgmr.msra.gmra.mrb[0].mxu1 %vm307_vm0, %v235_v29  ;;  %2568 = vmatmul.mubr.msk.f32.vlgmr.msra.gmra.mrb[0].mxu0 %vm307_vm0, %v2912_v30  ;;  %v3330_v30 = vld [vmem:[%s3482_s2] ss:$0 sm:$0xff] }
  0x55   : > { %2458 = vmatprep.mubr.msk.f32.mxu1 %vm307_vm0, %v2884_v20  ;;  %2570 = vmatprep.mubr.msk.f32.mxu0 %vm307_vm0, %v2920_v32  ;;  %v2204_v20 = vld [vmem:[%s2877_s24 + $0x181] sm:$0xff] }
  0x58   : > { %2459 = vmatmul.mubr.msk.f32.gmra.mrb[2].mxu1 %vm307_vm0, %v2900_v25  ;;  %2571 = vmatmul.mubr.msk.f32.gmra.mrb[2].mxu0 %vm307_vm0, %v2934_v34  ;;  %v2205_v25 = vld [vmem:[%s2877_s24 + $0x189] sm:$0xff]  ;;  %v3335_v34 = vld [vmem:[%s3483_s3] ss:$0 sm:$0xff] }
  0x59   : > { %2461 = vmatprep.mubr.msk.f32.mxu1 %vm307_vm0, %v2907_v28  ;;  %2573 = vmatprep.mubr.msk.f32.mxu0 %vm307_vm0, %v2942_v36 }
  0x5c   : > { %2462 = vmatmul.mubr.msk.f32.gmra.mrb[4].mxu1 %vm307_vm0, %v2917_v31  ;;  %2574 = vmatmul.mubr.msk.f32.gmra.mrb[4].mxu0 %vm307_vm0, %v2954_v38 }
  0x5d   : > { %2464 = vmatprep.mubr.msk.f32.mxu1 %vm307_vm0, %v2925_v33  ;;  %2576 = vmatprep.mubr.msk.f32.mxu0 %vm307_vm0, %v2962_v40 }
  0x60   : > { %2465 = vmatmul.mubr.msk.f32.gmra.mrb[6].mxu1 %vm307_vm0, %v2939_v35  ;;  %2577 = vmatmul.mubr.msk.f32.gmra.mrb[6].mxu0 %vm307_vm0, %v2974_v42 }
  0x61   : > { %2467 = vmatprep.mubr.msk.f32.mxu1 %vm307_vm0, %v2945_v37  ;;  %2579 = vmatprep.mubr.msk.f32.mxu0 %vm307_vm0, %v2982_v44 }
  0x64   : > { %2468 = vmatmul.mubr.msk.f32.gmra.mrb[8].mxu1 %vm307_vm0, %v2959_v39  ;;  %2580 = vmatmul.mubr.msk.f32.gmra.mrb[8].mxu0 %vm307_vm0, %v2994_v46 }
  0x65   : > { %2470 = vmatprep.mubr.msk.f32.mxu1 %vm307_vm0, %v2965_v41  ;;  %2582 = vmatprep.mubr.msk.f32.mxu0 %vm307_vm0, %v3002_v48 }
  0x68   : > { %2471 = vmatmul.mubr.msk.f32.gmra.mrb[10].mxu1 %vm307_vm0, %v2979_v43  ;;  %2583 = vmatmul.mubr.msk.f32.gmra.mrb[10].mxu0 %vm307_vm0, %v3014_v50 }
  0x69   : > { %2473 = vmatprep.mubr.msk.f32.mxu1 %vm307_vm0, %v2985_v45  ;;  %2585 = vmatprep.mubr.msk.f32.mxu0 %vm307_vm0, %v3022_v52 }
  0x6c   : > { %2474 = vmatmul.mubr.msk.f32.gmra.mrb[12].mxu1 %vm307_vm0, %v2999_v47  ;;  %2586 = vmatmul.mubr.msk.f32.gmra.mrb[12].mxu0 %vm307_vm0, %v3034_v54 }
  0x6d   : > { %2476 = vmatprep.mubr.msk.f32.mxu1 %vm307_vm0, %v3005_v49  ;;  %2588 = vmatprep.mubr.msk.f32.mxu0 %vm307_vm0, %v3042_v56 }
  0x70   : > { %2477 = vmatmul.mubr.msk.f32.gmra.mrb[14].mxu1 %vm307_vm0, %v3019_v51  ;;  %2589 = vmatmul.mubr.msk.f32.gmra.mrb[14].mxu0 %vm307_vm0, %v3054_v58 }
  0x71   : > { %2479 = vmatprep.mubr.msk.f32.mxu1 %vm307_vm0, %v3025_v53  ;;  %2591 = vmatprep.mubr.msk.f32.mxu0 %vm307_vm0, %v3062_v60 }
  0x74   : > { %2480 = vmatmul.mubr.msk.f32.gmra.mrb[16].mxu1 %vm307_vm0, %v3039_v55  ;;  %2592 = vmatmul.mubr.msk.f32.gmra.mrb[16].mxu0 %vm307_vm0, %v3074_v62 }
  0x75   : > { %2482 = vmatprep.mubr.msk.f32.mxu1 %vm307_vm0, %v3045_v57  ;;  %2594 = vmatprep.mubr.msk.f32.mxu0 %vm307_vm0, %v3082_v0 }
  0x78   : > { %2483 = vmatmul.mubr.msk.f32.gmra.mrb[18].mxu1 %vm307_vm0, %v3059_v59  ;;  %2595 = vmatmul.mubr.msk.f32.gmra.mrb[18].mxu0 %vm307_vm0, %v3094_v2 }
  0x79   : > { %2485 = vmatprep.mubr.msk.f32.mxu1 %vm307_vm0, %v3065_v61  ;;  %2597 = vmatprep.mubr.msk.f32.mxu0 %vm307_vm0, %v3102_v4 }
  0x7c   : > { %2486 = vmatmul.mubr.msk.f32.gmra.mrb[20].mxu1 %vm307_vm0, %v3079_v63  ;;  %2598 = vmatmul.mubr.msk.f32.gmra.mrb[20].mxu0 %vm307_vm0, %v3114_v6 }
  0x7d   : > { %2488 = vmatprep.mubr.msk.f32.mxu1 %vm307_vm0, %v3085_v1  ;;  %2600 = vmatprep.mubr.msk.f32.mxu0 %vm307_vm0, %v3122_v8 }
  0x80   : > { %2489 = vmatmul.mubr.msk.f32.gmra.mrb[22].mxu1 %vm307_vm0, %v3099_v3  ;;  %2601 = vmatmul.mubr.msk.f32.gmra.mrb[22].mxu0 %vm307_vm0, %v3134_v10 }
  0x81   : > { %2491 = vmatprep.mubr.msk.f32.mxu1 %vm307_vm0, %v3105_v5  ;;  %2603 = vmatprep.mubr.msk.f32.mxu0 %vm307_vm0, %v3142_v12 }
  0x84   : > { %2492 = vmatmul.mubr.msk.f32.gmra.mrb[24].mxu1 %vm307_vm0, %v3119_v7  ;;  %2604 = vmatmul.mubr.msk.f32.gmra.mrb[24].mxu0 %vm307_vm0, %v3154_v14 }
  0x85   : > { %2494 = vmatprep.mubr.msk.f32.mxu1 %vm307_vm0, %v3125_v9  ;;  %2606 = vmatprep.mubr.msk.f32.mxu0 %vm307_vm0, %v3162_v16 }
  0x88   : > { %2495 = vmatmul.mubr.msk.f32.gmra.mrb[26].mxu1 %vm307_vm0, %v3139_v11  ;;  %2607 = vmatmul.mubr.msk.f32.gmra.mrb[26].mxu0 %vm307_vm0, %v3174_v18 }
  0x89   : > { %2497 = vmatprep.mubr.msk.f32.mxu1 %vm307_vm0, %v3145_v13  ;;  %2609 = vmatprep.mubr.msk.f32.mxu0 %vm307_vm0, %v3182_v21 }
  0x8c   : > { %2498 = vmatmul.mubr.msk.f32.gmra.mrb[28].mxu1 %vm307_vm0, %v3159_v15  ;;  %2610 = vmatmul.mubr.msk.f32.gmra.mrb[28].mxu0 %vm307_vm0, %v3192_v23 }
  0x8d   : > { %2500 = vmatprep.mubr.msk.f32.mxu1 %vm307_vm0, %v3165_v17  ;;  %2612 = vmatprep.mubr.msk.f32.mxu0 %vm307_vm0, %v2204_v20 }
  0x90   : > { %2501 = vmatmul.mubr.msk.f32.gmra.mrb[30].mxu1 %vm307_vm0, %v3179_v19  ;;  %2613 = vmatmul.mubr.msk.f32.gmra.mrb[30].mxu0 %vm307_vm0, %v2205_v25 }
 0x127   : > { %v2457_v26 = vpop.f32.mrb[0].mxu1  ;;  %v2569_v28 = vpop.f32.mrb[0].mxu0 }
 0x128   : > { %v791_v31 = vpop.f32.mrb[1].mxu1  ;;  %v2647_v32 = vadd.f32 %v2569_v28, %v2457_v26  ;;  %v1540_v33 = vpop.f32.mrb[1].mxu0 }
 0x129   : > { %v2648_v35 = vadd.f32 %v1540_v33, %v791_v31 }
 0x12a   : > { %v1739_v36 = vmul.f32 %v2647_v32, %v3330_v30 }
 0x12b   : > { %v2460_v37 = vpop.f32.mrb[2].mxu1  ;;  %v1738_v38 = vmul.f32 %v2648_v35, %v3330_v30  ;;  %v2572_v39 = vpop.f32.mrb[2].mxu0 }
 0x12c   : > { %v801_v40 = vpop.f32.mrb[3].mxu1  ;;  %v1778_v41 = vadd.f32 %v3335_v34, %v1739_v36  ;;  %v2649_v42 = vadd.f32 %v2572_v39, %v2460_v37  ;;  %v1550_v43 = vpop.f32.mrb[3].mxu0 }
 0x12d   : > { %v1777_v44 = vadd.f32 %v3335_v34, %v1738_v38  ;;  %v2650_v45 = vadd.f32 %v1550_v43, %v801_v40 }
 0x12e   : > { %vm1810_vm1 = vcmp.gt.f32.partialorder %v1778_v41, 0.0  ;;  %v1842_v46 = vmul.f32 0.2, %v1778_v41  ;;  %v1741_v47 = vmul.f32 %v2649_v42, %v3330_v30 }
 0x12f   : > { %v2463_v48 = vpop.f32.mrb[4].mxu1  ;;  %vm1809_vm3 = vcmp.gt.f32.partialorder %v1777_v44, 0.0  ;;  %v1841_v49 = vmul.f32 0.2, %v1777_v44  ;;  %v1740_v50 = vmul.f32 %v2650_v45, %v3330_v30  ;;  %v2575_v51 = vpop.f32.mrb[4].mxu0 }
 0x130   : > { %v811_v52 = vpop.f32.mrb[5].mxu1  ;;  %v1874_v53 = vsel %vm1810_vm1, %v1778_v41, %v1842_v46  ;;  %v1780_v54 = vadd.f32 %v3335_v34, %v1741_v47  ;;  %v2651_v55 = vadd.f32 %v2575_v51, %v2463_v48  ;;  %v1560_v56 = vpop.f32.mrb[5].mxu0 }
 0x131   : > { %1907 = vst.msk [vmem:[%s3345_s14 + $0x8] sm:$0xff] %vm1905_vm2, %v1874_v53  ;;  %v1873_v57 = vsel %vm1809_vm3, %v1777_v44, %v1841_v49  ;;  %v1779_v58 = vadd.f32 %v3335_v34, %v1740_v50  ;;  %v2652_v59 = vadd.f32 %v1560_v56, %v811_v52 }
 0x132   : > { %1906 = vst.msk [vmem:[%s3345_s14] sm:$0xff] %vm1905_vm2, %v1873_v57  ;;  %vm1812_vm4 = vcmp.gt.f32.partialorder %v1780_v54, 0.0  ;;  %v1844_v60 = vmul.f32 0.2, %v1780_v54  ;;  %v1743_v61 = vmul.f32 %v2651_v55, %v3330_v30 }
 0x133   : > { %v2466_v62 = vpop.f32.mrb[6].mxu1  ;;  %vm1811_vm5 = vcmp.gt.f32.partialorder %v1779_v58, 0.0  ;;  %v1843_v63 = vmul.f32 0.2, %v1779_v58  ;;  %v1742_v0 = vmul.f32 %v2652_v59, %v3330_v30  ;;  %v2578_v1 = vpop.f32.mrb[6].mxu0 }
 0x134   : > { %v821_v2 = vpop.f32.mrb[7].mxu1  ;;  %v1876_v3 = vsel %vm1812_vm4, %v1780_v54, %v1844_v60  ;;  %v1782_v4 = vadd.f32 %v3335_v34, %v1743_v61  ;;  %v2653_v5 = vadd.f32 %v2578_v1, %v2466_v62  ;;  %v1570_v6 = vpop.f32.mrb[7].mxu0 }
 0x135   : > { %1909 = vst.msk [vmem:[%s3345_s14 + $0x18] sm:$0xff] %vm1905_vm2, %v1876_v3  ;;  %v1875_v7 = vsel %vm1811_vm5, %v1779_v58, %v1843_v63  ;;  %v1781_v8 = vadd.f32 %v3335_v34, %v1742_v0  ;;  %v2654_v9 = vadd.f32 %v1570_v6, %v821_v2 }
 0x136   : > { %1908 = vst.msk [vmem:[%s3345_s14 + $0x10] sm:$0xff] %vm1905_vm2, %v1875_v7  ;;  %vm1814_vm6 = vcmp.gt.f32.partialorder %v1782_v4, 0.0  ;;  %v1846_v10 = vmul.f32 0.2, %v1782_v4  ;;  %v1745_v11 = vmul.f32 %v2653_v5, %v3330_v30 }
 0x137   : > { %v2469_v12 = vpop.f32.mrb[8].mxu1  ;;  %vm1813_vm7 = vcmp.gt.f32.partialorder %v1781_v8, 0.0  ;;  %v1845_v13 = vmul.f32 0.2, %v1781_v8  ;;  %v1744_v14 = vmul.f32 %v2654_v9, %v3330_v30  ;;  %v2581_v15 = vpop.f32.mrb[8].mxu0 }
 0x138   : > { %v831_v16 = vpop.f32.mrb[9].mxu1  ;;  %v1878_v17 = vsel %vm1814_vm6, %v1782_v4, %v1846_v10  ;;  %v1784_v18 = vadd.f32 %v3335_v34, %v1745_v11  ;;  %v2655_v19 = vadd.f32 %v2581_v15, %v2469_v12  ;;  %v1580_v21 = vpop.f32.mrb[9].mxu0 }
 0x139   : > { %1911 = vst.msk [vmem:[%s3345_s14 + $0x28] sm:$0xff] %vm1905_vm2, %v1878_v17  ;;  %v1877_v22 = vsel %vm1813_vm7, %v1781_v8, %v1845_v13  ;;  %v1783_v23 = vadd.f32 %v3335_v34, %v1744_v14  ;;  %v2656_v24 = vadd.f32 %v1580_v21, %v831_v16 }
 0x13a   : > { %1910 = vst.msk [vmem:[%s3345_s14 + $0x20] sm:$0xff] %vm1905_vm2, %v1877_v22  ;;  %vm1816_vm8 = vcmp.gt.f32.partialorder %v1784_v18, 0.0  ;;  %v1848_v27 = vmul.f32 0.2, %v1784_v18  ;;  %v1747_v29 = vmul.f32 %v2655_v19, %v3330_v30 }
 0x13b   : > { %v2472_v20 = vpop.f32.mrb[10].mxu1  ;;  %vm1815_vm9 = vcmp.gt.f32.partialorder %v1783_v23, 0.0  ;;  %v1847_v25 = vmul.f32 0.2, %v1783_v23  ;;  %v1746_v26 = vmul.f32 %v2656_v24, %v3330_v30  ;;  %v2584_v28 = vpop.f32.mrb[10].mxu0 }
 0x13c   : > { %v841_v31 = vpop.f32.mrb[11].mxu1  ;;  %v1880_v32 = vsel %vm1816_vm8, %v1784_v18, %v1848_v27  ;;  %v1786_v33 = vadd.f32 %v3335_v34, %v1747_v29  ;;  %v2657_v35 = vadd.f32 %v2584_v28, %v2472_v20  ;;  %v1590_v36 = vpop.f32.mrb[11].mxu0 }
 0x13d   : > { %1913 = vst.msk [vmem:[%s3345_s14 + $0x38] sm:$0xff] %vm1905_vm2, %v1880_v32  ;;  %v1879_v37 = vsel %vm1815_vm9, %v1783_v23, %v1847_v25  ;;  %v1785_v38 = vadd.f32 %v3335_v34, %v1746_v26  ;;  %v2658_v39 = vadd.f32 %v1590_v36, %v841_v31 }
 0x13e   : > { %1912 = vst.msk [vmem:[%s3345_s14 + $0x30] sm:$0xff] %vm1905_vm2, %v1879_v37  ;;  %vm1818_vm10 = vcmp.gt.f32.partialorder %v1786_v33, 0.0  ;;  %v1850_v40 = vmul.f32 0.2, %v1786_v33  ;;  %v1749_v41 = vmul.f32 %v2657_v35, %v3330_v30 }
 0x13f   : > { %v2475_v42 = vpop.f32.mrb[12].mxu1  ;;  %vm1817_vm11 = vcmp.gt.f32.partialorder %v1785_v38, 0.0  ;;  %v1849_v43 = vmul.f32 0.2, %v1785_v38  ;;  %v1748_v44 = vmul.f32 %v2658_v39, %v3330_v30  ;;  %v2587_v45 = vpop.f32.mrb[12].mxu0 }
 0x140   : > { %v851_v46 = vpop.f32.mrb[13].mxu1  ;;  %v1882_v47 = vsel %vm1818_vm10, %v1786_v33, %v1850_v40  ;;  %v1788_v48 = vadd.f32 %v3335_v34, %v1749_v41  ;;  %v2659_v49 = vadd.f32 %v2587_v45, %v2475_v42  ;;  %v1600_v50 = vpop.f32.mrb[13].mxu0 }
 0x141   : > { %1915 = vst.msk [vmem:[%s3345_s14 + $0x48] sm:$0xff] %vm1905_vm2, %v1882_v47  ;;  %v1881_v51 = vsel %vm1817_vm11, %v1785_v38, %v1849_v43  ;;  %v1787_v52 = vadd.f32 %v3335_v34, %v1748_v44  ;;  %v2660_v53 = vadd.f32 %v1600_v50, %v851_v46 }
 0x142   : > { %1914 = vst.msk [vmem:[%s3345_s14 + $0x40] sm:$0xff] %vm1905_vm2, %v1881_v51  ;;  %vm1820_vm12 = vcmp.gt.f32.partialorder %v1788_v48, 0.0  ;;  %v1852_v54 = vmul.f32 0.2, %v1788_v48  ;;  %v1751_v55 = vmul.f32 %v2659_v49, %v3330_v30 }
 0x143   : > { %v2478_v56 = vpop.f32.mrb[14].mxu1  ;;  %vm1819_vm13 = vcmp.gt.f32.partialorder %v1787_v52, 0.0  ;;  %v1851_v57 = vmul.f32 0.2, %v1787_v52  ;;  %v1750_v58 = vmul.f32 %v2660_v53, %v3330_v30  ;;  %v2590_v59 = vpop.f32.mrb[14].mxu0 }
 0x144   : > { %v861_v60 = vpop.f32.mrb[15].mxu1  ;;  %v1884_v61 = vsel %vm1820_vm12, %v1788_v48, %v1852_v54  ;;  %v1790_v62 = vadd.f32 %v3335_v34, %v1751_v55  ;;  %v2661_v63 = vadd.f32 %v2590_v59, %v2478_v56  ;;  %v1610_v0 = vpop.f32.mrb[15].mxu0 }
 0x145   : > { %1917 = vst.msk [vmem:[%s3345_s14 + $0x58] sm:$0xff] %vm1905_vm2, %v1884_v61  ;;  %v1883_v1 = vsel %vm1819_vm13, %v1787_v52, %v1851_v57  ;;  %v1789_v2 = vadd.f32 %v3335_v34, %v1750_v58  ;;  %v2662_v3 = vadd.f32 %v1610_v0, %v861_v60 }
 0x146   : > { %1916 = vst.msk [vmem:[%s3345_s14 + $0x50] sm:$0xff] %vm1905_vm2, %v1883_v1  ;;  %vm1822_vm14 = vcmp.gt.f32.partialorder %v1790_v62, 0.0  ;;  %v1854_v4 = vmul.f32 0.2, %v1790_v62  ;;  %v1753_v5 = vmul.f32 %v2661_v63, %v3330_v30 }
 0x147   : > { %v2481_v6 = vpop.f32.mrb[16].mxu1  ;;  %vm1821_vm15 = vcmp.gt.f32.partialorder %v1789_v2, 0.0  ;;  %v1853_v7 = vmul.f32 0.2, %v1789_v2  ;;  %v1752_v8 = vmul.f32 %v2662_v3, %v3330_v30  ;;  %v2593_v9 = vpop.f32.mrb[16].mxu0 }
 0x148   : > { %v871_v10 = vpop.f32.mrb[17].mxu1  ;;  %v1886_v11 = vsel %vm1822_vm14, %v1790_v62, %v1854_v4  ;;  %v1792_v12 = vadd.f32 %v3335_v34, %v1753_v5  ;;  %v2663_v13 = vadd.f32 %v2593_v9, %v2481_v6  ;;  %v1620_v14 = vpop.f32.mrb[17].mxu0 }
 0x149   : > { %1919 = vst.msk [vmem:[%s3345_s14 + $0x68] sm:$0xff] %vm1905_vm2, %v1886_v11  ;;  %v1885_v15 = vsel %vm1821_vm15, %v1789_v2, %v1853_v7  ;;  %v1791_v16 = vadd.f32 %v3335_v34, %v1752_v8  ;;  %v2664_v17 = vadd.f32 %v1620_v14, %v871_v10 }
 0x14a   : > { %1918 = vst.msk [vmem:[%s3345_s14 + $0x60] sm:$0xff] %vm1905_vm2, %v1885_v15  ;;  %vm1824_vm0 = vcmp.gt.f32.partialorder %v1792_v12, 0.0  ;;  %v1856_v18 = vmul.f32 0.2, %v1792_v12  ;;  %v1755_v19 = vmul.f32 %v2663_v13, %v3330_v30 }
 0x14b   : > { %v2484_v21 = vpop.f32.mrb[18].mxu1  ;;  %vm1823_vm1 = vcmp.gt.f32.partialorder %v1791_v16, 0.0  ;;  %v1855_v22 = vmul.f32 0.2, %v1791_v16  ;;  %v1754_v23 = vmul.f32 %v2664_v17, %v3330_v30  ;;  %v2596_v24 = vpop.f32.mrb[18].mxu0 }
 0x14c   : > { %v881_v27 = vpop.f32.mrb[19].mxu1  ;;  %v1888_v29 = vsel %vm1824_vm0, %v1792_v12, %v1856_v18  ;;  %v1794_v20 = vadd.f32 %v3335_v34, %v1755_v19  ;;  %v2665_v25 = vadd.f32 %v2596_v24, %v2484_v21  ;;  %v1630_v26 = vpop.f32.mrb[19].mxu0 }
 0x14d   : > { %1921 = vst.msk [vmem:[%s3345_s14 + $0x78] sm:$0xff] %vm1905_vm2, %v1888_v29  ;;  %v1887_v28 = vsel %vm1823_vm1, %v1791_v16, %v1855_v22  ;;  %v1793_v31 = vadd.f32 %v3335_v34, %v1754_v23  ;;  %v2666_v32 = vadd.f32 %v1630_v26, %v881_v27 }
 0x14e   : > { %1920 = vst.msk [vmem:[%s3345_s14 + $0x70] sm:$0xff] %vm1905_vm2, %v1887_v28  ;;  %vm1826_vm3 = vcmp.gt.f32.partialorder %v1794_v20, 0.0  ;;  %v1858_v33 = vmul.f32 0.2, %v1794_v20  ;;  %v1757_v35 = vmul.f32 %v2665_v25, %v3330_v30 }
 0x14f   : > { %v2487_v36 = vpop.f32.mrb[20].mxu1  ;;  %vm1825_vm4 = vcmp.gt.f32.partialorder %v1793_v31, 0.0  ;;  %v1857_v37 = vmul.f32 0.2, %v1793_v31  ;;  %v1756_v38 = vmul.f32 %v2666_v32, %v3330_v30  ;;  %v2599_v39 = vpop.f32.mrb[20].mxu0 }
 0x150   : > { %v891_v40 = vpop.f32.mrb[21].mxu1  ;;  %v1890_v41 = vsel %vm1826_vm3, %v1794_v20, %v1858_v33  ;;  %v1796_v42 = vadd.f32 %v3335_v34, %v1757_v35  ;;  %v2667_v43 = vadd.f32 %v2599_v39, %v2487_v36  ;;  %v1640_v44 = vpop.f32.mrb[21].mxu0 }
 0x151   : > { %1923 = vst.msk [vmem:[%s3345_s14 + $0x88] sm:$0xff] %vm1905_vm2, %v1890_v41  ;;  %v1889_v45 = vsel %vm1825_vm4, %v1793_v31, %v1857_v37  ;;  %v1795_v46 = vadd.f32 %v3335_v34, %v1756_v38  ;;  %v2668_v47 = vadd.f32 %v1640_v44, %v891_v40 }
 0x152   : > { %1922 = vst.msk [vmem:[%s3345_s14 + $0x80] sm:$0xff] %vm1905_vm2, %v1889_v45  ;;  %vm1828_vm5 = vcmp.gt.f32.partialorder %v1796_v42, 0.0  ;;  %v1860_v48 = vmul.f32 0.2, %v1796_v42  ;;  %v1759_v49 = vmul.f32 %v2667_v43, %v3330_v30 }
 0x153   : > { %v2490_v50 = vpop.f32.mrb[22].mxu1  ;;  %vm1827_vm6 = vcmp.gt.f32.partialorder %v1795_v46, 0.0  ;;  %v1859_v51 = vmul.f32 0.2, %v1795_v46  ;;  %v1758_v52 = vmul.f32 %v2668_v47, %v3330_v30  ;;  %v2602_v53 = vpop.f32.mrb[22].mxu0 }
 0x154   : > { %v901_v54 = vpop.f32.mrb[23].mxu1  ;;  %v1892_v55 = vsel %vm1828_vm5, %v1796_v42, %v1860_v48  ;;  %v1798_v56 = vadd.f32 %v3335_v34, %v1759_v49  ;;  %v2669_v57 = vadd.f32 %v2602_v53, %v2490_v50  ;;  %v1650_v58 = vpop.f32.mrb[23].mxu0 }
 0x155   : > { %1925 = vst.msk [vmem:[%s3345_s14 + $0x98] sm:$0xff] %vm1905_vm2, %v1892_v55  ;;  %v1891_v59 = vsel %vm1827_vm6, %v1795_v46, %v1859_v51  ;;  %v1797_v60 = vadd.f32 %v3335_v34, %v1758_v52  ;;  %v2670_v61 = vadd.f32 %v1650_v58, %v901_v54 }
 0x156   : > { %1924 = vst.msk [vmem:[%s3345_s14 + $0x90] sm:$0xff] %vm1905_vm2, %v1891_v59  ;;  %vm1830_vm7 = vcmp.gt.f32.partialorder %v1798_v56, 0.0  ;;  %v1862_v62 = vmul.f32 0.2, %v1798_v56  ;;  %v1761_v63 = vmul.f32 %v2669_v57, %v3330_v30 }
 0x157   : > { %v2493_v0 = vpop.f32.mrb[24].mxu1  ;;  %vm1829_vm8 = vcmp.gt.f32.partialorder %v1797_v60, 0.0  ;;  %v1861_v1 = vmul.f32 0.2, %v1797_v60  ;;  %v1760_v2 = vmul.f32 %v2670_v61, %v3330_v30  ;;  %v2605_v3 = vpop.f32.mrb[24].mxu0 }
 0x158   : > { %v911_v4 = vpop.f32.mrb[25].mxu1  ;;  %v1894_v5 = vsel %vm1830_vm7, %v1798_v56, %v1862_v62  ;;  %v1800_v6 = vadd.f32 %v3335_v34, %v1761_v63  ;;  %v2671_v7 = vadd.f32 %v2605_v3, %v2493_v0  ;;  %v1660_v8 = vpop.f32.mrb[25].mxu0 }
 0x159   : > { %1927 = vst.msk [vmem:[%s3345_s14 + $0xa8] sm:$0xff] %vm1905_vm2, %v1894_v5  ;;  %v1893_v9 = vsel %vm1829_vm8, %v1797_v60, %v1861_v1  ;;  %v1799_v10 = vadd.f32 %v3335_v34, %v1760_v2  ;;  %v2672_v11 = vadd.f32 %v1660_v8, %v911_v4 }
 0x15a   : > { %1926 = vst.msk [vmem:[%s3345_s14 + $0xa0] sm:$0xff] %vm1905_vm2, %v1893_v9  ;;  %vm1832_vm9 = vcmp.gt.f32.partialorder %v1800_v6, 0.0  ;;  %v1864_v12 = vmul.f32 0.2, %v1800_v6  ;;  %v1763_v13 = vmul.f32 %v2671_v7, %v3330_v30 }
 0x15b   : > { %v2496_v14 = vpop.f32.mrb[26].mxu1  ;;  %vm1831_vm10 = vcmp.gt.f32.partialorder %v1799_v10, 0.0  ;;  %v1863_v15 = vmul.f32 0.2, %v1799_v10  ;;  %v1762_v16 = vmul.f32 %v2672_v11, %v3330_v30  ;;  %v2608_v17 = vpop.f32.mrb[26].mxu0 }
 0x15c   : > { %v921_v18 = vpop.f32.mrb[27].mxu1  ;;  %v1896_v19 = vsel %vm1832_vm9, %v1800_v6, %v1864_v12  ;;  %v1802_v21 = vadd.f32 %v3335_v34, %v1763_v13  ;;  %v2673_v22 = vadd.f32 %v2608_v17, %v2496_v14  ;;  %v1670_v23 = vpop.f32.mrb[27].mxu0 }
 0x15d   : > { %1929 = vst.msk [vmem:[%s3345_s14 + $0xb8] sm:$0xff] %vm1905_vm2, %v1896_v19  ;;  %v1895_v24 = vsel %vm1831_vm10, %v1799_v10, %v1863_v15  ;;  %v1801_v27 = vadd.f32 %v3335_v34, %v1762_v16  ;;  %v2674_v29 = vadd.f32 %v1670_v23, %v921_v18 }
 0x15e   : > { %1928 = vst.msk [vmem:[%s3345_s14 + $0xb0] sm:$0xff] %vm1905_vm2, %v1895_v24  ;;  %vm1834_vm11 = vcmp.gt.f32.partialorder %v1802_v21, 0.0  ;;  %v1866_v20 = vmul.f32 0.2, %v1802_v21  ;;  %v1765_v25 = vmul.f32 %v2673_v22, %v3330_v30 }
 0x15f   : > { %v2499_v26 = vpop.f32.mrb[28].mxu1  ;;  %vm1833_vm12 = vcmp.gt.f32.partialorder %v1801_v27, 0.0  ;;  %v1865_v28 = vmul.f32 0.2, %v1801_v27  ;;  %v1764_v31 = vmul.f32 %v2674_v29, %v3330_v30  ;;  %v2611_v32 = vpop.f32.mrb[28].mxu0 }
 0x160   : > { %v931_v33 = vpop.f32.mrb[29].mxu1  ;;  %v1898_v35 = vsel %vm1834_vm11, %v1802_v21, %v1866_v20  ;;  %v1804_v36 = vadd.f32 %v3335_v34, %v1765_v25  ;;  %v2675_v37 = vadd.f32 %v2611_v32, %v2499_v26  ;;  %v1680_v38 = vpop.f32.mrb[29].mxu0 }
 0x161   : > { %1931 = vst.msk [vmem:[%s3345_s14 + $0xc8] sm:$0xff] %vm1905_vm2, %v1898_v35  ;;  %v1897_v39 = vsel %vm1833_vm12, %v1801_v27, %v1865_v28  ;;  %v1803_v40 = vadd.f32 %v3335_v34, %v1764_v31  ;;  %v2676_v41 = vadd.f32 %v1680_v38, %v931_v33 }
 0x162   : > { %1930 = vst.msk [vmem:[%s3345_s14 + $0xc0] sm:$0xff] %vm1905_vm2, %v1897_v39  ;;  %vm1836_vm13 = vcmp.gt.f32.partialorder %v1804_v36, 0.0  ;;  %v1868_v42 = vmul.f32 0.2, %v1804_v36  ;;  %v1767_v43 = vmul.f32 %v2675_v37, %v3330_v30 }
 0x163   : > { %v2502_v44 = vpop.f32.mrb[30].mxu1  ;;  %vm1835_vm14 = vcmp.gt.f32.partialorder %v1803_v40, 0.0  ;;  %v1867_v45 = vmul.f32 0.2, %v1803_v40  ;;  %v1766_v46 = vmul.f32 %v2676_v41, %v3330_v30  ;;  %v2614_v47 = vpop.f32.mrb[30].mxu0 }
 0x164   : > { %v941_v48 = vpop.f32.mrb[31].mxu1  ;;  %v1900_v49 = vsel %vm1836_vm13, %v1804_v36, %v1868_v42  ;;  %v1806_v50 = vadd.f32 %v3335_v34, %v1767_v43  ;;  %v2677_v51 = vadd.f32 %v2614_v47, %v2502_v44  ;;  %v1690_v52 = vpop.f32.mrb[31].mxu0 }
 0x165   : > { %1933 = vst.msk [vmem:[%s3345_s14 + $0xd8] sm:$0xff] %vm1905_vm2, %v1900_v49  ;;  %v1899_v53 = vsel %vm1835_vm14, %v1803_v40, %v1867_v45  ;;  %v1805_v54 = vadd.f32 %v3335_v34, %v1766_v46  ;;  %v2678_v55 = vadd.f32 %v1690_v52, %v941_v48 }
 0x166   : > { %1932 = vst.msk [vmem:[%s3345_s14 + $0xd0] sm:$0xff] %vm1905_vm2, %v1899_v53  ;;  %vm1838_vm15 = vcmp.gt.f32.partialorder %v1806_v50, 0.0  ;;  %v1870_v56 = vmul.f32 0.2, %v1806_v50  ;;  %v1769_v57 = vmul.f32 %v2677_v51, %v3330_v30 }
 0x167   : > { %vm1837_vm0 = vcmp.gt.f32.partialorder %v1805_v54, 0.0  ;;  %v1869_v58 = vmul.f32 0.2, %v1805_v54  ;;  %v1768_v59 = vmul.f32 %v2678_v55, %v3330_v30 }
 0x168   : > { %v1902_v60 = vsel %vm1838_vm15, %v1806_v50, %v1870_v56  ;;  %v1808_v61 = vadd.f32 %v3335_v34, %v1769_v57 }
 0x169   : > { %1935 = vst.msk [vmem:[%s3345_s14 + $0xe8] sm:$0xff] %vm1905_vm2, %v1902_v60  ;;  %v1901_v62 = vsel %vm1837_vm0, %v1805_v54, %v1869_v58  ;;  %v1807_v63 = vadd.f32 %v3335_v34, %v1768_v59 }
 0x16a   : > { %1934 = vst.msk [vmem:[%s3345_s14 + $0xe0] sm:$0xff] %vm1905_vm2, %v1901_v62  ;;  %vm1840_vm1 = vcmp.gt.f32.partialorder %v1808_v61, 0.0  ;;  %v1872_v0 = vmul.f32 0.2, %v1808_v61 }
 0x16b   : > { %vm1839_vm3 = vcmp.gt.f32.partialorder %v1807_v63, 0.0  ;;  %v1871_v1 = vmul.f32 0.2, %v1807_v63 }
 0x16c   : > { %v1904_v2 = vsel %vm1840_vm1, %v1808_v61, %v1872_v0 }
 0x16d   : > { %1937 = vst.msk [vmem:[%s3345_s14 + $0xf8] sm:$0xff] %vm1905_vm2, %v1904_v2  ;;  %v1903_v3 = vsel %vm1839_vm3, %v1807_v63, %v1871_v1 }
 0x16e   : > { %1936 = vst.msk [vmem:[%s3345_s14 + $0xf0] sm:$0xff] %vm1905_vm2, %v1903_v3 }
 0x16f PF: > { %s14_s17 = sadd.s32 1, %s2790_s17   ;;  %s3485_s15 = smov %s2786_s16 }
 0x170   : > { %p11_p5 = scmp.ge.s32.totalorder %s14_s17, 4   ;;  %s3486_s16 = smov %s3488_s18 }
 0x172   :  { %13 = sbr.rel (!%p11_p5) target bundleno = 2 (0x2), region = 70 }

// kernel: _lambda_.5
= control target key start
LH: loop header
LB: loop body
LE: loop exit
PB: predicated region body
PF: predicated region fallthrough
CT: control target
= control target key end

     0   :  { %s1426_s18 = smov 0   ;;  %s1428_s19 = smov 0   ;;  %s1664_s0 = inlined_call_operand.vmem [shape: f32[2,1,9,9,64], index: 0, kind: input, shape index: {}]   ;;  %s1665_s1 = inlined_call_operand.vmem [shape: f32[4,64,32], index: 1, kind: input, shape index: {}]   ;;  %s1666_s2 = inlined_call_operand.vmem [shape: f32[1,32], index: 2, kind: input, shape index: {}]   ;;  %s1667_s3 = inlined_call_operand.vmem [shape: f32[1,32], index: 3, kind: input, shape index: {}]   ;;  %s1668_s4 = inlined_call_operand.vmem [shape: f32[1,32], index: 4, kind: input, shape index: {}]   ;;  %s1669_s5 = inlined_call_operand.vmem [shape: f32[2,1], index: 5, kind: output, shape index: {}]  }
   0x1   :  { %s1430_s20 = smov 0  }
   0x2 LB: > { %s27_s21 = sadd.s32 1, %s1389_s19  ;;  %p998_p0 = scmp.ge.s32.totalorder %s1393_s20, 1  ;;  %s1393_s20 = sphi %s1430_s20, %s15_s20   ;;  %s1389_s19 = sphi %s1428_s19, %s1671_s19   ;;  %s1385_s18 = sphi %s1426_s18, %s1670_s18  }
   0x3   : > { %p29_p1 = scmp.ge.s32.totalorder %s27_s21, 2  ;;  %p200_p2 = scmp.lt.s32.totalorder %s1393_s20, 3 }
   0x5   : > { %s1673_s21 = smov (%p29_p1, %s27_s21), 0  ;;  %p201_p3 = pnand %p998_p0, %p200_p2 }
   0x6   : > { %v1000_v0 = vld [vmem:[%s1665_s1 + $0x40] sm:$0xff] (!%p201_p3)  ;;  %v1001_v1 = vld [vmem:[%s1665_s1 + $0x48] sm:$0xff] (!%p201_p3)  ;;  %p227_p4 = scmp.lt.s32.totalorder (!%p201_p3), %s1385_s18, 1  ;;  %v1002_v5 = vld [vmem:[%s1665_s1 + $0x50] sm:$0xff] (!%p201_p3)  ;;  %vm269_vm0 = vcmask (!%p201_p3), 523264   ;;  %vm906_vm3 = vcmask (!%p201_p3), 261120  }
   0x7   : > { %204 = sbr.rel (%p201_p3) target bundleno = 497 (0x1f1), region = 40  ;;  %v1032_v2 = vld [vmem:[%s1665_s1 + $0x80] sm:$0xff] (!%p201_p3)  ;;  %v1255_v3 = vpack.c.bf16 (!%p201_p3), %v1001_v1, %v1000_v0  ;;  %v1033_v4 = vld [vmem:[%s1665_s1 + $0x88] sm:$0xff] (!%p201_p3)  ;;  %v1003_v6 = vld [vmem:[%s1665_s1 + $0x58] sm:$0xff] (!%p201_p3)  ;;  %p932_p5 = scmp.eq.s32.totalorder (!%p201_p3), %s1385_s18, 0 }
   0x8   : > { %v1287_v7 = vpack.c.bf16 (!%p201_p3), %v1033_v4, %v1032_v2  ;;  %v1259_v8 = vpack.c.bf16 (!%p201_p3), %v1003_v6, %v1002_v5  ;;  %v1034_v9 = vld [vmem:[%s1665_s1 + $0x90] sm:$0xff] (!%p201_p3)  ;;  %v1035_v10 = vld [vmem:[%s1665_s1 + $0x98] sm:$0xff] (!%p201_p3)  ;;  %v1004_v11 = vld [vmem:[%s1665_s1 + $0x60] sm:$0xff] (!%p201_p3) }
   0x9   : > { %1256 = vmatprep.subr.bf16.mxu1 (!%p201_p3), %v1255_v3  ;;  %v1291_v12 = vpack.c.bf16 (!%p201_p3), %v1035_v10, %v1034_v9  ;;  %v1005_v13 = vld [vmem:[%s1665_s1 + $0x68] sm:$0xff] (!%p201_p3)  ;;  %v1036_v14 = vld [vmem:[%s1665_s1 + $0xa0] sm:$0xff] (!%p201_p3)  ;;  %v1006_v18 = vld [vmem:[%s1665_s1 + $0x70] sm:$0xff] (!%p201_p3) }
   0xa   : > { %v1037_v15 = vld [vmem:[%s1665_s1 + $0xa8] sm:$0xff] (!%p201_p3)  ;;  %1288 = vmatprep.subr.bf16.mxu0 (!%p201_p3), %v1287_v7  ;;  %1258 = vmatpush3.bf16.msra.mxu1 (!%p201_p3), %v1255_v3  ;;  %v1263_v16 = vpack.c.bf16 (!%p201_p3), %v1005_v13, %v1004_v11  ;;  %v1007_v19 = vld [vmem:[%s1665_s1 + $0x78] sm:$0xff] (!%p201_p3)  ;;  %v1038_v20 = vld [vmem:[%s1665_s1 + $0xb0] sm:$0xff] (!%p201_p3) }
   0xb   : > { %1290 = vmatpush3.bf16.msra.mxu0 (!%p201_p3), %v1287_v7  ;;  %1260 = vmatprep.subr.bf16.mxu1 (!%p201_p3), %v1259_v8  ;;  %v1295_v17 = vpack.c.bf16 (!%p201_p3), %v1037_v15, %v1036_v14  ;;  %v1039_v21 = vld [vmem:[%s1665_s1 + $0xb8] sm:$0xff] (!%p201_p3)  ;;  %v1267_v24 = vpack.c.bf16 (!%p201_p3), %v1007_v19, %v1006_v18  ;;  %v244_v26 = vld [vmem:[%s1665_s1] sm:$0xff] (!%p201_p3)  ;;  %v245_v27 = vld [vmem:[%s1665_s1 + $0x8] sm:$0xff] (!%p201_p3) }
   0xc   : > { %1292 = vmatprep.subr.bf16.mxu0 (!%p201_p3), %v1291_v12  ;;  %v1299_v25 = vpack.c.bf16 (!%p201_p3), %v1039_v21, %v1038_v20  ;;  %v1056_v28 = vld [vmem:[%s1665_s1 + $0xc0] sm:$0xff] (!%p201_p3)  ;;  %v1057_v29 = vld [vmem:[%s1665_s1 + $0xc8] sm:$0xff] (!%p201_p3)  ;;  %v1271_v30 = vpack.c.bf16 (!%p201_p3), %v245_v27, %v244_v26  ;;  %v246_v32 = vld [vmem:[%s1665_s1 + $0x10] sm:$0xff] (!%p201_p3) }
   0xd   : > { %v1303_v31 = vpack.c.bf16 (!%p201_p3), %v1057_v29, %v1056_v28  ;;  %v247_v33 = vld [vmem:[%s1665_s1 + $0x18] sm:$0xff] (!%p201_p3)  ;;  %v1058_v35 = vld [vmem:[%s1665_s1 + $0xd0] sm:$0xff] (!%p201_p3)  ;;  %v248_v42 = vld [vmem:[%s1665_s1 + $0x20] sm:$0xff] (!%p201_p3) }
   0xe   : > { %s228_s15 = scalar_select %p227_p4, %s1385_s18, 1  ;;  %1262 = vmatpush3.bf16.msra.mxu1 %v1259_v8  ;;  %v1059_v36 = vld [vmem:[%s1665_s1 + $0xd8] sm:$0xff]  ;;  %v1275_v39 = vpack.c.bf16 %v247_v33, %v246_v32  ;;  %v249_v43 = vld [vmem:[%s1665_s1 + $0x28] sm:$0xff]  ;;  %v1060_v45 = vld [vmem:[%s1665_s1 + $0xe0] sm:$0xff] }
   0xf   : > { %1294 = vmatpush3.bf16.msra.mxu0 %v1291_v12  ;;  %1264 = vmatprep.subr.bf16.mxu1 %v1263_v16  ;;  %v1307_v41 = vpack.c.bf16 %v1059_v36, %v1058_v35  ;;  %v1061_v46 = vld [vmem:[%s1665_s1 + $0xe8] sm:$0xff]  ;;  %v1279_v49 = vpack.c.bf16 %v249_v43, %v248_v42  ;;  %v250_v52 = vld [vmem:[%s1665_s1 + $0x30] sm:$0xff]  ;;  %v251_v53 = vld [vmem:[%s1665_s1 + $0x38] sm:$0xff]  ;;  %vm938_vm10 = vcmask (%p932_p5), 1024  }
  0x10   : > { %s1343_s26 = smul.u32 144, %s228_s15  ;;  %1296 = vmatprep.subr.bf16.mxu0 %v1295_v17  ;;  %v1311_v51 = vpack.c.bf16 %v1061_v46, %v1060_v45  ;;  %v1062_v55 = vld [vmem:[%s1665_s1 + $0xf0] sm:$0xff]  ;;  %v1063_v56 = vld [vmem:[%s1665_s1 + $0xf8] sm:$0xff]  ;;  %v1283_v59 = vpack.c.bf16 %v251_v53, %v250_v52  ;;  %v1072_v4 = vld [vmem:[%s1666_s2] ss:$0 sm:$0xff] }
  0x11   : > { %v1315_v61 = vpack.c.bf16 %v1063_v56, %v1062_v55  ;;  %v1613_v8 = vld [vmem:[%s1667_s3] ss:$0 sm:$0xff] }
  0x12   : > { %s1496_s10 = scalar_lea.vmem %s1664_s0, %s1343_s26  ;;  %1266 = vmatpush3.bf16.msra.mxu1 %v1263_v16  ;;  %v1620_v21 = vld [vmem:[%s1668_s4] ss:$0 sm:$0xff] }
  0x13   : > { %v252_v22 = vld [vmem:[%s1496_s10 + $0x1] sm:$0xff]  ;;  %v1503_v23 = vld [vmem:[%s1496_s10 + $0x10] sm:$0xff]  ;;  %1298 = vmatpush3.bf16.msra.mxu0 %v1295_v17  ;;  %1268 = vmatprep.subr.bf16.mxu1 %v1267_v24 }
  0x14   : > { %1159 = vmatprep.mubr.msk.f32.mxu1 %vm269_vm0, %v252_v22  ;;  %1215 = vmatprep.mubr.msk.f32.mxu0 %vm269_vm0, %v1503_v23  ;;  %v1527_v34 = vld [vmem:[%s1496_s10 + $0x11] sm:$0xff]  ;;  %v1025_v37 = vld [vmem:[%s1496_s10 + $0x20] sm:$0xff] }
  0x15   : > { %1300 = vmatprep.subr.bf16.mxu0 %v1299_v25  ;;  %v254_v38 = vld [vmem:[%s1496_s10 + $0x21] sm:$0xff]  ;;  %v1026_v40 = vld [vmem:[%s1496_s10 + $0x30] sm:$0xff] }
  0x16   : > { %1270 = vmatpush3.bf16.msra.mxu1 %v1267_v24  ;;  %v255_v44 = vld [vmem:[%s1496_s10 + $0x31] sm:$0xff]  ;;  %v1027_v47 = vld [vmem:[%s1496_s10 + $0x40] sm:$0xff] }
  0x17   : > { %1302 = vmatpush3.bf16.msra.mxu0 %v1299_v25  ;;  %1272 = vmatprep.subr.bf16.mxu1 %v1271_v30  ;;  %v256_v48 = vld [vmem:[%s1496_s10 + $0x41] sm:$0xff]  ;;  %v1028_v50 = vld [vmem:[%s1496_s10 + $0x50] sm:$0xff] }
  0x18   : > { %1304 = vmatprep.subr.bf16.mxu0 %v1303_v31  ;;  %v257_v54 = vld [vmem:[%s1496_s10 + $0x51] sm:$0xff]  ;;  %v1029_v57 = vld [vmem:[%s1496_s10 + $0x60] sm:$0xff] }
  0x19   : > { %1160 = vmatmul.mubr.msk.f32.vlgmr.msra.gmra.mrb[0].mxu1 %vm269_vm0, %v1527_v34  ;;  %v258_v58 = vld [vmem:[%s1496_s10 + $0x61] sm:$0xff]  ;;  %v1030_v60 = vld [vmem:[%s1496_s10 + $0x70] sm:$0xff] }
  0x1a   : > { %1216 = vmatmul.mubr.msk.f32.vlgmr.msra.gmra.mrb[0].mxu0 %vm269_vm0, %v1025_v37  ;;  %1274 = vmatpush3.bf16.msra.mxu1 %v1271_v30  ;;  %v259_v62 = vld [vmem:[%s1496_s10 + $0x71] sm:$0xff]  ;;  %v1031_v63 = vld [vmem:[%s1496_s10 + $0x80] sm:$0xff] }
  0x1b   : > { %1306 = vmatpush3.bf16.msra.mxu0 %v1303_v31  ;;  %1162 = vmatprep.mubr.msk.f32.mxu1 %vm269_vm0, %v254_v38  ;;  %v236_v0 = vld [vmem:[%s1496_s10] sm:$0xff] }
  0x1c   : > { %1218 = vmatprep.mubr.msk.f32.mxu0 %vm269_vm0, %v1026_v40  ;;  %1276 = vmatprep.subr.bf16.mxu1 %v1275_v39  ;;  %v1055_v1 = vld [vmem:[%s1496_s10 + $0x81] sm:$0xff] }
  0x1d   : > { %1163 = vmatmul.mubr.msk.f32.gmra.mrb[2].mxu1 %vm269_vm0, %v255_v44  ;;  %1308 = vmatprep.subr.bf16.mxu0 %v1307_v41 }
  0x1e   : > { %1219 = vmatmul.mubr.msk.f32.gmra.mrb[2].mxu0 %vm269_vm0, %v1027_v47  ;;  %1278 = vmatpush3.bf16.msra.mxu1 %v1275_v39 }
  0x1f   : > { %1310 = vmatpush3.bf16.msra.mxu0 %v1307_v41  ;;  %1165 = vmatprep.mubr.msk.f32.mxu1 %vm269_vm0, %v256_v48 }
  0x20   : > { %1221 = vmatprep.mubr.msk.f32.mxu0 %vm269_vm0, %v1028_v50  ;;  %1280 = vmatprep.subr.bf16.mxu1 %v1279_v49 }
  0x21   : > { %1166 = vmatmul.mubr.msk.f32.gmra.mrb[4].mxu1 %vm269_vm0, %v257_v54  ;;  %1312 = vmatprep.subr.bf16.mxu0 %v1311_v51 }
  0x22   : > { %1222 = vmatmul.mubr.msk.f32.gmra.mrb[4].mxu0 %vm269_vm0, %v1029_v57  ;;  %1282 = vmatpush3.bf16.msra.mxu1 %v1279_v49 }
  0x23   : > { %1314 = vmatpush3.bf16.msra.mxu0 %v1311_v51  ;;  %1168 = vmatprep.mubr.msk.f32.mxu1 %vm269_vm0, %v258_v58 }
  0x24   : > { %1224 = vmatprep.mubr.msk.f32.mxu0 %vm269_vm0, %v1030_v60  ;;  %1284 = vmatprep.subr.bf16.mxu1 %v1283_v59 }
  0x25   : > { %1169 = vmatmul.mubr.msk.f32.gmra.mrb[6].mxu1 %vm269_vm0, %v259_v62  ;;  %1316 = vmatprep.subr.bf16.mxu0 %v1315_v61 }
  0x26   : > { %1225 = vmatmul.mubr.msk.f32.gmra.mrb[6].mxu0 %vm269_vm0, %v1031_v63  ;;  %1286 = vmatpush3.bf16.msra.mxu1 %v1283_v59 }
  0x27   : > { %1318 = vmatpush3.bf16.msra.mxu0 %v1315_v61  ;;  %1187 = vmatprep.mubr.msk.f32.mxu1 %vm269_vm0, %v236_v0 }
  0x28   : > { %1243 = vmatprep.mubr.msk.f32.mxu0 %vm269_vm0, %v1527_v34 }
  0x29   : > { %1188 = vmatmul.mubr.msk.f32.vlgmr.msra.gmra.mrb[0].mxu1 %vm269_vm0, %v1503_v23 }
  0x2a   : > { %1244 = vmatmul.mubr.msk.f32.vlgmr.msra.gmra.mrb[0].mxu0 %vm269_vm0, %v254_v38  ;;  %1190 = vmatprep.mubr.msk.f32.mxu1 %vm269_vm0, %v1025_v37 }
  0x2b   : > { %1246 = vmatprep.mubr.msk.f32.mxu0 %vm269_vm0, %v255_v44 }
  0x2d   : > { %1191 = vmatmul.mubr.msk.f32.gmra.mrb[2].mxu1 %vm269_vm0, %v1026_v40 }
  0x2e   : > { %1247 = vmatmul.mubr.msk.f32.gmra.mrb[2].mxu0 %vm269_vm0, %v256_v48  ;;  %1193 = vmatprep.mubr.msk.f32.mxu1 %vm269_vm0, %v1027_v47 }
  0x2f   : > { %1249 = vmatprep.mubr.msk.f32.mxu0 %vm269_vm0, %v257_v54 }
  0x31   : > { %1194 = vmatmul.mubr.msk.f32.gmra.mrb[4].mxu1 %vm269_vm0, %v1028_v50 }
  0x32   : > { %1250 = vmatmul.mubr.msk.f32.gmra.mrb[4].mxu0 %vm269_vm0, %v258_v58  ;;  %1196 = vmatprep.mubr.msk.f32.mxu1 %vm269_vm0, %v1029_v57 }
  0x33   : > { %1252 = vmatprep.mubr.msk.f32.mxu0 %vm269_vm0, %v259_v62 }
  0x35   : > { %1197 = vmatmul.mubr.msk.f32.gmra.mrb[6].mxu1 %vm269_vm0, %v1030_v60 }
  0x36   : > { %1253 = vmatmul.mubr.msk.f32.gmra.mrb[6].mxu0 %vm269_vm0, %v1055_v1 }
  0xfc   : > { %v1189_v2 = vpop.f32.mrb[0].mxu1 }
  0xfd   : > { %v1245_v3 = vpop.f32.mrb[0].mxu0  ;;  %v489_v5 = vpop.f32.mrb[1].mxu1 }
  0xfe   : > { %v1319_v6 = vadd.f32 %v1245_v3, %v1189_v2  ;;  %v790_v7 = vpop.f32.mrb[1].mxu0 }
  0xff   : > { %v1320_v9 = vadd.f32 %v790_v7, %v489_v5 }
 0x100   : > { %v845_v10 = vmul.f32 %v1319_v6, %v1072_v4  ;;  %v1192_v11 = vpop.f32.mrb[2].mxu1 }
 0x101   : > { %v844_v12 = vmul.f32 %v1320_v9, %v1072_v4  ;;  %v1248_v13 = vpop.f32.mrb[2].mxu0  ;;  %v499_v14 = vpop.f32.mrb[3].mxu1 }
 0x102   : > { %v860_v15 = vadd.f32 %v1613_v8, %v845_v10  ;;  %v1321_v16 = vadd.f32 %v1248_v13, %v1192_v11  ;;  %v800_v17 = vpop.f32.mrb[3].mxu0 }
 0x103   : > { %v859_v18 = vadd.f32 %v1613_v8, %v844_v12  ;;  %v1322_v19 = vadd.f32 %v800_v17, %v499_v14 }
 0x104   : > { %vm868_vm1 = vcmp.gt.f32.partialorder %v860_v15, 0.0  ;;  %v876_v20 = vmul.f32 0.2, %v860_v15  ;;  %v847_v22 = vmul.f32 %v1321_v16, %v1072_v4  ;;  %v1195_v23 = vpop.f32.mrb[4].mxu1 }
 0x105   : > { %vm867_vm2 = vcmp.gt.f32.partialorder %v859_v18, 0.0  ;;  %v875_v24 = vmul.f32 0.2, %v859_v18  ;;  %v846_v25 = vmul.f32 %v1322_v19, %v1072_v4  ;;  %v1251_v26 = vpop.f32.mrb[4].mxu0  ;;  %v509_v27 = vpop.f32.mrb[5].mxu1 }
 0x106   : > { %v884_v28 = vsel %vm868_vm1, %v860_v15, %v876_v20  ;;  %v862_v29 = vadd.f32 %v1613_v8, %v847_v22  ;;  %v1323_v30 = vadd.f32 %v1251_v26, %v1195_v23  ;;  %v810_v31 = vpop.f32.mrb[5].mxu0 }
 0x107   : > { %v899_v32 = vmul.f32 %v1620_v21, %v884_v28  ;;  %v883_v33 = vsel %vm867_vm2, %v859_v18, %v875_v24  ;;  %v861_v34 = vadd.f32 %v1613_v8, %v846_v25  ;;  %v1324_v35 = vadd.f32 %v810_v31, %v509_v27 }
 0x108   : > { %v898_v36 = vmul.f32 %v1620_v21, %v883_v33  ;;  %vm870_vm4 = vcmp.gt.f32.partialorder %v862_v29, 0.0  ;;  %v878_v37 = vmul.f32 0.2, %v862_v29  ;;  %v849_v38 = vmul.f32 %v1323_v30, %v1072_v4  ;;  %v1198_v39 = vpop.f32.mrb[6].mxu1 }
 0x109   : > { %v908_v40 = vsel %vm906_vm3, %v899_v32, 0.0  ;;  %vm869_vm5 = vcmp.gt.f32.partialorder %v861_v34, 0.0  ;;  %v877_v41 = vmul.f32 0.2, %v861_v34  ;;  %v848_v42 = vmul.f32 %v1324_v35, %v1072_v4  ;;  %v1254_v43 = vpop.f32.mrb[6].mxu0  ;;  %v519_v44 = vpop.f32.mrb[7].mxu1 }
 0x10a   : > { %v907_v45 = vsel %vm906_vm3, %v898_v36, 0.0  ;;  %v886_v46 = vsel %vm870_vm4, %v862_v29, %v878_v37  ;;  %v864_v47 = vadd.f32 %v1613_v8, %v849_v38  ;;  %v1325_v48 = vadd.f32 %v1254_v43, %v1198_v39  ;;  %v820_v49 = vpop.f32.mrb[7].mxu0 }
 0x10b   : > { %v901_v50 = vmul.f32 %v1620_v21, %v886_v46  ;;  %v885_v51 = vsel %vm869_vm5, %v861_v34, %v877_v41  ;;  %v863_v52 = vadd.f32 %v1613_v8, %v848_v42  ;;  %v1326_v53 = vadd.f32 %v820_v49, %v519_v44 }
 0x10c   : > { %v900_v54 = vmul.f32 %v1620_v21, %v885_v51  ;;  %vm872_vm6 = vcmp.gt.f32.partialorder %v864_v47, 0.0  ;;  %v880_v55 = vmul.f32 0.2, %v864_v47  ;;  %v851_v56 = vmul.f32 %v1325_v48, %v1072_v4 }
 0x10d   : > { %vm871_vm7 = vcmp.gt.f32.partialorder %v863_v52, 0.0  ;;  %v879_v57 = vmul.f32 0.2, %v863_v52  ;;  %v850_v58 = vmul.f32 %v1326_v53, %v1072_v4  ;;  %v909_v59 = vadd.f32 %v908_v40, %v907_v45 }
 0x10e   : > { %v866_v60 = vadd.f32 %v1613_v8, %v851_v56  ;;  %v888_v61 = vsel %vm872_vm6, %v864_v47, %v880_v55  ;;  %v910_v62 = vsel %vm906_vm3, %v900_v54, 0.0  ;;  %v912_v2 = vsel %vm906_vm3, %v901_v50, 0.0 }
 0x10f   : > { %v887_v63 = vsel %vm871_vm7, %v863_v52, %v879_v57  ;;  %v865_v0 = vadd.f32 %v1613_v8, %v850_v58  ;;  %v911_v1 = vadd.f32 %v910_v62, %v909_v59  ;;  %v903_v6 = vmul.f32 %v1620_v21, %v888_v61 }
 0x110   : > { %vm874_vm8 = vcmp.gt.f32.partialorder %v866_v60, 0.0  ;;  %v882_v3 = vmul.f32 0.2, %v866_v60  ;;  %v902_v5 = vmul.f32 %v1620_v21, %v887_v63 }
 0x111   : > { %v881_v7 = vmul.f32 0.2, %v865_v0  ;;  %vm873_vm9 = vcmp.gt.f32.partialorder %v865_v0, 0.0  ;;  %v913_v4 = vadd.f32 %v912_v2, %v911_v1  ;;  %v916_v14 = vsel %vm906_vm3, %v903_v6, 0.0 }
 0x112   : > { %v890_v9 = vsel %vm874_vm8, %v866_v60, %v882_v3  ;;  %v914_v10 = vsel %vm906_vm3, %v902_v5, 0.0 }
 0x113   : > { %v889_v11 = vsel %vm873_vm9, %v865_v0, %v881_v7  ;;  %v915_v12 = vadd.f32 %v914_v10, %v913_v4  ;;  %v905_v13 = vmul.f32 %v1620_v21, %v890_v9 }
 0x114   : > { %v904_v8 = vmul.f32 %v1620_v21, %v889_v11  ;;  %v1395_v21 = vmov (%p932_p5), 0.0  }
 0x115   : > { %v917_v15 = vadd.f32 %v916_v14, %v915_v12  ;;  %v920_v18 = vsel %vm906_vm3, %v905_v13, 0.0  ;;  %939 = vst.msk [vmem:[%s1669_s5] sm:$0x3] (%p932_p5), %vm938_vm10, %v1395_v21 }
 0x116   : > { %v918_v16 = vsel %vm906_vm3, %v904_v8, 0.0 }
 0x117   : > { %v919_v17 = vadd.f32 %v918_v16, %v917_v15 }
 0x119   : > { %v921_v19 = vadd.f32 %v920_v18, %v919_v17 }
 0x11b   : > { %922 = vadd.xlane.f32.xlu0 %v921_v19 }
 0x1a8   : > { %v923_v20 = vpop.xlane.xlu0 %922 }
 0x1a9   : > { %v924_v22 = vrot.slane %v923_v20, 4 }
 0x1ab   : > { %v925_v23 = vadd.f32 %v924_v22, %v923_v20 }
 0x1ad   : > { %v926_v24 = vrot.slane %v925_v23, 2 }
 0x1af   : > { %v927_v25 = vadd.f32 %v926_v24, %v925_v23 }
 0x1b1   : > { %v928_v26 = vrot.slane %v927_v25, 1 }
 0x1b3   : > { %v929_v27 = vadd.f32 %v928_v26, %v927_v25 }
 0x1b5   : > { %1344 = vpush %v929_v27 }
 0x1e1   : > { %937 = sbr.rel (!%p932_p5) target bundleno = 488 (0x1e8), region = 44 }
 0x1e6   : > { %s1345_s9 = spop %1344 }
 0x1e7   : > { %s931_s11 = smul.f32 0.015625, %s1345_s9 }
 0x1e8 PF: > { %v940_v28 = vlaneseq  ;;  %v943_v29 = vstv %s1385_s18  ;;  %v942_v32 = vld [vmem:[%s1669_s5] sm:$0x3]  ;;  %vm948_vm12 = vcmask 1024  }
 0x1e9   : > { %v945_v31 = vstv %s931_s11 }
 0x1ea   : > { %v941_v30 = vshrl.u32 %v940_v28, 7 }
 0x1ec   : > { %vm944_vm11 = vcmp.eq.s32.totalorder %v941_v30, %v943_v29 }
 0x1ed   : > { %v946_v33 = vsel %vm944_vm11, %v945_v31, 0.0 }
 0x1ee   : > { %v947_v34 = vadd.f32 %v946_v33, %v942_v32 }
 0x1f0   : > { %949 = vst.msk [vmem:[%s1669_s5] sm:$0x3] %vm948_vm12, %v947_v34 }
 0x1f1 PF: > { %s15_s20 = sadd.s32 1, %s1393_s20   ;;  %s1670_s18 = smov %s1389_s19 }
 0x1f2   : > { %p12_p6 = scmp.ge.s32.totalorder %s15_s20, 4   ;;  %s1671_s19 = smov %s1673_s21 }
 0x1f4   :  { %14 = sbr.rel (!%p12_p6) target bundleno = 2 (0x2), region = 74 }

</bundles_post_ra>
